<compile_context>
chip_gen: v7x
topology: tpu7x:2x2x1
jax: 0.10.0
libtpu: 0.0.40
codegen_flags: <defaults>
</compile_context>

<pallas_src>
import jax
import jax.numpy as jnp
from jax import lax
from jax.experimental import pallas as pl
from jax.experimental.pallas import tpu as pltpu


# ----------------------------------------------------------------------------------
# Fused Pallas kernel
# ----------------------------------------------------------------------------------
def _lstm_cell(gx_t, h, c, whh_ref, H):
    """One LSTM step.  gx_t already contains x_t @ W_ih^T + b_ih + b_hh (precomputed).
    PyTorch gate order (i, f, g, o).  whh_ref = W_hh^T, shape [H, 4H]."""
    gates = gx_t + jnp.dot(h, whh_ref[...], preferred_element_type=jnp.float32)  # [N, 4H]
    i = jax.nn.sigmoid(gates[:, 0:H])
    f = jax.nn.sigmoid(gates[:, H:2 * H])
    g = jnp.tanh(gates[:, 2 * H:3 * H])
    o = jax.nn.sigmoid(gates[:, 3 * H:4 * H])
    c_new = f * c + i * g
    h_new = o * jnp.tanh(c_new)
    return h_new, c_new


def speakaddr_kernel(x_enc_ref, dec_tgt_ref, user_emb_ref,
                     wih_f_ref, whh_f_ref, b_f_ref,
                     wih_b_ref, whh_b_ref, b_b_ref,
                     w_cth_ref, b_cth_ref, w_ctc_ref, b_ctc_ref,
                     wih_de_ref, wih_du_ref, whh_d_ref, b_d_ref,
                     w_out_ref, b_out_ref,
                     logits_ref,
                     gxf_ref, gxb_ref, gxd_ref, hdec_ref):
    Lenc, N, E = x_enc_ref.shape
    Ldec = dec_tgt_ref.shape[0]
    He = whh_f_ref.shape[0]
    Hd = whh_d_ref.shape[0]
    V = w_out_ref.shape[1]

    # ---------------- batched input-side gate precompute (bias folded in) ----------------
    x2d = x_enc_ref[...].reshape(Lenc * N, E)                                     # [Lenc*N, E]
    gxf_ref[...] = (jnp.dot(x2d, wih_f_ref[...], preferred_element_type=jnp.float32)
                    + b_f_ref[...]).reshape(Lenc, N, 4 * He)
    gxb_ref[...] = (jnp.dot(x2d, wih_b_ref[...], preferred_element_type=jnp.float32)
                    + b_b_ref[...]).reshape(Lenc, N, 4 * He)

    # decoder: target-embedding part batched over time; user part is time-invariant,
    # computed once and broadcast-added (bias folded here).
    t2d = dec_tgt_ref[...].reshape(Ldec * N, E)                                   # [Ldec*N, E]
    gu = (jnp.dot(user_emb_ref[...], wih_du_ref[...], preferred_element_type=jnp.float32)
          + b_d_ref[...])                                                         # [N, 4Hd]
    gxd_ref[...] = (jnp.dot(t2d, wih_de_ref[...], preferred_element_type=jnp.float32)
                    .reshape(Ldec, N, 4 * Hd) + gu[None, :, :])

    # ---------------- encoder: fwd + bwd interleaved in one recurrence loop ----------------
    zeros_e = jnp.zeros((N, He), jnp.float32)

    def enc_body(t, carry):
        h_f, c_f, h_b, c_b = carry
        h_f, c_f = _lstm_cell(gxf_ref[t], h_f, c_f, whh_f_ref, He)
        h_b, c_b = _lstm_cell(gxb_ref[Lenc - 1 - t], h_b, c_b, whh_b_ref, He)
        return (h_f, c_f, h_b, c_b)

    h_f, c_f, h_b, c_b = lax.fori_loop(
        0, Lenc, enc_body, (zeros_e, zeros_e, zeros_e, zeros_e), unroll=True)

    # ---------------- context2decoder FeedForward (Linear + Tanh) ----------------
    # encoder_hidden.transpose(1,0).view(N, -1) == concat[fwd, bwd] on features;
    # implemented as two dots against the two row-halves of W (no lane concat).
    w_cth = w_cth_ref[...]
    w_ctc = w_ctc_ref[...]
    dec_h0 = jnp.tanh(jnp.dot(h_f, w_cth[:He], preferred_element_type=jnp.float32)
                      + jnp.dot(h_b, w_cth[He:], preferred_element_type=jnp.float32)
                      + b_cth_ref[...])                                           # [N, Hd]
    dec_c0 = jnp.tanh(jnp.dot(c_f, w_ctc[:He], preferred_element_type=jnp.float32)
                      + jnp.dot(c_b, w_ctc[He:], preferred_element_type=jnp.float32)
                      + b_ctc_ref[...])                                           # [N, Hd]

    # ---------------- decoder LSTM (output projection hoisted out of the loop) ----------------
    def dec_body(t, hc):
        h, c = hc
        h_new, c_new = _lstm_cell(gxd_ref[t], h, c, whh_d_ref, Hd)
        hdec_ref[t] = h_new
        return (h_new, c_new)

    lax.fori_loop(0, Ldec, dec_body, (dec_h0, dec_c0), unroll=True)

    # ---------------- output projection: one big MXU push + one lane-dense store ----------------
    h_all = hdec_ref[...].reshape(Ldec * N, Hd)                                   # [Ldec*N, Hd]
    logits = (jnp.dot(h_all, w_out_ref[...], preferred_element_type=jnp.float32)
              + b_out_ref[...])                                                   # [Ldec*N, V]
    logits_ref[...] = logits.reshape(Ldec, N, V)


# ----------------------------------------------------------------------------------
# pallas_call wrapper (single launch, everything VMEM-resident)
# ----------------------------------------------------------------------------------
def _full_spec(shape):
    n = len(shape)
    return pl.BlockSpec(shape, lambda: (0,) * n)


def speakaddr_pallas(x_enc, dec_tgt, user_emb, p):
    Lenc, N, _ = x_enc.shape
    Ldec = dec_tgt.shape[0]
    He = p["enc_fwd"]["whh"].shape[0]
    Hd = p["dec"]["whh"].shape[0]
    V = p["out_proj"]["w"].shape[1]

    args = (x_enc, dec_tgt, user_emb,
            p["enc_fwd"]["wih"], p["enc_fwd"]["whh"], p["enc_fwd"]["b"],
            p["enc_bwd"]["wih"], p["enc_bwd"]["whh"], p["enc_bwd"]["b"],
            p["ctx2dec_h"]["w"], p["ctx2dec_h"]["b"],
            p["ctx2dec_c"]["w"], p["ctx2dec_c"]["b"],
            p["dec"]["wih_emb"], p["dec"]["wih_user"], p["dec"]["whh"], p["dec"]["b"],
            p["out_proj"]["w"], p["out_proj"]["b"])

    return pl.pallas_call(
        speakaddr_kernel,
        out_shape=jax.ShapeDtypeStruct((Ldec, N, V), jnp.float32),
        in_specs=[_full_spec(a.shape) for a in args],
        out_specs=_full_spec((Ldec, N, V)),
        scratch_shapes=[
            pltpu.VMEM((Lenc, N, 4 * He), jnp.float32),   # enc-fwd input gates
            pltpu.VMEM((Lenc, N, 4 * He), jnp.float32),   # enc-bwd input gates
            pltpu.VMEM((Ldec, N, 4 * Hd), jnp.float32),   # decoder input gates (emb+user+bias)
            pltpu.VMEM((Ldec, N, Hd), jnp.float32),       # decoder hidden states
        ],
    )(*args)


# ----------------------------------------------------------------------------------
# SpeakAddr forward (decode=False, teacher-forcing path)
# ----------------------------------------------------------------------------------
@jax.jit
def speakaddr_forward(params, input_utterances, conv_users,
                      input_utterance_length, input_conversation_length,
                      target_utterances):
    # TODO(synk): input_utterance_length masking (pack_padded_sequence) not applied.
    del input_utterance_length, input_conversation_length

    # Embedding lookups stay in XLA (HBM gather); sequences are fed time-major.
    x_enc = jnp.transpose(jnp.take(params["embedding"], input_utterances, axis=0),
                          (1, 0, 2)).astype(jnp.float32)                     # [Lenc, N, E]
    dec_tgt = jnp.transpose(jnp.take(params["embedding"], target_utterances, axis=0),
                            (1, 0, 2)).astype(jnp.float32)                   # [Ldec, N, E] (tied)
    user_emb = jnp.take(params["user_embedding"], conv_users, axis=0
                        ).astype(jnp.float32)                                # [N, Eu]

    logits = speakaddr_pallas(x_enc, dec_tgt, user_emb, params)              # [Ldec, N, V]
    return jnp.transpose(logits, (1, 0, 2))                                  # [N, Ldec, V]


# ----------------------------------------------------------------------------------
# Deterministic parameter construction (PyTorch export mapping):
#   wih       = W_ih^T            [In, 4H]
#   whh       = W_hh^T            [H, 4H]
#   b         = b_ih + b_hh       [1, 4H]
#   decoder input rows are split into embedding rows (wih_emb) and user rows (wih_user)
#   so the time-invariant user contribution can be precomputed once.
# ----------------------------------------------------------------------------------
def init_params(key, V, U, E, Eu, He, Hd):
    ks = jax.random.split(key, 20)
    s = 0.1

    def nrm(k, shape):
        return jax.random.normal(k, shape, jnp.float32) * s

    return {
        "embedding": nrm(ks[0], (V, E)),
        "user_embedding": nrm(ks[1], (U, Eu)),
        "enc_fwd": {"wih": nrm(ks[2], (E, 4 * He)),
                    "whh": nrm(ks[3], (He, 4 * He)),
                    "b": nrm(ks[4], (1, 4 * He))},
        "enc_bwd": {"wih": nrm(ks[5], (E, 4 * He)),
                    "whh": nrm(ks[6], (He, 4 * He)),
                    "b": nrm(ks[7], (1, 4 * He))},
        "ctx2dec_h": {"w": nrm(ks[8], (2 * He, Hd)), "b": nrm(ks[9], (1, Hd))},
        "ctx2dec_c": {"w": nrm(ks[10], (2 * He, Hd)), "b": nrm(ks[11], (1, Hd))},
        "dec": {"wih_emb": nrm(ks[12], (E, 4 * Hd)),
                "wih_user": nrm(ks[13], (Eu, 4 * Hd)),
                "whh": nrm(ks[14], (Hd, 4 * Hd)),
                "b": nrm(ks[15], (1, 4 * Hd))},
        "out_proj": {"w": nrm(ks[16], (Hd, V)), "b": jnp.zeros((1, V), jnp.float32)},
    }


if __name__ == "__main__":
    # Small config implied by the module's forward:
    V, U = 128, 8            # vocab_size, user_size
    E, Eu = 32, 32           # embedding_size, user embedding size
    He, Hd = 32, 64          # encoder_hidden_size, decoder_hidden_size
    N = 8                    # num_utterances (batch of utterances)
    Lenc, Ldec = 8, 8        # encoder seq len, max_unroll

    key = jax.random.PRNGKey(0)
    kp, k1, k2, k3 = jax.random.split(key, 4)
    params = init_params(kp, V, U, E, Eu, He, Hd)

    input_utterances = jax.random.randint(k1, (N, Lenc), 0, V, dtype=jnp.int32)
    target_utterances = jax.random.randint(k2, (N, Ldec), 0, V, dtype=jnp.int32)
    conv_users = jax.random.randint(k3, (N,), 0, U, dtype=jnp.int32)
    input_utterance_length = jnp.full((N,), Lenc, dtype=jnp.int32)
    input_conversation_length = jnp.array([N // 2, N - N // 2], dtype=jnp.int32)

    out = speakaddr_forward(params, input_utterances, conv_users,
                            input_utterance_length, input_conversation_length,
                            target_utterances)
    out = jax.block_until_ready(out)
    assert out.shape == (N, Ldec, V), out.shape
    assert jnp.all(jnp.isfinite(out))
    print("KERNEL_OK")
</pallas_src>

<mosaic_0001>
module attributes {stable_mosaic.version = 11 : i64} {
  func.func @speakaddr_kernel(%arg0: memref<8x8x32xf32, #tpu.memory_space<vmem>>, %arg1: memref<8x8x32xf32, #tpu.memory_space<vmem>>, %arg2: memref<8x32xf32, #tpu.memory_space<vmem>>, %arg3: memref<32x128xf32, #tpu.memory_space<vmem>>, %arg4: memref<32x128xf32, #tpu.memory_space<vmem>>, %arg5: memref<1x128xf32, #tpu.memory_space<vmem>>, %arg6: memref<32x128xf32, #tpu.memory_space<vmem>>, %arg7: memref<32x128xf32, #tpu.memory_space<vmem>>, %arg8: memref<1x128xf32, #tpu.memory_space<vmem>>, %arg9: memref<64x64xf32, #tpu.memory_space<vmem>>, %arg10: memref<1x64xf32, #tpu.memory_space<vmem>>, %arg11: memref<64x64xf32, #tpu.memory_space<vmem>>, %arg12: memref<1x64xf32, #tpu.memory_space<vmem>>, %arg13: memref<32x256xf32, #tpu.memory_space<vmem>>, %arg14: memref<32x256xf32, #tpu.memory_space<vmem>>, %arg15: memref<64x256xf32, #tpu.memory_space<vmem>>, %arg16: memref<1x256xf32, #tpu.memory_space<vmem>>, %arg17: memref<64x128xf32, #tpu.memory_space<vmem>>, %arg18: memref<1x128xf32, #tpu.memory_space<vmem>>, %arg19: memref<8x8x128xf32, #tpu.memory_space<vmem>>, %arg20: memref<8x8x128xf32, #tpu.memory_space<vmem>>, %arg21: memref<8x8x128xf32, #tpu.memory_space<vmem>>, %arg22: memref<8x8x256xf32, #tpu.memory_space<vmem>>, %arg23: memref<8x8x64xf32, #tpu.memory_space<vmem>>) attributes {dimension_semantics = [], scalar_prefetch = 0 : i64, scratch_operands = 4 : i64, tpu.core_type = #tpu.core_type<tc>} {
    %c0 = arith.constant 0 : index
    %c0_0 = arith.constant 0 : index
    %c0_1 = arith.constant 0 : index
    %0 = vector.load %arg0[%c0, %c0_0, %c0_1] : memref<8x8x32xf32, #tpu.memory_space<vmem>>, vector<8x8x32xf32>
    %1 = vector.shape_cast %0 : vector<8x8x32xf32> to vector<64x32xf32>
    %c0_2 = arith.constant 0 : index
    %c0_3 = arith.constant 0 : index
    %2 = vector.load %arg3[%c0_2, %c0_3] : memref<32x128xf32, #tpu.memory_space<vmem>>, vector<32x128xf32>
    %cst = arith.constant dense<0.000000e+00> : vector<64x128xf32>
    %3 = tpu.matmul %1, %2, %cst {dimension_numbers = #tpu.dot_dimension_numbers<[1], [0], [0], [1], [0, 0, 1, 1], [], []>} : vector<64x32xf32>, vector<32x128xf32>, vector<64x128xf32> -> vector<64x128xf32>
    %c0_4 = arith.constant 0 : index
    %c0_5 = arith.constant 0 : index
    %4 = vector.load %arg5[%c0_4, %c0_5] : memref<1x128xf32, #tpu.memory_space<vmem>>, vector<1x128xf32>
    %5 = vector.broadcast %4 : vector<1x128xf32> to vector<64x128xf32>
    %6 = arith.addf %3, %5 : vector<64x128xf32>
    %7 = vector.shape_cast %6 : vector<64x128xf32> to vector<8x8x128xf32>
    %c0_6 = arith.constant 0 : index
    %c0_7 = arith.constant 0 : index
    %c0_8 = arith.constant 0 : index
    %8 = vector.load %arg20[%c0_6, %c0_7, %c0_8] : memref<8x8x128xf32, #tpu.memory_space<vmem>>, vector<8x8x128xf32>
    tpu.vector_store %arg20[%c0_6, %c0_7, %c0_8], %7 {strides = array<i32>} : memref<8x8x128xf32, #tpu.memory_space<vmem>>, vector<8x8x128xf32>,
    %c0_9 = arith.constant 0 : index
    %c0_10 = arith.constant 0 : index
    %9 = vector.load %arg6[%c0_9, %c0_10] : memref<32x128xf32, #tpu.memory_space<vmem>>, vector<32x128xf32>
    %cst_11 = arith.constant dense<0.000000e+00> : vector<64x128xf32>
    %10 = tpu.matmul %1, %9, %cst_11 {dimension_numbers = #tpu.dot_dimension_numbers<[1], [0], [0], [1], [0, 0, 1, 1], [], []>} : vector<64x32xf32>, vector<32x128xf32>, vector<64x128xf32> -> vector<64x128xf32>
    %c0_12 = arith.constant 0 : index
    %c0_13 = arith.constant 0 : index
    %11 = vector.load %arg8[%c0_12, %c0_13] : memref<1x128xf32, #tpu.memory_space<vmem>>, vector<1x128xf32>
    %12 = vector.broadcast %11 : vector<1x128xf32> to vector<64x128xf32>
    %13 = arith.addf %10, %12 : vector<64x128xf32>
    %14 = vector.shape_cast %13 : vector<64x128xf32> to vector<8x8x128xf32>
    %c0_14 = arith.constant 0 : index
    %c0_15 = arith.constant 0 : index
    %c0_16 = arith.constant 0 : index
    %15 = vector.load %arg21[%c0_14, %c0_15, %c0_16] : memref<8x8x128xf32, #tpu.memory_space<vmem>>, vector<8x8x128xf32>
    tpu.vector_store %arg21[%c0_14, %c0_15, %c0_16], %14 {strides = array<i32>} : memref<8x8x128xf32, #tpu.memory_space<vmem>>, vector<8x8x128xf32>,
    %c0_17 = arith.constant 0 : index
    %c0_18 = arith.constant 0 : index
    %c0_19 = arith.constant 0 : index
    %16 = vector.load %arg1[%c0_17, %c0_18, %c0_19] : memref<8x8x32xf32, #tpu.memory_space<vmem>>, vector<8x8x32xf32>
    %17 = vector.shape_cast %16 : vector<8x8x32xf32> to vector<64x32xf32>
    %c0_20 = arith.constant 0 : index
    %c0_21 = arith.constant 0 : index
    %18 = vector.load %arg2[%c0_20, %c0_21] : memref<8x32xf32, #tpu.memory_space<vmem>>, vector<8x32xf32>
    %c0_22 = arith.constant 0 : index
    %c0_23 = arith.constant 0 : index
    %19 = vector.load %arg14[%c0_22, %c0_23] : memref<32x256xf32, #tpu.memory_space<vmem>>, vector<32x256xf32>
    %cst_24 = arith.constant dense<0.000000e+00> : vector<8x256xf32>
    %20 = tpu.matmul %18, %19, %cst_24 {dimension_numbers = #tpu.dot_dimension_numbers<[1], [0], [0], [1], [0, 0, 1, 1], [], []>} : vector<8x32xf32>, vector<32x256xf32>, vector<8x256xf32> -> vector<8x256xf32>
    %c0_25 = arith.constant 0 : index
    %c0_26 = arith.constant 0 : index
    %21 = vector.load %arg16[%c0_25, %c0_26] : memref<1x256xf32, #tpu.memory_space<vmem>>, vector<1x256xf32>
    %22 = vector.broadcast %21 : vector<1x256xf32> to vector<8x256xf32>
    %23 = arith.addf %20, %22 : vector<8x256xf32>
    %c0_27 = arith.constant 0 : index
    %c0_28 = arith.constant 0 : index
    %24 = vector.load %arg13[%c0_27, %c0_28] : memref<32x256xf32, #tpu.memory_space<vmem>>, vector<32x256xf32>
    %cst_29 = arith.constant dense<0.000000e+00> : vector<64x256xf32>
    %25 = tpu.matmul %17, %24, %cst_29 {dimension_numbers = #tpu.dot_dimension_numbers<[1], [0], [0], [1], [0, 0, 1, 1], [], []>} : vector<64x32xf32>, vector<32x256xf32>, vector<64x256xf32> -> vector<64x256xf32>
    %26 = vector.shape_cast %25 : vector<64x256xf32> to vector<8x8x256xf32>
    %27 = vector.shape_cast %23 : vector<8x256xf32> to vector<1x8x256xf32>
    %28 = vector.broadcast %27 : vector<1x8x256xf32> to vector<8x8x256xf32>
    %29 = arith.addf %26, %28 : vector<8x8x256xf32>
    %c0_30 = arith.constant 0 : index
    %c0_31 = arith.constant 0 : index
    %c0_32 = arith.constant 0 : index
    %30 = vector.load %arg22[%c0_30, %c0_31, %c0_32] : memref<8x8x256xf32, #tpu.memory_space<vmem>>, vector<8x8x256xf32>
    tpu.vector_store %arg22[%c0_30, %c0_31, %c0_32], %29 {strides = array<i32>} : memref<8x8x256xf32, #tpu.memory_space<vmem>>, vector<8x8x256xf32>,
    %cst_33 = arith.constant 0.000000e+00 : f32
    %31 = vector.broadcast %cst_33 : f32 to vector<8x32xf32>
    %c0_i32 = arith.constant 0 : i32
    %32 = arith.index_cast %c0_i32 : i32 to index
    %c0_34 = arith.constant 0 : index
    %c0_35 = arith.constant 0 : index
    %33 = vector.load %arg20[%32, %c0_34, %c0_35] : memref<8x8x128xf32, #tpu.memory_space<vmem>>, vector<1x8x128xf32>
    %34 = vector.shape_cast %33 : vector<1x8x128xf32> to vector<8x128xf32>
    %c0_36 = arith.constant 0 : index
    %c0_37 = arith.constant 0 : index
    %35 = vector.load %arg4[%c0_36, %c0_37] : memref<32x128xf32, #tpu.memory_space<vmem>>, vector<32x128xf32>
    %cst_38 = arith.constant dense<0.000000e+00> : vector<8x128xf32>
    %36 = tpu.matmul %31, %35, %cst_38 {dimension_numbers = #tpu.dot_dimension_numbers<[1], [0], [0], [1], [0, 0, 1, 1], [], []>} : vector<8x32xf32>, vector<32x128xf32>, vector<8x128xf32> -> vector<8x128xf32>
    %37 = arith.addf %34, %36 : vector<8x128xf32>
    %38 = vector.extract_strided_slice %37 {offsets = [0, 0], sizes = [8, 32], strides = [1, 1]} : vector<8x128xf32> to vector<8x32xf32>
    %39 = arith.negf %38 : vector<8x32xf32>
    %40 = math.exp %39 : vector<8x32xf32>
    %cst_39 = arith.constant 1.000000e+00 : f32
    %41 = vector.broadcast %cst_39 : f32 to vector<8x32xf32>
    %42 = arith.addf %41, %40 : vector<8x32xf32>
    %43 = arith.divf %41, %42 : vector<8x32xf32>
    %44 = vector.extract_strided_slice %37 {offsets = [0, 32], sizes = [8, 32], strides = [1, 1]} : vector<8x128xf32> to vector<8x32xf32>
    %45 = arith.negf %44 : vector<8x32xf32>
    %46 = math.exp %45 : vector<8x32xf32>
    %cst_40 = arith.constant 1.000000e+00 : f32
    %47 = vector.broadcast %cst_40 : f32 to vector<8x32xf32>
    %48 = arith.addf %47, %46 : vector<8x32xf32>
    %49 = arith.divf %47, %48 : vector<8x32xf32>
    %50 = vector.extract_strided_slice %37 {offsets = [0, 64], sizes = [8, 32], strides = [1, 1]} : vector<8x128xf32> to vector<8x32xf32>
    %51 = math.tanh %50 : vector<8x32xf32>
    %52 = vector.extract_strided_slice %37 {offsets = [0, 96], sizes = [8, 32], strides = [1, 1]} : vector<8x128xf32> to vector<8x32xf32>
    %53 = arith.negf %52 : vector<8x32xf32>
    %54 = math.exp %53 : vector<8x32xf32>
    %cst_41 = arith.constant 1.000000e+00 : f32
    %55 = vector.broadcast %cst_41 : f32 to vector<8x32xf32>
    %56 = arith.addf %55, %54 : vector<8x32xf32>
    %57 = arith.divf %55, %56 : vector<8x32xf32>
    %58 = arith.mulf %49, %31 : vector<8x32xf32>
    %59 = arith.mulf %43, %51 : vector<8x32xf32>
    %60 = arith.addf %58, %59 : vector<8x32xf32>
    %61 = math.tanh %60 : vector<8x32xf32>
    %62 = arith.mulf %57, %61 : vector<8x32xf32>
    %c7_i32 = arith.constant 7 : i32
    %63 = arith.subi %c7_i32, %c0_i32 : i32
    %64 = arith.index_cast %63 : i32 to index
    %c0_42 = arith.constant 0 : index
    %c0_43 = arith.constant 0 : index
    %65 = vector.load %arg21[%64, %c0_42, %c0_43] : memref<8x8x128xf32, #tpu.memory_space<vmem>>, vector<1x8x128xf32>
    %66 = vector.shape_cast %65 : vector<1x8x128xf32> to vector<8x128xf32>
    %c0_44 = arith.constant 0 : index
    %c0_45 = arith.constant 0 : index
    %67 = vector.load %arg7[%c0_44, %c0_45] : memref<32x128xf32, #tpu.memory_space<vmem>>, vector<32x128xf32>
    %cst_46 = arith.constant dense<0.000000e+00> : vector<8x128xf32>
    %68 = tpu.matmul %31, %67, %cst_46 {dimension_numbers = #tpu.dot_dimension_numbers<[1], [0], [0], [1], [0, 0, 1, 1], [], []>} : vector<8x32xf32>, vector<32x128xf32>, vector<8x128xf32> -> vector<8x128xf32>
    %69 = arith.addf %66, %68 : vector<8x128xf32>
    %70 = vector.extract_strided_slice %69 {offsets = [0, 0], sizes = [8, 32], strides = [1, 1]} : vector<8x128xf32> to vector<8x32xf32>
    %71 = arith.negf %70 : vector<8x32xf32>
    %72 = math.exp %71 : vector<8x32xf32>
    %cst_47 = arith.constant 1.000000e+00 : f32
    %73 = vector.broadcast %cst_47 : f32 to vector<8x32xf32>
    %74 = arith.addf %73, %72 : vector<8x32xf32>
    %75 = arith.divf %73, %74 : vector<8x32xf32>
    %76 = vector.extract_strided_slice %69 {offsets = [0, 32], sizes = [8, 32], strides = [1, 1]} : vector<8x128xf32> to vector<8x32xf32>
    %77 = arith.negf %76 : vector<8x32xf32>
    %78 = math.exp %77 : vector<8x32xf32>
    %cst_48 = arith.constant 1.000000e+00 : f32
    %79 = vector.broadcast %cst_48 : f32 to vector<8x32xf32>
    %80 = arith.addf %79, %78 : vector<8x32xf32>
    %81 = arith.divf %79, %80 : vector<8x32xf32>
    %82 = vector.extract_strided_slice %69 {offsets = [0, 64], sizes = [8, 32], strides = [1, 1]} : vector<8x128xf32> to vector<8x32xf32>
    %83 = math.tanh %82 : vector<8x32xf32>
    %84 = vector.extract_strided_slice %69 {offsets = [0, 96], sizes = [8, 32], strides = [1, 1]} : vector<8x128xf32> to vector<8x32xf32>
    %85 = arith.negf %84 : vector<8x32xf32>
    %86 = math.exp %85 : vector<8x32xf32>
    %cst_49 = arith.constant 1.000000e+00 : f32
    %87 = vector.broadcast %cst_49 : f32 to vector<8x32xf32>
    %88 = arith.addf %87, %86 : vector<8x32xf32>
    %89 = arith.divf %87, %88 : vector<8x32xf32>
    %90 = arith.mulf %81, %31 : vector<8x32xf32>
    %91 = arith.mulf %75, %83 : vector<8x32xf32>
    %92 = arith.addf %90, %91 : vector<8x32xf32>
    %93 = math.tanh %92 : vector<8x32xf32>
    %94 = arith.mulf %89, %93 : vector<8x32xf32>
    %c1_i32 = arith.constant 1 : i32
    %95 = arith.index_cast %c1_i32 : i32 to index
    %c0_50 = arith.constant 0 : index
    %c0_51 = arith.constant 0 : index
    %96 = vector.load %arg20[%95, %c0_50, %c0_51] : memref<8x8x128xf32, #tpu.memory_space<vmem>>, vector<1x8x128xf32>
    %97 = vector.shape_cast %96 : vector<1x8x128xf32> to vector<8x128xf32>
    %c0_52 = arith.constant 0 : index
    %c0_53 = arith.constant 0 : index
    %98 = vector.load %arg4[%c0_52, %c0_53] : memref<32x128xf32, #tpu.memory_space<vmem>>, vector<32x128xf32>
    %cst_54 = arith.constant dense<0.000000e+00> : vector<8x128xf32>
    %99 = tpu.matmul %62, %98, %cst_54 {dimension_numbers = #tpu.dot_dimension_numbers<[1], [0], [0], [1], [0, 0, 1, 1], [], []>} : vector<8x32xf32>, vector<32x128xf32>, vector<8x128xf32> -> vector<8x128xf32>
    %100 = arith.addf %97, %99 : vector<8x128xf32>
    %101 = vector.extract_strided_slice %100 {offsets = [0, 0], sizes = [8, 32], strides = [1, 1]} : vector<8x128xf32> to vector<8x32xf32>
    %102 = arith.negf %101 : vector<8x32xf32>
    %103 = math.exp %102 : vector<8x32xf32>
    %cst_55 = arith.constant 1.000000e+00 : f32
    %104 = vector.broadcast %cst_55 : f32 to vector<8x32xf32>
    %105 = arith.addf %104, %103 : vector<8x32xf32>
    %106 = arith.divf %104, %105 : vector<8x32xf32>
    %107 = vector.extract_strided_slice %100 {offsets = [0, 32], sizes = [8, 32], strides = [1, 1]} : vector<8x128xf32> to vector<8x32xf32>
    %108 = arith.negf %107 : vector<8x32xf32>
    %109 = math.exp %108 : vector<8x32xf32>
    %cst_56 = arith.constant 1.000000e+00 : f32
    %110 = vector.broadcast %cst_56 : f32 to vector<8x32xf32>
    %111 = arith.addf %110, %109 : vector<8x32xf32>
    %112 = arith.divf %110, %111 : vector<8x32xf32>
    %113 = vector.extract_strided_slice %100 {offsets = [0, 64], sizes = [8, 32], strides = [1, 1]} : vector<8x128xf32> to vector<8x32xf32>
    %114 = math.tanh %113 : vector<8x32xf32>
    %115 = vector.extract_strided_slice %100 {offsets = [0, 96], sizes = [8, 32], strides = [1, 1]} : vector<8x128xf32> to vector<8x32xf32>
    %116 = arith.negf %115 : vector<8x32xf32>
    %117 = math.exp %116 : vector<8x32xf32>
    %cst_57 = arith.constant 1.000000e+00 : f32
    %118 = vector.broadcast %cst_57 : f32 to vector<8x32xf32>
    %119 = arith.addf %118, %117 : vector<8x32xf32>
    %120 = arith.divf %118, %119 : vector<8x32xf32>
    %121 = arith.mulf %112, %60 : vector<8x32xf32>
    %122 = arith.mulf %106, %114 : vector<8x32xf32>
    %123 = arith.addf %121, %122 : vector<8x32xf32>
    %124 = math.tanh %123 : vector<8x32xf32>
    %125 = arith.mulf %120, %124 : vector<8x32xf32>
    %c7_i32_58 = arith.constant 7 : i32
    %126 = arith.subi %c7_i32_58, %c1_i32 : i32
    %127 = arith.index_cast %126 : i32 to index
    %c0_59 = arith.constant 0 : index
    %c0_60 = arith.constant 0 : index
    %128 = vector.load %arg21[%127, %c0_59, %c0_60] : memref<8x8x128xf32, #tpu.memory_space<vmem>>, vector<1x8x128xf32>
    %129 = vector.shape_cast %128 : vector<1x8x128xf32> to vector<8x128xf32>
    %c0_61 = arith.constant 0 : index
    %c0_62 = arith.constant 0 : index
    %130 = vector.load %arg7[%c0_61, %c0_62] : memref<32x128xf32, #tpu.memory_space<vmem>>, vector<32x128xf32>
    %cst_63 = arith.constant dense<0.000000e+00> : vector<8x128xf32>
    %131 = tpu.matmul %94, %130, %cst_63 {dimension_numbers = #tpu.dot_dimension_numbers<[1], [0], [0], [1], [0, 0, 1, 1], [], []>} : vector<8x32xf32>, vector<32x128xf32>, vector<8x128xf32> -> vector<8x128xf32>
    %132 = arith.addf %129, %131 : vector<8x128xf32>
    %133 = vector.extract_strided_slice %132 {offsets = [0, 0], sizes = [8, 32], strides = [1, 1]} : vector<8x128xf32> to vector<8x32xf32>
    %134 = arith.negf %133 : vector<8x32xf32>
    %135 = math.exp %134 : vector<8x32xf32>
    %cst_64 = arith.constant 1.000000e+00 : f32
    %136 = vector.broadcast %cst_64 : f32 to vector<8x32xf32>
    %137 = arith.addf %136, %135 : vector<8x32xf32>
    %138 = arith.divf %136, %137 : vector<8x32xf32>
    %139 = vector.extract_strided_slice %132 {offsets = [0, 32], sizes = [8, 32], strides = [1, 1]} : vector<8x128xf32> to vector<8x32xf32>
    %140 = arith.negf %139 : vector<8x32xf32>
    %141 = math.exp %140 : vector<8x32xf32>
    %cst_65 = arith.constant 1.000000e+00 : f32
    %142 = vector.broadcast %cst_65 : f32 to vector<8x32xf32>
    %143 = arith.addf %142, %141 : vector<8x32xf32>
    %144 = arith.divf %142, %143 : vector<8x32xf32>
    %145 = vector.extract_strided_slice %132 {offsets = [0, 64], sizes = [8, 32], strides = [1, 1]} : vector<8x128xf32> to vector<8x32xf32>
    %146 = math.tanh %145 : vector<8x32xf32>
    %147 = vector.extract_strided_slice %132 {offsets = [0, 96], sizes = [8, 32], strides = [1, 1]} : vector<8x128xf32> to vector<8x32xf32>
    %148 = arith.negf %147 : vector<8x32xf32>
    %149 = math.exp %148 : vector<8x32xf32>
    %cst_66 = arith.constant 1.000000e+00 : f32
    %150 = vector.broadcast %cst_66 : f32 to vector<8x32xf32>
    %151 = arith.addf %150, %149 : vector<8x32xf32>
    %152 = arith.divf %150, %151 : vector<8x32xf32>
    %153 = arith.mulf %144, %92 : vector<8x32xf32>
    %154 = arith.mulf %138, %146 : vector<8x32xf32>
    %155 = arith.addf %153, %154 : vector<8x32xf32>
    %156 = math.tanh %155 : vector<8x32xf32>
    %157 = arith.mulf %152, %156 : vector<8x32xf32>
    %c2_i32 = arith.constant 2 : i32
    %158 = arith.index_cast %c2_i32 : i32 to index
    %c0_67 = arith.constant 0 : index
    %c0_68 = arith.constant 0 : index
    %159 = vector.load %arg20[%158, %c0_67, %c0_68] : memref<8x8x128xf32, #tpu.memory_space<vmem>>, vector<1x8x128xf32>
    %160 = vector.shape_cast %159 : vector<1x8x128xf32> to vector<8x128xf32>
    %c0_69 = arith.constant 0 : index
    %c0_70 = arith.constant 0 : index
    %161 = vector.load %arg4[%c0_69, %c0_70] : memref<32x128xf32, #tpu.memory_space<vmem>>, vector<32x128xf32>
    %cst_71 = arith.constant dense<0.000000e+00> : vector<8x128xf32>
    %162 = tpu.matmul %125, %161, %cst_71 {dimension_numbers = #tpu.dot_dimension_numbers<[1], [0], [0], [1], [0, 0, 1, 1], [], []>} : vector<8x32xf32>, vector<32x128xf32>, vector<8x128xf32> -> vector<8x128xf32>
    %163 = arith.addf %160, %162 : vector<8x128xf32>
    %164 = vector.extract_strided_slice %163 {offsets = [0, 0], sizes = [8, 32], strides = [1, 1]} : vector<8x128xf32> to vector<8x32xf32>
    %165 = arith.negf %164 : vector<8x32xf32>
    %166 = math.exp %165 : vector<8x32xf32>
    %cst_72 = arith.constant 1.000000e+00 : f32
    %167 = vector.broadcast %cst_72 : f32 to vector<8x32xf32>
    %168 = arith.addf %167, %166 : vector<8x32xf32>
    %169 = arith.divf %167, %168 : vector<8x32xf32>
    %170 = vector.extract_strided_slice %163 {offsets = [0, 32], sizes = [8, 32], strides = [1, 1]} : vector<8x128xf32> to vector<8x32xf32>
    %171 = arith.negf %170 : vector<8x32xf32>
    %172 = math.exp %171 : vector<8x32xf32>
    %cst_73 = arith.constant 1.000000e+00 : f32
    %173 = vector.broadcast %cst_73 : f32 to vector<8x32xf32>
    %174 = arith.addf %173, %172 : vector<8x32xf32>
    %175 = arith.divf %173, %174 : vector<8x32xf32>
    %176 = vector.extract_strided_slice %163 {offsets = [0, 64], sizes = [8, 32], strides = [1, 1]} : vector<8x128xf32> to vector<8x32xf32>
    %177 = math.tanh %176 : vector<8x32xf32>
    %178 = vector.extract_strided_slice %163 {offsets = [0, 96], sizes = [8, 32], strides = [1, 1]} : vector<8x128xf32> to vector<8x32xf32>
    %179 = arith.negf %178 : vector<8x32xf32>
    %180 = math.exp %179 : vector<8x32xf32>
    %cst_74 = arith.constant 1.000000e+00 : f32
    %181 = vector.broadcast %cst_74 : f32 to vector<8x32xf32>
    %182 = arith.addf %181, %180 : vector<8x32xf32>
    %183 = arith.divf %181, %182 : vector<8x32xf32>
    %184 = arith.mulf %175, %123 : vector<8x32xf32>
    %185 = arith.mulf %169, %177 : vector<8x32xf32>
    %186 = arith.addf %184, %185 : vector<8x32xf32>
    %187 = math.tanh %186 : vector<8x32xf32>
    %188 = arith.mulf %183, %187 : vector<8x32xf32>
    %c7_i32_75 = arith.constant 7 : i32
    %189 = arith.subi %c7_i32_75, %c2_i32 : i32
    %190 = arith.index_cast %189 : i32 to index
    %c0_76 = arith.constant 0 : index
    %c0_77 = arith.constant 0 : index
    %191 = vector.load %arg21[%190, %c0_76, %c0_77] : memref<8x8x128xf32, #tpu.memory_space<vmem>>, vector<1x8x128xf32>
    %192 = vector.shape_cast %191 : vector<1x8x128xf32> to vector<8x128xf32>
    %c0_78 = arith.constant 0 : index
    %c0_79 = arith.constant 0 : index
    %193 = vector.load %arg7[%c0_78, %c0_79] : memref<32x128xf32, #tpu.memory_space<vmem>>, vector<32x128xf32>
    %cst_80 = arith.constant dense<0.000000e+00> : vector<8x128xf32>
    %194 = tpu.matmul %157, %193, %cst_80 {dimension_numbers = #tpu.dot_dimension_numbers<[1], [0], [0], [1], [0, 0, 1, 1], [], []>} : vector<8x32xf32>, vector<32x128xf32>, vector<8x128xf32> -> vector<8x128xf32>
    %195 = arith.addf %192, %194 : vector<8x128xf32>
    %196 = vector.extract_strided_slice %195 {offsets = [0, 0], sizes = [8, 32], strides = [1, 1]} : vector<8x128xf32> to vector<8x32xf32>
    %197 = arith.negf %196 : vector<8x32xf32>
    %198 = math.exp %197 : vector<8x32xf32>
    %cst_81 = arith.constant 1.000000e+00 : f32
    %199 = vector.broadcast %cst_81 : f32 to vector<8x32xf32>
    %200 = arith.addf %199, %198 : vector<8x32xf32>
    %201 = arith.divf %199, %200 : vector<8x32xf32>
    %202 = vector.extract_strided_slice %195 {offsets = [0, 32], sizes = [8, 32], strides = [1, 1]} : vector<8x128xf32> to vector<8x32xf32>
    %203 = arith.negf %202 : vector<8x32xf32>
    %204 = math.exp %203 : vector<8x32xf32>
    %cst_82 = arith.constant 1.000000e+00 : f32
    %205 = vector.broadcast %cst_82 : f32 to vector<8x32xf32>
    %206 = arith.addf %205, %204 : vector<8x32xf32>
    %207 = arith.divf %205, %206 : vector<8x32xf32>
    %208 = vector.extract_strided_slice %195 {offsets = [0, 64], sizes = [8, 32], strides = [1, 1]} : vector<8x128xf32> to vector<8x32xf32>
    %209 = math.tanh %208 : vector<8x32xf32>
    %210 = vector.extract_strided_slice %195 {offsets = [0, 96], sizes = [8, 32], strides = [1, 1]} : vector<8x128xf32> to vector<8x32xf32>
    %211 = arith.negf %210 : vector<8x32xf32>
    %212 = math.exp %211 : vector<8x32xf32>
    %cst_83 = arith.constant 1.000000e+00 : f32
    %213 = vector.broadcast %cst_83 : f32 to vector<8x32xf32>
    %214 = arith.addf %213, %212 : vector<8x32xf32>
    %215 = arith.divf %213, %214 : vector<8x32xf32>
    %216 = arith.mulf %207, %155 : vector<8x32xf32>
    %217 = arith.mulf %201, %209 : vector<8x32xf32>
    %218 = arith.addf %216, %217 : vector<8x32xf32>
    %219 = math.tanh %218 : vector<8x32xf32>
    %220 = arith.mulf %215, %219 : vector<8x32xf32>
    %c3_i32 = arith.constant 3 : i32
    %221 = arith.index_cast %c3_i32 : i32 to index
    %c0_84 = arith.constant 0 : index
    %c0_85 = arith.constant 0 : index
    %222 = vector.load %arg20[%221, %c0_84, %c0_85] : memref<8x8x128xf32, #tpu.memory_space<vmem>>, vector<1x8x128xf32>
    %223 = vector.shape_cast %222 : vector<1x8x128xf32> to vector<8x128xf32>
    %c0_86 = arith.constant 0 : index
    %c0_87 = arith.constant 0 : index
    %224 = vector.load %arg4[%c0_86, %c0_87] : memref<32x128xf32, #tpu.memory_space<vmem>>, vector<32x128xf32>
    %cst_88 = arith.constant dense<0.000000e+00> : vector<8x128xf32>
    %225 = tpu.matmul %188, %224, %cst_88 {dimension_numbers = #tpu.dot_dimension_numbers<[1], [0], [0], [1], [0, 0, 1, 1], [], []>} : vector<8x32xf32>, vector<32x128xf32>, vector<8x128xf32> -> vector<8x128xf32>
    %226 = arith.addf %223, %225 : vector<8x128xf32>
    %227 = vector.extract_strided_slice %226 {offsets = [0, 0], sizes = [8, 32], strides = [1, 1]} : vector<8x128xf32> to vector<8x32xf32>
    %228 = arith.negf %227 : vector<8x32xf32>
    %229 = math.exp %228 : vector<8x32xf32>
    %cst_89 = arith.constant 1.000000e+00 : f32
    %230 = vector.broadcast %cst_89 : f32 to vector<8x32xf32>
    %231 = arith.addf %230, %229 : vector<8x32xf32>
    %232 = arith.divf %230, %231 : vector<8x32xf32>
    %233 = vector.extract_strided_slice %226 {offsets = [0, 32], sizes = [8, 32], strides = [1, 1]} : vector<8x128xf32> to vector<8x32xf32>
    %234 = arith.negf %233 : vector<8x32xf32>
    %235 = math.exp %234 : vector<8x32xf32>
    %cst_90 = arith.constant 1.000000e+00 : f32
    %236 = vector.broadcast %cst_90 : f32 to vector<8x32xf32>
    %237 = arith.addf %236, %235 : vector<8x32xf32>
    %238 = arith.divf %236, %237 : vector<8x32xf32>
    %239 = vector.extract_strided_slice %226 {offsets = [0, 64], sizes = [8, 32], strides = [1, 1]} : vector<8x128xf32> to vector<8x32xf32>
    %240 = math.tanh %239 : vector<8x32xf32>
    %241 = vector.extract_strided_slice %226 {offsets = [0, 96], sizes = [8, 32], strides = [1, 1]} : vector<8x128xf32> to vector<8x32xf32>
    %242 = arith.negf %241 : vector<8x32xf32>
    %243 = math.exp %242 : vector<8x32xf32>
    %cst_91 = arith.constant 1.000000e+00 : f32
    %244 = vector.broadcast %cst_91 : f32 to vector<8x32xf32>
    %245 = arith.addf %244, %243 : vector<8x32xf32>
    %246 = arith.divf %244, %245 : vector<8x32xf32>
    %247 = arith.mulf %238, %186 : vector<8x32xf32>
    %248 = arith.mulf %232, %240 : vector<8x32xf32>
    %249 = arith.addf %247, %248 : vector<8x32xf32>
    %250 = math.tanh %249 : vector<8x32xf32>
    %251 = arith.mulf %246, %250 : vector<8x32xf32>
    %c7_i32_92 = arith.constant 7 : i32
    %252 = arith.subi %c7_i32_92, %c3_i32 : i32
    %253 = arith.index_cast %252 : i32 to index
    %c0_93 = arith.constant 0 : index
    %c0_94 = arith.constant 0 : index
    %254 = vector.load %arg21[%253, %c0_93, %c0_94] : memref<8x8x128xf32, #tpu.memory_space<vmem>>, vector<1x8x128xf32>
    %255 = vector.shape_cast %254 : vector<1x8x128xf32> to vector<8x128xf32>
    %c0_95 = arith.constant 0 : index
    %c0_96 = arith.constant 0 : index
    %256 = vector.load %arg7[%c0_95, %c0_96] : memref<32x128xf32, #tpu.memory_space<vmem>>, vector<32x128xf32>
    %cst_97 = arith.constant dense<0.000000e+00> : vector<8x128xf32>
    %257 = tpu.matmul %220, %256, %cst_97 {dimension_numbers = #tpu.dot_dimension_numbers<[1], [0], [0], [1], [0, 0, 1, 1], [], []>} : vector<8x32xf32>, vector<32x128xf32>, vector<8x128xf32> -> vector<8x128xf32>
    %258 = arith.addf %255, %257 : vector<8x128xf32>
    %259 = vector.extract_strided_slice %258 {offsets = [0, 0], sizes = [8, 32], strides = [1, 1]} : vector<8x128xf32> to vector<8x32xf32>
    %260 = arith.negf %259 : vector<8x32xf32>
    %261 = math.exp %260 : vector<8x32xf32>
    %cst_98 = arith.constant 1.000000e+00 : f32
    %262 = vector.broadcast %cst_98 : f32 to vector<8x32xf32>
    %263 = arith.addf %262, %261 : vector<8x32xf32>
    %264 = arith.divf %262, %263 : vector<8x32xf32>
    %265 = vector.extract_strided_slice %258 {offsets = [0, 32], sizes = [8, 32], strides = [1, 1]} : vector<8x128xf32> to vector<8x32xf32>
    %266 = arith.negf %265 : vector<8x32xf32>
    %267 = math.exp %266 : vector<8x32xf32>
    %cst_99 = arith.constant 1.000000e+00 : f32
    %268 = vector.broadcast %cst_99 : f32 to vector<8x32xf32>
    %269 = arith.addf %268, %267 : vector<8x32xf32>
    %270 = arith.divf %268, %269 : vector<8x32xf32>
    %271 = vector.extract_strided_slice %258 {offsets = [0, 64], sizes = [8, 32], strides = [1, 1]} : vector<8x128xf32> to vector<8x32xf32>
    %272 = math.tanh %271 : vector<8x32xf32>
    %273 = vector.extract_strided_slice %258 {offsets = [0, 96], sizes = [8, 32], strides = [1, 1]} : vector<8x128xf32> to vector<8x32xf32>
    %274 = arith.negf %273 : vector<8x32xf32>
    %275 = math.exp %274 : vector<8x32xf32>
    %cst_100 = arith.constant 1.000000e+00 : f32
    %276 = vector.broadcast %cst_100 : f32 to vector<8x32xf32>
    %277 = arith.addf %276, %275 : vector<8x32xf32>
    %278 = arith.divf %276, %277 : vector<8x32xf32>
    %279 = arith.mulf %270, %218 : vector<8x32xf32>
    %280 = arith.mulf %264, %272 : vector<8x32xf32>
    %281 = arith.addf %279, %280 : vector<8x32xf32>
    %282 = math.tanh %281 : vector<8x32xf32>
    %283 = arith.mulf %278, %282 : vector<8x32xf32>
    %c4_i32 = arith.constant 4 : i32
    %284 = arith.index_cast %c4_i32 : i32 to index
    %c0_101 = arith.constant 0 : index
    %c0_102 = arith.constant 0 : index
    %285 = vector.load %arg20[%284, %c0_101, %c0_102] : memref<8x8x128xf32, #tpu.memory_space<vmem>>, vector<1x8x128xf32>
    %286 = vector.shape_cast %285 : vector<1x8x128xf32> to vector<8x128xf32>
    %c0_103 = arith.constant 0 : index
    %c0_104 = arith.constant 0 : index
    %287 = vector.load %arg4[%c0_103, %c0_104] : memref<32x128xf32, #tpu.memory_space<vmem>>, vector<32x128xf32>
    %cst_105 = arith.constant dense<0.000000e+00> : vector<8x128xf32>
    %288 = tpu.matmul %251, %287, %cst_105 {dimension_numbers = #tpu.dot_dimension_numbers<[1], [0], [0], [1], [0, 0, 1, 1], [], []>} : vector<8x32xf32>, vector<32x128xf32>, vector<8x128xf32> -> vector<8x128xf32>
    %289 = arith.addf %286, %288 : vector<8x128xf32>
    %290 = vector.extract_strided_slice %289 {offsets = [0, 0], sizes = [8, 32], strides = [1, 1]} : vector<8x128xf32> to vector<8x32xf32>
    %291 = arith.negf %290 : vector<8x32xf32>
    %292 = math.exp %291 : vector<8x32xf32>
    %cst_106 = arith.constant 1.000000e+00 : f32
    %293 = vector.broadcast %cst_106 : f32 to vector<8x32xf32>
    %294 = arith.addf %293, %292 : vector<8x32xf32>
    %295 = arith.divf %293, %294 : vector<8x32xf32>
    %296 = vector.extract_strided_slice %289 {offsets = [0, 32], sizes = [8, 32], strides = [1, 1]} : vector<8x128xf32> to vector<8x32xf32>
    %297 = arith.negf %296 : vector<8x32xf32>
    %298 = math.exp %297 : vector<8x32xf32>
    %cst_107 = arith.constant 1.000000e+00 : f32
    %299 = vector.broadcast %cst_107 : f32 to vector<8x32xf32>
    %300 = arith.addf %299, %298 : vector<8x32xf32>
    %301 = arith.divf %299, %300 : vector<8x32xf32>
    %302 = vector.extract_strided_slice %289 {offsets = [0, 64], sizes = [8, 32], strides = [1, 1]} : vector<8x128xf32> to vector<8x32xf32>
    %303 = math.tanh %302 : vector<8x32xf32>
    %304 = vector.extract_strided_slice %289 {offsets = [0, 96], sizes = [8, 32], strides = [1, 1]} : vector<8x128xf32> to vector<8x32xf32>
    %305 = arith.negf %304 : vector<8x32xf32>
    %306 = math.exp %305 : vector<8x32xf32>
    %cst_108 = arith.constant 1.000000e+00 : f32
    %307 = vector.broadcast %cst_108 : f32 to vector<8x32xf32>
    %308 = arith.addf %307, %306 : vector<8x32xf32>
    %309 = arith.divf %307, %308 : vector<8x32xf32>
    %310 = arith.mulf %301, %249 : vector<8x32xf32>
    %311 = arith.mulf %295, %303 : vector<8x32xf32>
    %312 = arith.addf %310, %311 : vector<8x32xf32>
    %313 = math.tanh %312 : vector<8x32xf32>
    %314 = arith.mulf %309, %313 : vector<8x32xf32>
    %c7_i32_109 = arith.constant 7 : i32
    %315 = arith.subi %c7_i32_109, %c4_i32 : i32
    %316 = arith.index_cast %315 : i32 to index
    %c0_110 = arith.constant 0 : index
    %c0_111 = arith.constant 0 : index
    %317 = vector.load %arg21[%316, %c0_110, %c0_111] : memref<8x8x128xf32, #tpu.memory_space<vmem>>, vector<1x8x128xf32>
    %318 = vector.shape_cast %317 : vector<1x8x128xf32> to vector<8x128xf32>
    %c0_112 = arith.constant 0 : index
    %c0_113 = arith.constant 0 : index
    %319 = vector.load %arg7[%c0_112, %c0_113] : memref<32x128xf32, #tpu.memory_space<vmem>>, vector<32x128xf32>
    %cst_114 = arith.constant dense<0.000000e+00> : vector<8x128xf32>
    %320 = tpu.matmul %283, %319, %cst_114 {dimension_numbers = #tpu.dot_dimension_numbers<[1], [0], [0], [1], [0, 0, 1, 1], [], []>} : vector<8x32xf32>, vector<32x128xf32>, vector<8x128xf32> -> vector<8x128xf32>
    %321 = arith.addf %318, %320 : vector<8x128xf32>
    %322 = vector.extract_strided_slice %321 {offsets = [0, 0], sizes = [8, 32], strides = [1, 1]} : vector<8x128xf32> to vector<8x32xf32>
    %323 = arith.negf %322 : vector<8x32xf32>
    %324 = math.exp %323 : vector<8x32xf32>
    %cst_115 = arith.constant 1.000000e+00 : f32
    %325 = vector.broadcast %cst_115 : f32 to vector<8x32xf32>
    %326 = arith.addf %325, %324 : vector<8x32xf32>
    %327 = arith.divf %325, %326 : vector<8x32xf32>
    %328 = vector.extract_strided_slice %321 {offsets = [0, 32], sizes = [8, 32], strides = [1, 1]} : vector<8x128xf32> to vector<8x32xf32>
    %329 = arith.negf %328 : vector<8x32xf32>
    %330 = math.exp %329 : vector<8x32xf32>
    %cst_116 = arith.constant 1.000000e+00 : f32
    %331 = vector.broadcast %cst_116 : f32 to vector<8x32xf32>
    %332 = arith.addf %331, %330 : vector<8x32xf32>
    %333 = arith.divf %331, %332 : vector<8x32xf32>
    %334 = vector.extract_strided_slice %321 {offsets = [0, 64], sizes = [8, 32], strides = [1, 1]} : vector<8x128xf32> to vector<8x32xf32>
    %335 = math.tanh %334 : vector<8x32xf32>
    %336 = vector.extract_strided_slice %321 {offsets = [0, 96], sizes = [8, 32], strides = [1, 1]} : vector<8x128xf32> to vector<8x32xf32>
    %337 = arith.negf %336 : vector<8x32xf32>
    %338 = math.exp %337 : vector<8x32xf32>
    %cst_117 = arith.constant 1.000000e+00 : f32
    %339 = vector.broadcast %cst_117 : f32 to vector<8x32xf32>
    %340 = arith.addf %339, %338 : vector<8x32xf32>
    %341 = arith.divf %339, %340 : vector<8x32xf32>
    %342 = arith.mulf %333, %281 : vector<8x32xf32>
    %343 = arith.mulf %327, %335 : vector<8x32xf32>
    %344 = arith.addf %342, %343 : vector<8x32xf32>
    %345 = math.tanh %344 : vector<8x32xf32>
    %346 = arith.mulf %341, %345 : vector<8x32xf32>
    %c5_i32 = arith.constant 5 : i32
    %347 = arith.index_cast %c5_i32 : i32 to index
    %c0_118 = arith.constant 0 : index
    %c0_119 = arith.constant 0 : index
    %348 = vector.load %arg20[%347, %c0_118, %c0_119] : memref<8x8x128xf32, #tpu.memory_space<vmem>>, vector<1x8x128xf32>
    %349 = vector.shape_cast %348 : vector<1x8x128xf32> to vector<8x128xf32>
    %c0_120 = arith.constant 0 : index
    %c0_121 = arith.constant 0 : index
    %350 = vector.load %arg4[%c0_120, %c0_121] : memref<32x128xf32, #tpu.memory_space<vmem>>, vector<32x128xf32>
    %cst_122 = arith.constant dense<0.000000e+00> : vector<8x128xf32>
    %351 = tpu.matmul %314, %350, %cst_122 {dimension_numbers = #tpu.dot_dimension_numbers<[1], [0], [0], [1], [0, 0, 1, 1], [], []>} : vector<8x32xf32>, vector<32x128xf32>, vector<8x128xf32> -> vector<8x128xf32>
    %352 = arith.addf %349, %351 : vector<8x128xf32>
    %353 = vector.extract_strided_slice %352 {offsets = [0, 0], sizes = [8, 32], strides = [1, 1]} : vector<8x128xf32> to vector<8x32xf32>
    %354 = arith.negf %353 : vector<8x32xf32>
    %355 = math.exp %354 : vector<8x32xf32>
    %cst_123 = arith.constant 1.000000e+00 : f32
    %356 = vector.broadcast %cst_123 : f32 to vector<8x32xf32>
    %357 = arith.addf %356, %355 : vector<8x32xf32>
    %358 = arith.divf %356, %357 : vector<8x32xf32>
    %359 = vector.extract_strided_slice %352 {offsets = [0, 32], sizes = [8, 32], strides = [1, 1]} : vector<8x128xf32> to vector<8x32xf32>
    %360 = arith.negf %359 : vector<8x32xf32>
    %361 = math.exp %360 : vector<8x32xf32>
    %cst_124 = arith.constant 1.000000e+00 : f32
    %362 = vector.broadcast %cst_124 : f32 to vector<8x32xf32>
    %363 = arith.addf %362, %361 : vector<8x32xf32>
    %364 = arith.divf %362, %363 : vector<8x32xf32>
    %365 = vector.extract_strided_slice %352 {offsets = [0, 64], sizes = [8, 32], strides = [1, 1]} : vector<8x128xf32> to vector<8x32xf32>
    %366 = math.tanh %365 : vector<8x32xf32>
    %367 = vector.extract_strided_slice %352 {offsets = [0, 96], sizes = [8, 32], strides = [1, 1]} : vector<8x128xf32> to vector<8x32xf32>
    %368 = arith.negf %367 : vector<8x32xf32>
    %369 = math.exp %368 : vector<8x32xf32>
    %cst_125 = arith.constant 1.000000e+00 : f32
    %370 = vector.broadcast %cst_125 : f32 to vector<8x32xf32>
    %371 = arith.addf %370, %369 : vector<8x32xf32>
    %372 = arith.divf %370, %371 : vector<8x32xf32>
    %373 = arith.mulf %364, %312 : vector<8x32xf32>
    %374 = arith.mulf %358, %366 : vector<8x32xf32>
    %375 = arith.addf %373, %374 : vector<8x32xf32>
    %376 = math.tanh %375 : vector<8x32xf32>
    %377 = arith.mulf %372, %376 : vector<8x32xf32>
    %c7_i32_126 = arith.constant 7 : i32
    %378 = arith.subi %c7_i32_126, %c5_i32 : i32
    %379 = arith.index_cast %378 : i32 to index
    %c0_127 = arith.constant 0 : index
    %c0_128 = arith.constant 0 : index
    %380 = vector.load %arg21[%379, %c0_127, %c0_128] : memref<8x8x128xf32, #tpu.memory_space<vmem>>, vector<1x8x128xf32>
    %381 = vector.shape_cast %380 : vector<1x8x128xf32> to vector<8x128xf32>
    %c0_129 = arith.constant 0 : index
    %c0_130 = arith.constant 0 : index
    %382 = vector.load %arg7[%c0_129, %c0_130] : memref<32x128xf32, #tpu.memory_space<vmem>>, vector<32x128xf32>
    %cst_131 = arith.constant dense<0.000000e+00> : vector<8x128xf32>
    %383 = tpu.matmul %346, %382, %cst_131 {dimension_numbers = #tpu.dot_dimension_numbers<[1], [0], [0], [1], [0, 0, 1, 1], [], []>} : vector<8x32xf32>, vector<32x128xf32>, vector<8x128xf32> -> vector<8x128xf32>
    %384 = arith.addf %381, %383 : vector<8x128xf32>
    %385 = vector.extract_strided_slice %384 {offsets = [0, 0], sizes = [8, 32], strides = [1, 1]} : vector<8x128xf32> to vector<8x32xf32>
    %386 = arith.negf %385 : vector<8x32xf32>
    %387 = math.exp %386 : vector<8x32xf32>
    %cst_132 = arith.constant 1.000000e+00 : f32
    %388 = vector.broadcast %cst_132 : f32 to vector<8x32xf32>
    %389 = arith.addf %388, %387 : vector<8x32xf32>
    %390 = arith.divf %388, %389 : vector<8x32xf32>
    %391 = vector.extract_strided_slice %384 {offsets = [0, 32], sizes = [8, 32], strides = [1, 1]} : vector<8x128xf32> to vector<8x32xf32>
    %392 = arith.negf %391 : vector<8x32xf32>
    %393 = math.exp %392 : vector<8x32xf32>
    %cst_133 = arith.constant 1.000000e+00 : f32
    %394 = vector.broadcast %cst_133 : f32 to vector<8x32xf32>
    %395 = arith.addf %394, %393 : vector<8x32xf32>
    %396 = arith.divf %394, %395 : vector<8x32xf32>
    %397 = vector.extract_strided_slice %384 {offsets = [0, 64], sizes = [8, 32], strides = [1, 1]} : vector<8x128xf32> to vector<8x32xf32>
    %398 = math.tanh %397 : vector<8x32xf32>
    %399 = vector.extract_strided_slice %384 {offsets = [0, 96], sizes = [8, 32], strides = [1, 1]} : vector<8x128xf32> to vector<8x32xf32>
    %400 = arith.negf %399 : vector<8x32xf32>
    %401 = math.exp %400 : vector<8x32xf32>
    %cst_134 = arith.constant 1.000000e+00 : f32
    %402 = vector.broadcast %cst_134 : f32 to vector<8x32xf32>
    %403 = arith.addf %402, %401 : vector<8x32xf32>
    %404 = arith.divf %402, %403 : vector<8x32xf32>
    %405 = arith.mulf %396, %344 : vector<8x32xf32>
    %406 = arith.mulf %390, %398 : vector<8x32xf32>
    %407 = arith.addf %405, %406 : vector<8x32xf32>
    %408 = math.tanh %407 : vector<8x32xf32>
    %409 = arith.mulf %404, %408 : vector<8x32xf32>
    %c6_i32 = arith.constant 6 : i32
    %410 = arith.index_cast %c6_i32 : i32 to index
    %c0_135 = arith.constant 0 : index
    %c0_136 = arith.constant 0 : index
    %411 = vector.load %arg20[%410, %c0_135, %c0_136] : memref<8x8x128xf32, #tpu.memory_space<vmem>>, vector<1x8x128xf32>
    %412 = vector.shape_cast %411 : vector<1x8x128xf32> to vector<8x128xf32>
    %c0_137 = arith.constant 0 : index
    %c0_138 = arith.constant 0 : index
    %413 = vector.load %arg4[%c0_137, %c0_138] : memref<32x128xf32, #tpu.memory_space<vmem>>, vector<32x128xf32>
    %cst_139 = arith.constant dense<0.000000e+00> : vector<8x128xf32>
    %414 = tpu.matmul %377, %413, %cst_139 {dimension_numbers = #tpu.dot_dimension_numbers<[1], [0], [0], [1], [0, 0, 1, 1], [], []>} : vector<8x32xf32>, vector<32x128xf32>, vector<8x128xf32> -> vector<8x128xf32>
    %415 = arith.addf %412, %414 : vector<8x128xf32>
    %416 = vector.extract_strided_slice %415 {offsets = [0, 0], sizes = [8, 32], strides = [1, 1]} : vector<8x128xf32> to vector<8x32xf32>
    %417 = arith.negf %416 : vector<8x32xf32>
    %418 = math.exp %417 : vector<8x32xf32>
    %cst_140 = arith.constant 1.000000e+00 : f32
    %419 = vector.broadcast %cst_140 : f32 to vector<8x32xf32>
    %420 = arith.addf %419, %418 : vector<8x32xf32>
    %421 = arith.divf %419, %420 : vector<8x32xf32>
    %422 = vector.extract_strided_slice %415 {offsets = [0, 32], sizes = [8, 32], strides = [1, 1]} : vector<8x128xf32> to vector<8x32xf32>
    %423 = arith.negf %422 : vector<8x32xf32>
    %424 = math.exp %423 : vector<8x32xf32>
    %cst_141 = arith.constant 1.000000e+00 : f32
    %425 = vector.broadcast %cst_141 : f32 to vector<8x32xf32>
    %426 = arith.addf %425, %424 : vector<8x32xf32>
    %427 = arith.divf %425, %426 : vector<8x32xf32>
    %428 = vector.extract_strided_slice %415 {offsets = [0, 64], sizes = [8, 32], strides = [1, 1]} : vector<8x128xf32> to vector<8x32xf32>
    %429 = math.tanh %428 : vector<8x32xf32>
    %430 = vector.extract_strided_slice %415 {offsets = [0, 96], sizes = [8, 32], strides = [1, 1]} : vector<8x128xf32> to vector<8x32xf32>
    %431 = arith.negf %430 : vector<8x32xf32>
    %432 = math.exp %431 : vector<8x32xf32>
    %cst_142 = arith.constant 1.000000e+00 : f32
    %433 = vector.broadcast %cst_142 : f32 to vector<8x32xf32>
    %434 = arith.addf %433, %432 : vector<8x32xf32>
    %435 = arith.divf %433, %434 : vector<8x32xf32>
    %436 = arith.mulf %427, %375 : vector<8x32xf32>
    %437 = arith.mulf %421, %429 : vector<8x32xf32>
    %438 = arith.addf %436, %437 : vector<8x32xf32>
    %439 = math.tanh %438 : vector<8x32xf32>
    %440 = arith.mulf %435, %439 : vector<8x32xf32>
    %c7_i32_143 = arith.constant 7 : i32
    %441 = arith.subi %c7_i32_143, %c6_i32 : i32
    %442 = arith.index_cast %441 : i32 to index
    %c0_144 = arith.constant 0 : index
    %c0_145 = arith.constant 0 : index
    %443 = vector.load %arg21[%442, %c0_144, %c0_145] : memref<8x8x128xf32, #tpu.memory_space<vmem>>, vector<1x8x128xf32>
    %444 = vector.shape_cast %443 : vector<1x8x128xf32> to vector<8x128xf32>
    %c0_146 = arith.constant 0 : index
    %c0_147 = arith.constant 0 : index
    %445 = vector.load %arg7[%c0_146, %c0_147] : memref<32x128xf32, #tpu.memory_space<vmem>>, vector<32x128xf32>
    %cst_148 = arith.constant dense<0.000000e+00> : vector<8x128xf32>
    %446 = tpu.matmul %409, %445, %cst_148 {dimension_numbers = #tpu.dot_dimension_numbers<[1], [0], [0], [1], [0, 0, 1, 1], [], []>} : vector<8x32xf32>, vector<32x128xf32>, vector<8x128xf32> -> vector<8x128xf32>
    %447 = arith.addf %444, %446 : vector<8x128xf32>
    %448 = vector.extract_strided_slice %447 {offsets = [0, 0], sizes = [8, 32], strides = [1, 1]} : vector<8x128xf32> to vector<8x32xf32>
    %449 = arith.negf %448 : vector<8x32xf32>
    %450 = math.exp %449 : vector<8x32xf32>
    %cst_149 = arith.constant 1.000000e+00 : f32
    %451 = vector.broadcast %cst_149 : f32 to vector<8x32xf32>
    %452 = arith.addf %451, %450 : vector<8x32xf32>
    %453 = arith.divf %451, %452 : vector<8x32xf32>
    %454 = vector.extract_strided_slice %447 {offsets = [0, 32], sizes = [8, 32], strides = [1, 1]} : vector<8x128xf32> to vector<8x32xf32>
    %455 = arith.negf %454 : vector<8x32xf32>
    %456 = math.exp %455 : vector<8x32xf32>
    %cst_150 = arith.constant 1.000000e+00 : f32
    %457 = vector.broadcast %cst_150 : f32 to vector<8x32xf32>
    %458 = arith.addf %457, %456 : vector<8x32xf32>
    %459 = arith.divf %457, %458 : vector<8x32xf32>
    %460 = vector.extract_strided_slice %447 {offsets = [0, 64], sizes = [8, 32], strides = [1, 1]} : vector<8x128xf32> to vector<8x32xf32>
    %461 = math.tanh %460 : vector<8x32xf32>
    %462 = vector.extract_strided_slice %447 {offsets = [0, 96], sizes = [8, 32], strides = [1, 1]} : vector<8x128xf32> to vector<8x32xf32>
    %463 = arith.negf %462 : vector<8x32xf32>
    %464 = math.exp %463 : vector<8x32xf32>
    %cst_151 = arith.constant 1.000000e+00 : f32
    %465 = vector.broadcast %cst_151 : f32 to vector<8x32xf32>
    %466 = arith.addf %465, %464 : vector<8x32xf32>
    %467 = arith.divf %465, %466 : vector<8x32xf32>
    %468 = arith.mulf %459, %407 : vector<8x32xf32>
    %469 = arith.mulf %453, %461 : vector<8x32xf32>
    %470 = arith.addf %468, %469 : vector<8x32xf32>
    %471 = math.tanh %470 : vector<8x32xf32>
    %472 = arith.mulf %467, %471 : vector<8x32xf32>
    %c7_i32_152 = arith.constant 7 : i32
    %473 = arith.index_cast %c7_i32_152 : i32 to index
    %c0_153 = arith.constant 0 : index
    %c0_154 = arith.constant 0 : index
    %474 = vector.load %arg20[%473, %c0_153, %c0_154] : memref<8x8x128xf32, #tpu.memory_space<vmem>>, vector<1x8x128xf32>
    %475 = vector.shape_cast %474 : vector<1x8x128xf32> to vector<8x128xf32>
    %c0_155 = arith.constant 0 : index
    %c0_156 = arith.constant 0 : index
    %476 = vector.load %arg4[%c0_155, %c0_156] : memref<32x128xf32, #tpu.memory_space<vmem>>, vector<32x128xf32>
    %cst_157 = arith.constant dense<0.000000e+00> : vector<8x128xf32>
    %477 = tpu.matmul %440, %476, %cst_157 {dimension_numbers = #tpu.dot_dimension_numbers<[1], [0], [0], [1], [0, 0, 1, 1], [], []>} : vector<8x32xf32>, vector<32x128xf32>, vector<8x128xf32> -> vector<8x128xf32>
    %478 = arith.addf %475, %477 : vector<8x128xf32>
    %479 = vector.extract_strided_slice %478 {offsets = [0, 0], sizes = [8, 32], strides = [1, 1]} : vector<8x128xf32> to vector<8x32xf32>
    %480 = arith.negf %479 : vector<8x32xf32>
    %481 = math.exp %480 : vector<8x32xf32>
    %cst_158 = arith.constant 1.000000e+00 : f32
    %482 = vector.broadcast %cst_158 : f32 to vector<8x32xf32>
    %483 = arith.addf %482, %481 : vector<8x32xf32>
    %484 = arith.divf %482, %483 : vector<8x32xf32>
    %485 = vector.extract_strided_slice %478 {offsets = [0, 32], sizes = [8, 32], strides = [1, 1]} : vector<8x128xf32> to vector<8x32xf32>
    %486 = arith.negf %485 : vector<8x32xf32>
    %487 = math.exp %486 : vector<8x32xf32>
    %cst_159 = arith.constant 1.000000e+00 : f32
    %488 = vector.broadcast %cst_159 : f32 to vector<8x32xf32>
    %489 = arith.addf %488, %487 : vector<8x32xf32>
    %490 = arith.divf %488, %489 : vector<8x32xf32>
    %491 = vector.extract_strided_slice %478 {offsets = [0, 64], sizes = [8, 32], strides = [1, 1]} : vector<8x128xf32> to vector<8x32xf32>
    %492 = math.tanh %491 : vector<8x32xf32>
    %493 = vector.extract_strided_slice %478 {offsets = [0, 96], sizes = [8, 32], strides = [1, 1]} : vector<8x128xf32> to vector<8x32xf32>
    %494 = arith.negf %493 : vector<8x32xf32>
    %495 = math.exp %494 : vector<8x32xf32>
    %cst_160 = arith.constant 1.000000e+00 : f32
    %496 = vector.broadcast %cst_160 : f32 to vector<8x32xf32>
    %497 = arith.addf %496, %495 : vector<8x32xf32>
    %498 = arith.divf %496, %497 : vector<8x32xf32>
    %499 = arith.mulf %490, %438 : vector<8x32xf32>
    %500 = arith.mulf %484, %492 : vector<8x32xf32>
    %501 = arith.addf %499, %500 : vector<8x32xf32>
    %502 = math.tanh %501 : vector<8x32xf32>
    %503 = arith.mulf %498, %502 : vector<8x32xf32>
    %c7_i32_161 = arith.constant 7 : i32
    %504 = arith.subi %c7_i32_161, %c7_i32_152 : i32
    %505 = arith.index_cast %504 : i32 to index
    %c0_162 = arith.constant 0 : index
    %c0_163 = arith.constant 0 : index
    %506 = vector.load %arg21[%505, %c0_162, %c0_163] : memref<8x8x128xf32, #tpu.memory_space<vmem>>, vector<1x8x128xf32>
    %507 = vector.shape_cast %506 : vector<1x8x128xf32> to vector<8x128xf32>
    %c0_164 = arith.constant 0 : index
    %c0_165 = arith.constant 0 : index
    %508 = vector.load %arg7[%c0_164, %c0_165] : memref<32x128xf32, #tpu.memory_space<vmem>>, vector<32x128xf32>
    %cst_166 = arith.constant dense<0.000000e+00> : vector<8x128xf32>
    %509 = tpu.matmul %472, %508, %cst_166 {dimension_numbers = #tpu.dot_dimension_numbers<[1], [0], [0], [1], [0, 0, 1, 1], [], []>} : vector<8x32xf32>, vector<32x128xf32>, vector<8x128xf32> -> vector<8x128xf32>
    %510 = arith.addf %507, %509 : vector<8x128xf32>
    %511 = vector.extract_strided_slice %510 {offsets = [0, 0], sizes = [8, 32], strides = [1, 1]} : vector<8x128xf32> to vector<8x32xf32>
    %512 = arith.negf %511 : vector<8x32xf32>
    %513 = math.exp %512 : vector<8x32xf32>
    %cst_167 = arith.constant 1.000000e+00 : f32
    %514 = vector.broadcast %cst_167 : f32 to vector<8x32xf32>
    %515 = arith.addf %514, %513 : vector<8x32xf32>
    %516 = arith.divf %514, %515 : vector<8x32xf32>
    %517 = vector.extract_strided_slice %510 {offsets = [0, 32], sizes = [8, 32], strides = [1, 1]} : vector<8x128xf32> to vector<8x32xf32>
    %518 = arith.negf %517 : vector<8x32xf32>
    %519 = math.exp %518 : vector<8x32xf32>
    %cst_168 = arith.constant 1.000000e+00 : f32
    %520 = vector.broadcast %cst_168 : f32 to vector<8x32xf32>
    %521 = arith.addf %520, %519 : vector<8x32xf32>
    %522 = arith.divf %520, %521 : vector<8x32xf32>
    %523 = vector.extract_strided_slice %510 {offsets = [0, 64], sizes = [8, 32], strides = [1, 1]} : vector<8x128xf32> to vector<8x32xf32>
    %524 = math.tanh %523 : vector<8x32xf32>
    %525 = vector.extract_strided_slice %510 {offsets = [0, 96], sizes = [8, 32], strides = [1, 1]} : vector<8x128xf32> to vector<8x32xf32>
    %526 = arith.negf %525 : vector<8x32xf32>
    %527 = math.exp %526 : vector<8x32xf32>
    %cst_169 = arith.constant 1.000000e+00 : f32
    %528 = vector.broadcast %cst_169 : f32 to vector<8x32xf32>
    %529 = arith.addf %528, %527 : vector<8x32xf32>
    %530 = arith.divf %528, %529 : vector<8x32xf32>
    %531 = arith.mulf %522, %470 : vector<8x32xf32>
    %532 = arith.mulf %516, %524 : vector<8x32xf32>
    %533 = arith.addf %531, %532 : vector<8x32xf32>
    %534 = math.tanh %533 : vector<8x32xf32>
    %535 = arith.mulf %530, %534 : vector<8x32xf32>
    %c8_i32 = arith.constant 8 : i32
    %c0_170 = arith.constant 0 : index
    %c0_171 = arith.constant 0 : index
    %536 = vector.load %arg9[%c0_170, %c0_171] : memref<64x64xf32, #tpu.memory_space<vmem>>, vector<64x64xf32>
    %c0_172 = arith.constant 0 : index
    %c0_173 = arith.constant 0 : index
    %537 = vector.load %arg11[%c0_172, %c0_173] : memref<64x64xf32, #tpu.memory_space<vmem>>, vector<64x64xf32>
    %538 = vector.extract_strided_slice %536 {offsets = [0, 0], sizes = [32, 64], strides = [1, 1]} : vector<64x64xf32> to vector<32x64xf32>
    %cst_174 = arith.constant dense<0.000000e+00> : vector<8x64xf32>
    %539 = tpu.matmul %503, %538, %cst_174 {dimension_numbers = #tpu.dot_dimension_numbers<[1], [0], [0], [1], [0, 0, 1, 1], [], []>} : vector<8x32xf32>, vector<32x64xf32>, vector<8x64xf32> -> vector<8x64xf32>
    %540 = vector.extract_strided_slice %536 {offsets = [32, 0], sizes = [32, 64], strides = [1, 1]} : vector<64x64xf32> to vector<32x64xf32>
    %cst_175 = arith.constant dense<0.000000e+00> : vector<8x64xf32>
    %541 = tpu.matmul %535, %540, %cst_175 {dimension_numbers = #tpu.dot_dimension_numbers<[1], [0], [0], [1], [0, 0, 1, 1], [], []>} : vector<8x32xf32>, vector<32x64xf32>, vector<8x64xf32> -> vector<8x64xf32>
    %542 = arith.addf %539, %541 : vector<8x64xf32>
    %c0_176 = arith.constant 0 : index
    %c0_177 = arith.constant 0 : index
    %543 = vector.load %arg10[%c0_176, %c0_177] : memref<1x64xf32, #tpu.memory_space<vmem>>, vector<1x64xf32>
    %544 = vector.broadcast %543 : vector<1x64xf32> to vector<8x64xf32>
    %545 = arith.addf %542, %544 : vector<8x64xf32>
    %546 = math.tanh %545 : vector<8x64xf32>
    %547 = vector.extract_strided_slice %537 {offsets = [0, 0], sizes = [32, 64], strides = [1, 1]} : vector<64x64xf32> to vector<32x64xf32>
    %cst_178 = arith.constant dense<0.000000e+00> : vector<8x64xf32>
    %548 = tpu.matmul %501, %547, %cst_178 {dimension_numbers = #tpu.dot_dimension_numbers<[1], [0], [0], [1], [0, 0, 1, 1], [], []>} : vector<8x32xf32>, vector<32x64xf32>, vector<8x64xf32> -> vector<8x64xf32>
    %549 = vector.extract_strided_slice %537 {offsets = [32, 0], sizes = [32, 64], strides = [1, 1]} : vector<64x64xf32> to vector<32x64xf32>
    %cst_179 = arith.constant dense<0.000000e+00> : vector<8x64xf32>
    %550 = tpu.matmul %533, %549, %cst_179 {dimension_numbers = #tpu.dot_dimension_numbers<[1], [0], [0], [1], [0, 0, 1, 1], [], []>} : vector<8x32xf32>, vector<32x64xf32>, vector<8x64xf32> -> vector<8x64xf32>
    %551 = arith.addf %548, %550 : vector<8x64xf32>
    %c0_180 = arith.constant 0 : index
    %c0_181 = arith.constant 0 : index
    %552 = vector.load %arg12[%c0_180, %c0_181] : memref<1x64xf32, #tpu.memory_space<vmem>>, vector<1x64xf32>
    %553 = vector.broadcast %552 : vector<1x64xf32> to vector<8x64xf32>
    %554 = arith.addf %551, %553 : vector<8x64xf32>
    %555 = math.tanh %554 : vector<8x64xf32>
    %c0_i32_182 = arith.constant 0 : i32
    %556 = arith.index_cast %c0_i32_182 : i32 to index
    %c0_183 = arith.constant 0 : index
    %c0_184 = arith.constant 0 : index
    %557 = vector.load %arg22[%556, %c0_183, %c0_184] : memref<8x8x256xf32, #tpu.memory_space<vmem>>, vector<1x8x256xf32>
    %558 = vector.shape_cast %557 : vector<1x8x256xf32> to vector<8x256xf32>
    %c0_185 = arith.constant 0 : index
    %c0_186 = arith.constant 0 : index
    %559 = vector.load %arg15[%c0_185, %c0_186] : memref<64x256xf32, #tpu.memory_space<vmem>>, vector<64x256xf32>
    %cst_187 = arith.constant dense<0.000000e+00> : vector<8x256xf32>
    %560 = tpu.matmul %546, %559, %cst_187 {dimension_numbers = #tpu.dot_dimension_numbers<[1], [0], [0], [1], [0, 0, 1, 1], [], []>} : vector<8x64xf32>, vector<64x256xf32>, vector<8x256xf32> -> vector<8x256xf32>
    %561 = arith.addf %558, %560 : vector<8x256xf32>
    %562 = vector.extract_strided_slice %561 {offsets = [0, 0], sizes = [8, 64], strides = [1, 1]} : vector<8x256xf32> to vector<8x64xf32>
    %563 = arith.negf %562 : vector<8x64xf32>
    %564 = math.exp %563 : vector<8x64xf32>
    %cst_188 = arith.constant 1.000000e+00 : f32
    %565 = vector.broadcast %cst_188 : f32 to vector<8x64xf32>
    %566 = arith.addf %565, %564 : vector<8x64xf32>
    %567 = arith.divf %565, %566 : vector<8x64xf32>
    %568 = vector.extract_strided_slice %561 {offsets = [0, 64], sizes = [8, 64], strides = [1, 1]} : vector<8x256xf32> to vector<8x64xf32>
    %569 = arith.negf %568 : vector<8x64xf32>
    %570 = math.exp %569 : vector<8x64xf32>
    %cst_189 = arith.constant 1.000000e+00 : f32
    %571 = vector.broadcast %cst_189 : f32 to vector<8x64xf32>
    %572 = arith.addf %571, %570 : vector<8x64xf32>
    %573 = arith.divf %571, %572 : vector<8x64xf32>
    %574 = vector.extract_strided_slice %561 {offsets = [0, 128], sizes = [8, 64], strides = [1, 1]} : vector<8x256xf32> to vector<8x64xf32>
    %575 = math.tanh %574 : vector<8x64xf32>
    %576 = vector.extract_strided_slice %561 {offsets = [0, 192], sizes = [8, 64], strides = [1, 1]} : vector<8x256xf32> to vector<8x64xf32>
    %577 = arith.negf %576 : vector<8x64xf32>
    %578 = math.exp %577 : vector<8x64xf32>
    %cst_190 = arith.constant 1.000000e+00 : f32
    %579 = vector.broadcast %cst_190 : f32 to vector<8x64xf32>
    %580 = arith.addf %579, %578 : vector<8x64xf32>
    %581 = arith.divf %579, %580 : vector<8x64xf32>
    %582 = arith.mulf %573, %555 : vector<8x64xf32>
    %583 = arith.mulf %567, %575 : vector<8x64xf32>
    %584 = arith.addf %582, %583 : vector<8x64xf32>
    %585 = math.tanh %584 : vector<8x64xf32>
    %586 = arith.mulf %581, %585 : vector<8x64xf32>
    %587 = arith.index_cast %c0_i32_182 : i32 to index
    %c0_191 = arith.constant 0 : index
    %c0_192 = arith.constant 0 : index
    %588 = vector.load %arg23[%587, %c0_191, %c0_192] : memref<8x8x64xf32, #tpu.memory_space<vmem>>, vector<1x8x64xf32>
    %589 = vector.shape_cast %588 : vector<1x8x64xf32> to vector<8x64xf32>
    %590 = vector.shape_cast %586 : vector<8x64xf32> to vector<1x8x64xf32>
    tpu.vector_store %arg23[%587, %c0_191, %c0_192], %590 {strides = array<i32>} : memref<8x8x64xf32, #tpu.memory_space<vmem>>, vector<1x8x64xf32>,
    %c1_i32_193 = arith.constant 1 : i32
    %591 = arith.index_cast %c1_i32_193 : i32 to index
    %c0_194 = arith.constant 0 : index
    %c0_195 = arith.constant 0 : index
    %592 = vector.load %arg22[%591, %c0_194, %c0_195] : memref<8x8x256xf32, #tpu.memory_space<vmem>>, vector<1x8x256xf32>
    %593 = vector.shape_cast %592 : vector<1x8x256xf32> to vector<8x256xf32>
    %c0_196 = arith.constant 0 : index
    %c0_197 = arith.constant 0 : index
    %594 = vector.load %arg15[%c0_196, %c0_197] : memref<64x256xf32, #tpu.memory_space<vmem>>, vector<64x256xf32>
    %cst_198 = arith.constant dense<0.000000e+00> : vector<8x256xf32>
    %595 = tpu.matmul %586, %594, %cst_198 {dimension_numbers = #tpu.dot_dimension_numbers<[1], [0], [0], [1], [0, 0, 1, 1], [], []>} : vector<8x64xf32>, vector<64x256xf32>, vector<8x256xf32> -> vector<8x256xf32>
    %596 = arith.addf %593, %595 : vector<8x256xf32>
    %597 = vector.extract_strided_slice %596 {offsets = [0, 0], sizes = [8, 64], strides = [1, 1]} : vector<8x256xf32> to vector<8x64xf32>
    %598 = arith.negf %597 : vector<8x64xf32>
    %599 = math.exp %598 : vector<8x64xf32>
    %cst_199 = arith.constant 1.000000e+00 : f32
    %600 = vector.broadcast %cst_199 : f32 to vector<8x64xf32>
    %601 = arith.addf %600, %599 : vector<8x64xf32>
    %602 = arith.divf %600, %601 : vector<8x64xf32>
    %603 = vector.extract_strided_slice %596 {offsets = [0, 64], sizes = [8, 64], strides = [1, 1]} : vector<8x256xf32> to vector<8x64xf32>
    %604 = arith.negf %603 : vector<8x64xf32>
    %605 = math.exp %604 : vector<8x64xf32>
    %cst_200 = arith.constant 1.000000e+00 : f32
    %606 = vector.broadcast %cst_200 : f32 to vector<8x64xf32>
    %607 = arith.addf %606, %605 : vector<8x64xf32>
    %608 = arith.divf %606, %607 : vector<8x64xf32>
    %609 = vector.extract_strided_slice %596 {offsets = [0, 128], sizes = [8, 64], strides = [1, 1]} : vector<8x256xf32> to vector<8x64xf32>
    %610 = math.tanh %609 : vector<8x64xf32>
    %611 = vector.extract_strided_slice %596 {offsets = [0, 192], sizes = [8, 64], strides = [1, 1]} : vector<8x256xf32> to vector<8x64xf32>
    %612 = arith.negf %611 : vector<8x64xf32>
    %613 = math.exp %612 : vector<8x64xf32>
    %cst_201 = arith.constant 1.000000e+00 : f32
    %614 = vector.broadcast %cst_201 : f32 to vector<8x64xf32>
    %615 = arith.addf %614, %613 : vector<8x64xf32>
    %616 = arith.divf %614, %615 : vector<8x64xf32>
    %617 = arith.mulf %608, %584 : vector<8x64xf32>
    %618 = arith.mulf %602, %610 : vector<8x64xf32>
    %619 = arith.addf %617, %618 : vector<8x64xf32>
    %620 = math.tanh %619 : vector<8x64xf32>
    %621 = arith.mulf %616, %620 : vector<8x64xf32>
    %622 = arith.index_cast %c1_i32_193 : i32 to index
    %c0_202 = arith.constant 0 : index
    %c0_203 = arith.constant 0 : index
    %623 = vector.load %arg23[%622, %c0_202, %c0_203] : memref<8x8x64xf32, #tpu.memory_space<vmem>>, vector<1x8x64xf32>
    %624 = vector.shape_cast %623 : vector<1x8x64xf32> to vector<8x64xf32>
    %625 = vector.shape_cast %621 : vector<8x64xf32> to vector<1x8x64xf32>
    tpu.vector_store %arg23[%622, %c0_202, %c0_203], %625 {strides = array<i32>} : memref<8x8x64xf32, #tpu.memory_space<vmem>>, vector<1x8x64xf32>,
    %c2_i32_204 = arith.constant 2 : i32
    %626 = arith.index_cast %c2_i32_204 : i32 to index
    %c0_205 = arith.constant 0 : index
    %c0_206 = arith.constant 0 : index
    %627 = vector.load %arg22[%626, %c0_205, %c0_206] : memref<8x8x256xf32, #tpu.memory_space<vmem>>, vector<1x8x256xf32>
    %628 = vector.shape_cast %627 : vector<1x8x256xf32> to vector<8x256xf32>
    %c0_207 = arith.constant 0 : index
    %c0_208 = arith.constant 0 : index
    %629 = vector.load %arg15[%c0_207, %c0_208] : memref<64x256xf32, #tpu.memory_space<vmem>>, vector<64x256xf32>
    %cst_209 = arith.constant dense<0.000000e+00> : vector<8x256xf32>
    %630 = tpu.matmul %621, %629, %cst_209 {dimension_numbers = #tpu.dot_dimension_numbers<[1], [0], [0], [1], [0, 0, 1, 1], [], []>} : vector<8x64xf32>, vector<64x256xf32>, vector<8x256xf32> -> vector<8x256xf32>
    %631 = arith.addf %628, %630 : vector<8x256xf32>
    %632 = vector.extract_strided_slice %631 {offsets = [0, 0], sizes = [8, 64], strides = [1, 1]} : vector<8x256xf32> to vector<8x64xf32>
    %633 = arith.negf %632 : vector<8x64xf32>
    %634 = math.exp %633 : vector<8x64xf32>
    %cst_210 = arith.constant 1.000000e+00 : f32
    %635 = vector.broadcast %cst_210 : f32 to vector<8x64xf32>
    %636 = arith.addf %635, %634 : vector<8x64xf32>
    %637 = arith.divf %635, %636 : vector<8x64xf32>
    %638 = vector.extract_strided_slice %631 {offsets = [0, 64], sizes = [8, 64], strides = [1, 1]} : vector<8x256xf32> to vector<8x64xf32>
    %639 = arith.negf %638 : vector<8x64xf32>
    %640 = math.exp %639 : vector<8x64xf32>
    %cst_211 = arith.constant 1.000000e+00 : f32
    %641 = vector.broadcast %cst_211 : f32 to vector<8x64xf32>
    %642 = arith.addf %641, %640 : vector<8x64xf32>
    %643 = arith.divf %641, %642 : vector<8x64xf32>
    %644 = vector.extract_strided_slice %631 {offsets = [0, 128], sizes = [8, 64], strides = [1, 1]} : vector<8x256xf32> to vector<8x64xf32>
    %645 = math.tanh %644 : vector<8x64xf32>
    %646 = vector.extract_strided_slice %631 {offsets = [0, 192], sizes = [8, 64], strides = [1, 1]} : vector<8x256xf32> to vector<8x64xf32>
    %647 = arith.negf %646 : vector<8x64xf32>
    %648 = math.exp %647 : vector<8x64xf32>
    %cst_212 = arith.constant 1.000000e+00 : f32
    %649 = vector.broadcast %cst_212 : f32 to vector<8x64xf32>
    %650 = arith.addf %649, %648 : vector<8x64xf32>
    %651 = arith.divf %649, %650 : vector<8x64xf32>
    %652 = arith.mulf %643, %619 : vector<8x64xf32>
    %653 = arith.mulf %637, %645 : vector<8x64xf32>
    %654 = arith.addf %652, %653 : vector<8x64xf32>
    %655 = math.tanh %654 : vector<8x64xf32>
    %656 = arith.mulf %651, %655 : vector<8x64xf32>
    %657 = arith.index_cast %c2_i32_204 : i32 to index
    %c0_213 = arith.constant 0 : index
    %c0_214 = arith.constant 0 : index
    %658 = vector.load %arg23[%657, %c0_213, %c0_214] : memref<8x8x64xf32, #tpu.memory_space<vmem>>, vector<1x8x64xf32>
    %659 = vector.shape_cast %658 : vector<1x8x64xf32> to vector<8x64xf32>
    %660 = vector.shape_cast %656 : vector<8x64xf32> to vector<1x8x64xf32>
    tpu.vector_store %arg23[%657, %c0_213, %c0_214], %660 {strides = array<i32>} : memref<8x8x64xf32, #tpu.memory_space<vmem>>, vector<1x8x64xf32>,
    %c3_i32_215 = arith.constant 3 : i32
    %661 = arith.index_cast %c3_i32_215 : i32 to index
    %c0_216 = arith.constant 0 : index
    %c0_217 = arith.constant 0 : index
    %662 = vector.load %arg22[%661, %c0_216, %c0_217] : memref<8x8x256xf32, #tpu.memory_space<vmem>>, vector<1x8x256xf32>
    %663 = vector.shape_cast %662 : vector<1x8x256xf32> to vector<8x256xf32>
    %c0_218 = arith.constant 0 : index
    %c0_219 = arith.constant 0 : index
    %664 = vector.load %arg15[%c0_218, %c0_219] : memref<64x256xf32, #tpu.memory_space<vmem>>, vector<64x256xf32>
    %cst_220 = arith.constant dense<0.000000e+00> : vector<8x256xf32>
    %665 = tpu.matmul %656, %664, %cst_220 {dimension_numbers = #tpu.dot_dimension_numbers<[1], [0], [0], [1], [0, 0, 1, 1], [], []>} : vector<8x64xf32>, vector<64x256xf32>, vector<8x256xf32> -> vector<8x256xf32>
    %666 = arith.addf %663, %665 : vector<8x256xf32>
    %667 = vector.extract_strided_slice %666 {offsets = [0, 0], sizes = [8, 64], strides = [1, 1]} : vector<8x256xf32> to vector<8x64xf32>
    %668 = arith.negf %667 : vector<8x64xf32>
    %669 = math.exp %668 : vector<8x64xf32>
    %cst_221 = arith.constant 1.000000e+00 : f32
    %670 = vector.broadcast %cst_221 : f32 to vector<8x64xf32>
    %671 = arith.addf %670, %669 : vector<8x64xf32>
    %672 = arith.divf %670, %671 : vector<8x64xf32>
    %673 = vector.extract_strided_slice %666 {offsets = [0, 64], sizes = [8, 64], strides = [1, 1]} : vector<8x256xf32> to vector<8x64xf32>
    %674 = arith.negf %673 : vector<8x64xf32>
    %675 = math.exp %674 : vector<8x64xf32>
    %cst_222 = arith.constant 1.000000e+00 : f32
    %676 = vector.broadcast %cst_222 : f32 to vector<8x64xf32>
    %677 = arith.addf %676, %675 : vector<8x64xf32>
    %678 = arith.divf %676, %677 : vector<8x64xf32>
    %679 = vector.extract_strided_slice %666 {offsets = [0, 128], sizes = [8, 64], strides = [1, 1]} : vector<8x256xf32> to vector<8x64xf32>
    %680 = math.tanh %679 : vector<8x64xf32>
    %681 = vector.extract_strided_slice %666 {offsets = [0, 192], sizes = [8, 64], strides = [1, 1]} : vector<8x256xf32> to vector<8x64xf32>
    %682 = arith.negf %681 : vector<8x64xf32>
    %683 = math.exp %682 : vector<8x64xf32>
    %cst_223 = arith.constant 1.000000e+00 : f32
    %684 = vector.broadcast %cst_223 : f32 to vector<8x64xf32>
    %685 = arith.addf %684, %683 : vector<8x64xf32>
    %686 = arith.divf %684, %685 : vector<8x64xf32>
    %687 = arith.mulf %678, %654 : vector<8x64xf32>
    %688 = arith.mulf %672, %680 : vector<8x64xf32>
    %689 = arith.addf %687, %688 : vector<8x64xf32>
    %690 = math.tanh %689 : vector<8x64xf32>
    %691 = arith.mulf %686, %690 : vector<8x64xf32>
    %692 = arith.index_cast %c3_i32_215 : i32 to index
    %c0_224 = arith.constant 0 : index
    %c0_225 = arith.constant 0 : index
    %693 = vector.load %arg23[%692, %c0_224, %c0_225] : memref<8x8x64xf32, #tpu.memory_space<vmem>>, vector<1x8x64xf32>
    %694 = vector.shape_cast %693 : vector<1x8x64xf32> to vector<8x64xf32>
    %695 = vector.shape_cast %691 : vector<8x64xf32> to vector<1x8x64xf32>
    tpu.vector_store %arg23[%692, %c0_224, %c0_225], %695 {strides = array<i32>} : memref<8x8x64xf32, #tpu.memory_space<vmem>>, vector<1x8x64xf32>,
    %c4_i32_226 = arith.constant 4 : i32
    %696 = arith.index_cast %c4_i32_226 : i32 to index
    %c0_227 = arith.constant 0 : index
    %c0_228 = arith.constant 0 : index
    %697 = vector.load %arg22[%696, %c0_227, %c0_228] : memref<8x8x256xf32, #tpu.memory_space<vmem>>, vector<1x8x256xf32>
    %698 = vector.shape_cast %697 : vector<1x8x256xf32> to vector<8x256xf32>
    %c0_229 = arith.constant 0 : index
    %c0_230 = arith.constant 0 : index
    %699 = vector.load %arg15[%c0_229, %c0_230] : memref<64x256xf32, #tpu.memory_space<vmem>>, vector<64x256xf32>
    %cst_231 = arith.constant dense<0.000000e+00> : vector<8x256xf32>
    %700 = tpu.matmul %691, %699, %cst_231 {dimension_numbers = #tpu.dot_dimension_numbers<[1], [0], [0], [1], [0, 0, 1, 1], [], []>} : vector<8x64xf32>, vector<64x256xf32>, vector<8x256xf32> -> vector<8x256xf32>
    %701 = arith.addf %698, %700 : vector<8x256xf32>
    %702 = vector.extract_strided_slice %701 {offsets = [0, 0], sizes = [8, 64], strides = [1, 1]} : vector<8x256xf32> to vector<8x64xf32>
    %703 = arith.negf %702 : vector<8x64xf32>
    %704 = math.exp %703 : vector<8x64xf32>
    %cst_232 = arith.constant 1.000000e+00 : f32
    %705 = vector.broadcast %cst_232 : f32 to vector<8x64xf32>
    %706 = arith.addf %705, %704 : vector<8x64xf32>
    %707 = arith.divf %705, %706 : vector<8x64xf32>
    %708 = vector.extract_strided_slice %701 {offsets = [0, 64], sizes = [8, 64], strides = [1, 1]} : vector<8x256xf32> to vector<8x64xf32>
    %709 = arith.negf %708 : vector<8x64xf32>
    %710 = math.exp %709 : vector<8x64xf32>
    %cst_233 = arith.constant 1.000000e+00 : f32
    %711 = vector.broadcast %cst_233 : f32 to vector<8x64xf32>
    %712 = arith.addf %711, %710 : vector<8x64xf32>
    %713 = arith.divf %711, %712 : vector<8x64xf32>
    %714 = vector.extract_strided_slice %701 {offsets = [0, 128], sizes = [8, 64], strides = [1, 1]} : vector<8x256xf32> to vector<8x64xf32>
    %715 = math.tanh %714 : vector<8x64xf32>
    %716 = vector.extract_strided_slice %701 {offsets = [0, 192], sizes = [8, 64], strides = [1, 1]} : vector<8x256xf32> to vector<8x64xf32>
    %717 = arith.negf %716 : vector<8x64xf32>
    %718 = math.exp %717 : vector<8x64xf32>
    %cst_234 = arith.constant 1.000000e+00 : f32
    %719 = vector.broadcast %cst_234 : f32 to vector<8x64xf32>
    %720 = arith.addf %719, %718 : vector<8x64xf32>
    %721 = arith.divf %719, %720 : vector<8x64xf32>
    %722 = arith.mulf %713, %689 : vector<8x64xf32>
    %723 = arith.mulf %707, %715 : vector<8x64xf32>
    %724 = arith.addf %722, %723 : vector<8x64xf32>
    %725 = math.tanh %724 : vector<8x64xf32>
    %726 = arith.mulf %721, %725 : vector<8x64xf32>
    %727 = arith.index_cast %c4_i32_226 : i32 to index
    %c0_235 = arith.constant 0 : index
    %c0_236 = arith.constant 0 : index
    %728 = vector.load %arg23[%727, %c0_235, %c0_236] : memref<8x8x64xf32, #tpu.memory_space<vmem>>, vector<1x8x64xf32>
    %729 = vector.shape_cast %728 : vector<1x8x64xf32> to vector<8x64xf32>
    %730 = vector.shape_cast %726 : vector<8x64xf32> to vector<1x8x64xf32>
    tpu.vector_store %arg23[%727, %c0_235, %c0_236], %730 {strides = array<i32>} : memref<8x8x64xf32, #tpu.memory_space<vmem>>, vector<1x8x64xf32>,
    %c5_i32_237 = arith.constant 5 : i32
    %731 = arith.index_cast %c5_i32_237 : i32 to index
    %c0_238 = arith.constant 0 : index
    %c0_239 = arith.constant 0 : index
    %732 = vector.load %arg22[%731, %c0_238, %c0_239] : memref<8x8x256xf32, #tpu.memory_space<vmem>>, vector<1x8x256xf32>
    %733 = vector.shape_cast %732 : vector<1x8x256xf32> to vector<8x256xf32>
    %c0_240 = arith.constant 0 : index
    %c0_241 = arith.constant 0 : index
    %734 = vector.load %arg15[%c0_240, %c0_241] : memref<64x256xf32, #tpu.memory_space<vmem>>, vector<64x256xf32>
    %cst_242 = arith.constant dense<0.000000e+00> : vector<8x256xf32>
    %735 = tpu.matmul %726, %734, %cst_242 {dimension_numbers = #tpu.dot_dimension_numbers<[1], [0], [0], [1], [0, 0, 1, 1], [], []>} : vector<8x64xf32>, vector<64x256xf32>, vector<8x256xf32> -> vector<8x256xf32>
    %736 = arith.addf %733, %735 : vector<8x256xf32>
    %737 = vector.extract_strided_slice %736 {offsets = [0, 0], sizes = [8, 64], strides = [1, 1]} : vector<8x256xf32> to vector<8x64xf32>
    %738 = arith.negf %737 : vector<8x64xf32>
    %739 = math.exp %738 : vector<8x64xf32>
    %cst_243 = arith.constant 1.000000e+00 : f32
    %740 = vector.broadcast %cst_243 : f32 to vector<8x64xf32>
    %741 = arith.addf %740, %739 : vector<8x64xf32>
    %742 = arith.divf %740, %741 : vector<8x64xf32>
    %743 = vector.extract_strided_slice %736 {offsets = [0, 64], sizes = [8, 64], strides = [1, 1]} : vector<8x256xf32> to vector<8x64xf32>
    %744 = arith.negf %743 : vector<8x64xf32>
    %745 = math.exp %744 : vector<8x64xf32>
    %cst_244 = arith.constant 1.000000e+00 : f32
    %746 = vector.broadcast %cst_244 : f32 to vector<8x64xf32>
    %747 = arith.addf %746, %745 : vector<8x64xf32>
    %748 = arith.divf %746, %747 : vector<8x64xf32>
    %749 = vector.extract_strided_slice %736 {offsets = [0, 128], sizes = [8, 64], strides = [1, 1]} : vector<8x256xf32> to vector<8x64xf32>
    %750 = math.tanh %749 : vector<8x64xf32>
    %751 = vector.extract_strided_slice %736 {offsets = [0, 192], sizes = [8, 64], strides = [1, 1]} : vector<8x256xf32> to vector<8x64xf32>
    %752 = arith.negf %751 : vector<8x64xf32>
    %753 = math.exp %752 : vector<8x64xf32>
    %cst_245 = arith.constant 1.000000e+00 : f32
    %754 = vector.broadcast %cst_245 : f32 to vector<8x64xf32>
    %755 = arith.addf %754, %753 : vector<8x64xf32>
    %756 = arith.divf %754, %755 : vector<8x64xf32>
    %757 = arith.mulf %748, %724 : vector<8x64xf32>
    %758 = arith.mulf %742, %750 : vector<8x64xf32>
    %759 = arith.addf %757, %758 : vector<8x64xf32>
    %760 = math.tanh %759 : vector<8x64xf32>
    %761 = arith.mulf %756, %760 : vector<8x64xf32>
    %762 = arith.index_cast %c5_i32_237 : i32 to index
    %c0_246 = arith.constant 0 : index
    %c0_247 = arith.constant 0 : index
    %763 = vector.load %arg23[%762, %c0_246, %c0_247] : memref<8x8x64xf32, #tpu.memory_space<vmem>>, vector<1x8x64xf32>
    %764 = vector.shape_cast %763 : vector<1x8x64xf32> to vector<8x64xf32>
    %765 = vector.shape_cast %761 : vector<8x64xf32> to vector<1x8x64xf32>
    tpu.vector_store %arg23[%762, %c0_246, %c0_247], %765 {strides = array<i32>} : memref<8x8x64xf32, #tpu.memory_space<vmem>>, vector<1x8x64xf32>,
    %c6_i32_248 = arith.constant 6 : i32
    %766 = arith.index_cast %c6_i32_248 : i32 to index
    %c0_249 = arith.constant 0 : index
    %c0_250 = arith.constant 0 : index
    %767 = vector.load %arg22[%766, %c0_249, %c0_250] : memref<8x8x256xf32, #tpu.memory_space<vmem>>, vector<1x8x256xf32>
    %768 = vector.shape_cast %767 : vector<1x8x256xf32> to vector<8x256xf32>
    %c0_251 = arith.constant 0 : index
    %c0_252 = arith.constant 0 : index
    %769 = vector.load %arg15[%c0_251, %c0_252] : memref<64x256xf32, #tpu.memory_space<vmem>>, vector<64x256xf32>
    %cst_253 = arith.constant dense<0.000000e+00> : vector<8x256xf32>
    %770 = tpu.matmul %761, %769, %cst_253 {dimension_numbers = #tpu.dot_dimension_numbers<[1], [0], [0], [1], [0, 0, 1, 1], [], []>} : vector<8x64xf32>, vector<64x256xf32>, vector<8x256xf32> -> vector<8x256xf32>
    %771 = arith.addf %768, %770 : vector<8x256xf32>
    %772 = vector.extract_strided_slice %771 {offsets = [0, 0], sizes = [8, 64], strides = [1, 1]} : vector<8x256xf32> to vector<8x64xf32>
    %773 = arith.negf %772 : vector<8x64xf32>
    %774 = math.exp %773 : vector<8x64xf32>
    %cst_254 = arith.constant 1.000000e+00 : f32
    %775 = vector.broadcast %cst_254 : f32 to vector<8x64xf32>
    %776 = arith.addf %775, %774 : vector<8x64xf32>
    %777 = arith.divf %775, %776 : vector<8x64xf32>
    %778 = vector.extract_strided_slice %771 {offsets = [0, 64], sizes = [8, 64], strides = [1, 1]} : vector<8x256xf32> to vector<8x64xf32>
    %779 = arith.negf %778 : vector<8x64xf32>
    %780 = math.exp %779 : vector<8x64xf32>
    %cst_255 = arith.constant 1.000000e+00 : f32
    %781 = vector.broadcast %cst_255 : f32 to vector<8x64xf32>
    %782 = arith.addf %781, %780 : vector<8x64xf32>
    %783 = arith.divf %781, %782 : vector<8x64xf32>
    %784 = vector.extract_strided_slice %771 {offsets = [0, 128], sizes = [8, 64], strides = [1, 1]} : vector<8x256xf32> to vector<8x64xf32>
    %785 = math.tanh %784 : vector<8x64xf32>
    %786 = vector.extract_strided_slice %771 {offsets = [0, 192], sizes = [8, 64], strides = [1, 1]} : vector<8x256xf32> to vector<8x64xf32>
    %787 = arith.negf %786 : vector<8x64xf32>
    %788 = math.exp %787 : vector<8x64xf32>
    %cst_256 = arith.constant 1.000000e+00 : f32
    %789 = vector.broadcast %cst_256 : f32 to vector<8x64xf32>
    %790 = arith.addf %789, %788 : vector<8x64xf32>
    %791 = arith.divf %789, %790 : vector<8x64xf32>
    %792 = arith.mulf %783, %759 : vector<8x64xf32>
    %793 = arith.mulf %777, %785 : vector<8x64xf32>
    %794 = arith.addf %792, %793 : vector<8x64xf32>
    %795 = math.tanh %794 : vector<8x64xf32>
    %796 = arith.mulf %791, %795 : vector<8x64xf32>
    %797 = arith.index_cast %c6_i32_248 : i32 to index
    %c0_257 = arith.constant 0 : index
    %c0_258 = arith.constant 0 : index
    %798 = vector.load %arg23[%797, %c0_257, %c0_258] : memref<8x8x64xf32, #tpu.memory_space<vmem>>, vector<1x8x64xf32>
    %799 = vector.shape_cast %798 : vector<1x8x64xf32> to vector<8x64xf32>
    %800 = vector.shape_cast %796 : vector<8x64xf32> to vector<1x8x64xf32>
    tpu.vector_store %arg23[%797, %c0_257, %c0_258], %800 {strides = array<i32>} : memref<8x8x64xf32, #tpu.memory_space<vmem>>, vector<1x8x64xf32>,
    %c7_i32_259 = arith.constant 7 : i32
    %801 = arith.index_cast %c7_i32_259 : i32 to index
    %c0_260 = arith.constant 0 : index
    %c0_261 = arith.constant 0 : index
    %802 = vector.load %arg22[%801, %c0_260, %c0_261] : memref<8x8x256xf32, #tpu.memory_space<vmem>>, vector<1x8x256xf32>
    %803 = vector.shape_cast %802 : vector<1x8x256xf32> to vector<8x256xf32>
    %c0_262 = arith.constant 0 : index
    %c0_263 = arith.constant 0 : index
    %804 = vector.load %arg15[%c0_262, %c0_263] : memref<64x256xf32, #tpu.memory_space<vmem>>, vector<64x256xf32>
    %cst_264 = arith.constant dense<0.000000e+00> : vector<8x256xf32>
    %805 = tpu.matmul %796, %804, %cst_264 {dimension_numbers = #tpu.dot_dimension_numbers<[1], [0], [0], [1], [0, 0, 1, 1], [], []>} : vector<8x64xf32>, vector<64x256xf32>, vector<8x256xf32> -> vector<8x256xf32>
    %806 = arith.addf %803, %805 : vector<8x256xf32>
    %807 = vector.extract_strided_slice %806 {offsets = [0, 0], sizes = [8, 64], strides = [1, 1]} : vector<8x256xf32> to vector<8x64xf32>
    %808 = arith.negf %807 : vector<8x64xf32>
    %809 = math.exp %808 : vector<8x64xf32>
    %cst_265 = arith.constant 1.000000e+00 : f32
    %810 = vector.broadcast %cst_265 : f32 to vector<8x64xf32>
    %811 = arith.addf %810, %809 : vector<8x64xf32>
    %812 = arith.divf %810, %811 : vector<8x64xf32>
    %813 = vector.extract_strided_slice %806 {offsets = [0, 64], sizes = [8, 64], strides = [1, 1]} : vector<8x256xf32> to vector<8x64xf32>
    %814 = arith.negf %813 : vector<8x64xf32>
    %815 = math.exp %814 : vector<8x64xf32>
    %cst_266 = arith.constant 1.000000e+00 : f32
    %816 = vector.broadcast %cst_266 : f32 to vector<8x64xf32>
    %817 = arith.addf %816, %815 : vector<8x64xf32>
    %818 = arith.divf %816, %817 : vector<8x64xf32>
    %819 = vector.extract_strided_slice %806 {offsets = [0, 128], sizes = [8, 64], strides = [1, 1]} : vector<8x256xf32> to vector<8x64xf32>
    %820 = math.tanh %819 : vector<8x64xf32>
    %821 = vector.extract_strided_slice %806 {offsets = [0, 192], sizes = [8, 64], strides = [1, 1]} : vector<8x256xf32> to vector<8x64xf32>
    %822 = arith.negf %821 : vector<8x64xf32>
    %823 = math.exp %822 : vector<8x64xf32>
    %cst_267 = arith.constant 1.000000e+00 : f32
    %824 = vector.broadcast %cst_267 : f32 to vector<8x64xf32>
    %825 = arith.addf %824, %823 : vector<8x64xf32>
    %826 = arith.divf %824, %825 : vector<8x64xf32>
    %827 = arith.mulf %818, %794 : vector<8x64xf32>
    %828 = arith.mulf %812, %820 : vector<8x64xf32>
    %829 = arith.addf %827, %828 : vector<8x64xf32>
    %830 = math.tanh %829 : vector<8x64xf32>
    %831 = arith.mulf %826, %830 : vector<8x64xf32>
    %832 = arith.index_cast %c7_i32_259 : i32 to index
    %c0_268 = arith.constant 0 : index
    %c0_269 = arith.constant 0 : index
    %833 = vector.load %arg23[%832, %c0_268, %c0_269] : memref<8x8x64xf32, #tpu.memory_space<vmem>>, vector<1x8x64xf32>
    %834 = vector.shape_cast %833 : vector<1x8x64xf32> to vector<8x64xf32>
    %835 = vector.shape_cast %831 : vector<8x64xf32> to vector<1x8x64xf32>
    tpu.vector_store %arg23[%832, %c0_268, %c0_269], %835 {strides = array<i32>} : memref<8x8x64xf32, #tpu.memory_space<vmem>>, vector<1x8x64xf32>,
    %c8_i32_270 = arith.constant 8 : i32
    %c0_271 = arith.constant 0 : index
    %c0_272 = arith.constant 0 : index
    %c0_273 = arith.constant 0 : index
    %836 = vector.load %arg23[%c0_271, %c0_272, %c0_273] : memref<8x8x64xf32, #tpu.memory_space<vmem>>, vector<8x8x64xf32>
    %837 = vector.shape_cast %836 : vector<8x8x64xf32> to vector<64x64xf32>
    %c0_274 = arith.constant 0 : index
    %c0_275 = arith.constant 0 : index
    %838 = vector.load %arg17[%c0_274, %c0_275] : memref<64x128xf32, #tpu.memory_space<vmem>>, vector<64x128xf32>
    %cst_276 = arith.constant dense<0.000000e+00> : vector<64x128xf32>
    %839 = tpu.matmul %837, %838, %cst_276 {dimension_numbers = #tpu.dot_dimension_numbers<[1], [0], [0], [1], [0, 0, 1, 1], [], []>} : vector<64x64xf32>, vector<64x128xf32>, vector<64x128xf32> -> vector<64x128xf32>
    %c0_277 = arith.constant 0 : index
    %c0_278 = arith.constant 0 : index
    %840 = vector.load %arg18[%c0_277, %c0_278] : memref<1x128xf32, #tpu.memory_space<vmem>>, vector<1x128xf32>
    %841 = vector.broadcast %840 : vector<1x128xf32> to vector<64x128xf32>
    %842 = arith.addf %839, %841 : vector<64x128xf32>
    %843 = vector.shape_cast %842 : vector<64x128xf32> to vector<8x8x128xf32>
    %c0_279 = arith.constant 0 : index
    %c0_280 = arith.constant 0 : index
    %c0_281 = arith.constant 0 : index
    %844 = vector.load %arg19[%c0_279, %c0_280, %c0_281] : memref<8x8x128xf32, #tpu.memory_space<vmem>>, vector<8x8x128xf32>
    tpu.vector_store %arg19[%c0_279, %c0_280, %c0_281], %843 {strides = array<i32>} : memref<8x8x128xf32, #tpu.memory_space<vmem>>, vector<8x8x128xf32>,
    return
  }
}

</mosaic_0001>

<bundles_post_ra>
// kernel: speakaddr_forward.1
= control target key start
LH: loop header
LB: loop body
LE: loop exit
PB: predicated region body
PF: predicated region fallthrough
CT: control target
= control target key end

     0   :  { %vm81_vm0 = vcmask 261120   ;;  %v4818_v3 = vmov 0.0|0.0   ;;  %vm4819_vm1 = vmmov 0   ;;  %v4820_v4 = vmov 0.0   ;;  %s4822_s25 = smov 32   ;;  %s5723_s3 = inlined_call_operand.vmem [shape: f32[32,128], index: 3, kind: input, shape index: {}]   ;;  %s5724_s0 = inlined_call_operand.vmem [shape: f32[8,8,32], index: 0, kind: input, shape index: {}]   ;;  %s5725_s6 = inlined_call_operand.vmem [shape: f32[32,128], index: 6, kind: input, shape index: {}]   ;;  %s5726_s14 = inlined_call_operand.vmem [shape: f32[32,256], index: 14, kind: input, shape index: {}]   ;;  %s5727_s4 = inlined_call_operand.vmem [shape: f32[32,128], index: 4, kind: input, shape index: {}]   ;;  %s5728_s13 = inlined_call_operand.vmem [shape: f32[32,256], index: 13, kind: input, shape index: {}]   ;;  %s5729_s2 = inlined_call_operand.vmem [shape: f32[8,32], index: 2, kind: input, shape index: {}]   ;;  %s5730_s1 = inlined_call_operand.vmem [shape: f32[8,8,32], index: 1, kind: input, shape index: {}]   ;;  %s5731_s7 = inlined_call_operand.vmem [shape: f32[32,128], index: 7, kind: input, shape index: {}]   ;;  %s5732_s5 = inlined_call_operand.vmem [shape: f32[1,128], index: 5, kind: input, shape index: {}]   ;;  %s5733_s8 = inlined_call_operand.vmem [shape: f32[1,128], index: 8, kind: input, shape index: {}]   ;;  %s5734_s16 = inlined_call_operand.vmem [shape: f32[1,256], index: 16, kind: input, shape index: {}]   ;;  %s5735_s9 = inlined_call_operand.vmem [shape: f32[64,64], index: 9, kind: input, shape index: {}]   ;;  %s5736_s11 = inlined_call_operand.vmem [shape: f32[64,64], index: 11, kind: input, shape index: {}]   ;;  %s5737_s15 = inlined_call_operand.vmem [shape: f32[64,256], index: 15, kind: input, shape index: {}]   ;;  %s5738_s10 = inlined_call_operand.vmem [shape: f32[1,64], index: 10, kind: input, shape index: {}]   ;;  %s5739_s12 = inlined_call_operand.vmem [shape: f32[1,64], index: 12, kind: input, shape index: {}]   ;;  %s5740_s17 = inlined_call_operand.vmem [shape: f32[64,128], index: 17, kind: input, shape index: {}]   ;;  %s5741_s18 = inlined_call_operand.vmem [shape: f32[1,128], index: 18, kind: input, shape index: {}]   ;;  %s5742_s19 = inlined_call_operand.vmem [shape: f32[8,8,128], index: 19, kind: output, shape index: {}]  }
   0x1   :  { %5747 = sst [smem:[#allocation6_spill]] %s5723_s3  ;;  %4312 = vmatprep.subr.bf16.mxu1 %v4818_v3  ;;  %4060 = vmatprep.mubr.msk.f32.mxu1 %vm4819_vm1, %v4820_v4  ;;  %v624_v19 = vld [vmem:[%s5727_s4] sm:$0xff]  ;;  %v625_v20 = vld [vmem:[%s5727_s4 + $0x8] sm:$0xff]  ;;  %v626_v25 = vld [vmem:[%s5727_s4 + $0x10] sm:$0xff]  ;;  %vm2606_vm2 = vcmask 523264  }
   0x2   :  { %5748 = sst [smem:[#allocation7_spill]] %s5724_s0  ;;  %s5751_s20 = sld [smem:[#allocation6_spill]]  ;;  %v4978_v22 = vpack.c.bf16 %v625_v20, %v624_v19  ;;  %v627_v26 = vld [vmem:[%s5727_s4 + $0x18] sm:$0xff]  ;;  %v447_v39 = vld [vmem:[%s5728_s13 + $0x8] sm:$0xff]  ;;  %v446_v43 = vld [vmem:[%s5728_s13] sm:$0xff] }
   0x3   :  { %5749 = sst [smem:[#allocation8_spill]] %s5725_s6  ;;  %s5752_s26 = sld [smem:[#allocation7_spill]]  ;;  %v4996_v28 = vpack.c.bf16 %v627_v26, %v626_v25  ;;  %v449_v40 = vld [vmem:[%s5728_s13 + $0x18] sm:$0xff]  ;;  %v448_v44 = vld [vmem:[%s5728_s13 + $0x10] sm:$0xff]  ;;  %v451_v45 = vld [vmem:[%s5728_s13 + $0x28] sm:$0xff] }
   0x4   :  { %5750 = sst [smem:[#allocation9_spill]] %s5726_s14  ;;  %s5753_s29 = sld [smem:[#allocation8_spill]]  ;;  %4314 = vmatpush3.bf16.msra.mxu1 %v4978_v22  ;;  %v4280_v42 = vpack.c.bf16 %v449_v40, %v447_v39  ;;  %v453_v46 = vld [vmem:[%s5728_s13 + $0x38] sm:$0xff]  ;;  %v351_v47 = vld [vmem:[%s5729_s2] sm:$0xff]  ;;  %v4282_v48 = vpack.c.bf16 %v448_v44, %v446_v43  ;;  %v452_v51 = vld [vmem:[%s5728_s13 + $0x30] sm:$0xff] }
   0x5   :  { %s5754_s28 = sld [smem:[#allocation9_spill]]  ;;  %4315 = vmatprep.subr.bf16.mxu1 %v4818_v3  ;;  %v4284_v49 = vpack.c.bf16 %v453_v46, %v451_v45  ;;  %v450_v50 = vld [vmem:[%s5728_s13 + $0x20] sm:$0xff]  ;;  %v344_v54 = vld [vmem:[%s5730_s1 + $0x8] sm:$0xff]  ;;  %v345_v55 = vld [vmem:[%s5730_s1 + $0x10] sm:$0xff]  ;;  %s4823_s6 = smov 96  }
   0x6   :  { %v4286_v52 = vpack.c.bf16 %v452_v51, %v450_v50  ;;  %v343_v53 = vld [vmem:[%s5730_s1] sm:$0xff]  ;;  %v346_v56 = vld [vmem:[%s5730_s1 + $0x18] sm:$0xff]  ;;  %v348_v58 = vld [vmem:[%s5730_s1 + $0x28] sm:$0xff] }
   0x7   :  { %v347_v57 = vld [vmem:[%s5730_s1 + $0x20] sm:$0xff]  ;;  %v349_v59 = vld [vmem:[%s5730_s1 + $0x30] sm:$0xff]  ;;  %v350_v60 = vld [vmem:[%s5730_s1 + $0x38] sm:$0xff] }
   0x8   :  { %v70_v0 = vld [vmem:[%s5751_s20] sm:$0xff]  ;;  %v71_v1 = vld [vmem:[%s5751_s20 + $0x8] sm:$0xff]  ;;  %v72_v2 = vld [vmem:[%s5751_s20 + $0x10] sm:$0xff]  ;;  %4317 = vmatpush3.bf16.msra.mxu1 %v4996_v28 }
   0x9   :  { %v4256_v5 = vpack.c.bf16 %v71_v1, %v70_v0  ;;  %v73_v6 = vld [vmem:[%s5751_s20 + $0x18] sm:$0xff]  ;;  %v62_v7 = vld [vmem:[%s5752_s26] sm:$0xff]  ;;  %v63_v14 = vld [vmem:[%s5752_s26 + $0x8] sm:$0xff]  ;;  %4324 = vmatprep.subr.bf16.mxu1 %v4818_v3 }
   0xa   :  { %v4260_v8 = vpack.c.bf16 %v73_v6, %v72_v2  ;;  %3976 = vmatprep.mubr.msk.f32.mxu0 %vm81_vm0, %v62_v7  ;;  %v219_v9 = vld [vmem:[%s5753_s29] sm:$0xff]  ;;  %v220_v10 = vld [vmem:[%s5753_s29 + $0x8] sm:$0xff]  ;;  %v221_v12 = vld [vmem:[%s5753_s29 + $0x10] sm:$0xff] }
   0xb   :  { %4257 = vmatprep.subr.bf16.mxu0 %v4256_v5  ;;  %v4264_v11 = vpack.c.bf16 %v220_v10, %v219_v9  ;;  %v222_v13 = vld [vmem:[%s5753_s29 + $0x18] sm:$0xff]  ;;  %v64_v15 = vld [vmem:[%s5752_s26 + $0x10] sm:$0xff]  ;;  %v353_v17 = vld [vmem:[%s5754_s28 + $0x8] sm:$0xff] }
   0xc   :  { %4259 = vmatpush3.bf16.msra.mxu0 %v4256_v5  ;;  %v4268_v16 = vpack.c.bf16 %v222_v13, %v221_v12  ;;  %v355_v18 = vld [vmem:[%s5754_s28 + $0x18] sm:$0xff]  ;;  %v66_v23 = vld [vmem:[%s5752_s26 + $0x20] sm:$0xff]  ;;  %v67_v27 = vld [vmem:[%s5752_s26 + $0x28] sm:$0xff] }
   0xd   :  { %4261 = vmatprep.subr.bf16.mxu0 %v4260_v8  ;;  %v65_v21 = vld [vmem:[%s5752_s26 + $0x18] sm:$0xff]  ;;  %v4272_v24 = vpack.c.bf16 %v355_v18, %v353_v17  ;;  %v68_v29 = vld [vmem:[%s5752_s26 + $0x30] sm:$0xff]  ;;  %v352_v31 = vld [vmem:[%s5754_s28] sm:$0xff] }
   0xe   :  { %v69_v30 = vld [vmem:[%s5752_s26 + $0x38] sm:$0xff]  ;;  %v354_v32 = vld [vmem:[%s5754_s28 + $0x10] sm:$0xff]  ;;  %v357_v33 = vld [vmem:[%s5754_s28 + $0x28] sm:$0xff] }
   0xf   :  { %v359_v34 = vld [vmem:[%s5754_s28 + $0x38] sm:$0xff]  ;;  %v4274_v35 = vpack.c.bf16 %v354_v32, %v352_v31  ;;  %v356_v37 = vld [vmem:[%s5754_s28 + $0x20] sm:$0xff]  ;;  %v358_v38 = vld [vmem:[%s5754_s28 + $0x30] sm:$0xff]  ;;  %v362_v32 = vlaneseq }
  0x10   :  { %4263 = vmatpush3.bf16.msra.mxu0 %v4260_v8  ;;  %v4276_v36 = vpack.c.bf16 %v359_v34, %v357_v33  ;;  %v4278_v41 = vpack.c.bf16 %v358_v38, %v356_v37  ;;  %v728_v61 = vld [vmem:[%s5731_s7] sm:$0xff]  ;;  %v729_v62 = vld [vmem:[%s5731_s7 + $0x8] sm:$0xff]  ;;  %v730_v0 = vld [vmem:[%s5731_s7 + $0x10] sm:$0xff] }
  0x11   :  { %4265 = vmatprep.subr.bf16.mxu0 %v4264_v11  ;;  %v5117_v63 = vpack.c.bf16 %v729_v62, %v728_v61  ;;  %v731_v1 = vld [vmem:[%s5731_s7 + $0x18] sm:$0xff]  ;;  %v5144_v5 = vld [vmem:[%s5732_s5] ss:$0 sm:$0xff]  ;;  %v363_v37 = vshrl.u32 %v362_v32, 7 }
  0x12   :  { %v5127_v2 = vpack.c.bf16 %v731_v1, %v730_v0 }
  0x13   :  { %3977 = vmatmul.mubr.msk.f32.vlgmr.msra.gmra.mrb[0].mxu0 %vm81_vm0, %v63_v14  ;;  %v368_v44 = vsub.s32 1, %v363_v37 }
  0x14   :  { %4267 = vmatpush3.bf16.msra.mxu0 %v4264_v11  ;;  %3979 = vmatprep.mubr.msk.f32.mxu0 %vm81_vm0, %v64_v15 }
  0x15   :  { %4269 = vmatprep.subr.bf16.mxu0 %v4268_v16 }
  0x17   :  { %3980 = vmatmul.mubr.msk.f32.gmra.mrb[2].mxu0 %vm81_vm0, %v65_v21 }
  0x18   :  { %3982 = vmatprep.mubr.msk.f32.mxu0 %vm81_vm0, %v66_v23  ;;  %4271 = vmatpush3.bf16.msra.mxu0 %v4268_v16 }
  0x19   :  { %4273 = vmatprep.subr.bf16.mxu0 %v4272_v24 }
  0x1b   :  { %3983 = vmatmul.mubr.msk.f32.gmra.mrb[4].mxu0 %vm81_vm0, %v67_v27 }
  0x1c   :  { %3985 = vmatprep.mubr.msk.f32.mxu0 %vm81_vm0, %v68_v29 }
  0x1f   :  { %3986 = vmatmul.mubr.msk.f32.gmra.mrb[6].mxu0 %vm81_vm0, %v69_v30 }
  0x20   :  { %3996 = vmatprep.mubr.msk.f32.mxu0 %vm81_vm0, %v62_v7 }
  0x23   :  { %3997 = vmatmul.mubr.msk.f32.vlgmr.msra.gmra.mrb[8].mxu0 %vm81_vm0, %v63_v14 }
  0x24   :  { %4275 = vmatpush1.bf16.msra.mxu0 %v4274_v35  ;;  %3999 = vmatprep.mubr.msk.f32.mxu0 %vm81_vm0, %v64_v15 }
  0x25   :  { %4277 = vmatprep.subr.bf16.mxu0 %v4276_v36 }
  0x27   :  { %4000 = vmatmul.mubr.msk.f32.gmra.mrb[10].mxu0 %vm81_vm0, %v65_v21  ;;  %v5172_v21 = vld [vmem:[%s5733_s8] ss:$0 sm:$0xff] }
  0x28   :  { %4002 = vmatprep.mubr.msk.f32.mxu0 %vm81_vm0, %v66_v23  ;;  %4279 = vmatpush1.bf16.msra.mxu0 %v4278_v41  ;;  %v364_v41 = vsub.s32 0, %v363_v37 }
  0x29   :  { %4281 = vmatprep.subr.bf16.mxu0 %v4280_v42  ;;  %v360_v42 = vld [vmem:[%s5734_s16] sm:$0x3]  ;;  %s4821_s16 = smov 64  }
  0x2a   :  { %v365_v46 = vrot.slane %v360_v42, %v364_v41 }
  0x2b   :  { %4003 = vmatmul.mubr.msk.f32.gmra.mrb[12].mxu0 %vm81_vm0, %v67_v27 }
  0x2c   :  { %4005 = vmatprep.mubr.msk.f32.mxu0 %vm81_vm0, %v68_v29 }
  0x2f   :  { %4006 = vmatmul.mubr.msk.f32.gmra.mrb[14].mxu0 %vm81_vm0, %v69_v30 }
  0x30   :  { %439 = vmatprep.mubr.f32.mxu0 %v4820_v4 }
  0x33   :  { %3750 = vmatmul.mubr.msk.f32.vlgmr.msra.gmra.mrb[16].mxu0 %vm81_vm0, %v351_v47  ;;  %v369_v47 = vrot.slane %v360_v42, %v368_v44 }
  0x34   :  { %4283 = vmatpush1.bf16.msra.mxu0 %v4282_v48  ;;  %542 = vmatprep.mubr.f32.mxu0 %v4820_v4 }
  0x35   :  { %4285 = vmatprep.subr.bf16.mxu0 %v4284_v49 }
  0x38   :  { %4287 = vmatpush1.bf16.msra.mxu0 %v4286_v52 }
  0x39   :  { %4288 = vmatprep.subr.bf16.mxu0 %v4818_v3 }
  0x3b   :  { %3751 = vmatmul.mubr.msk.f32.vlgmr.msra.gmra.mrb[18].mxu0 %vm81_vm0, %v343_v53 }
  0x3c   :  { %4290 = vmatpush3.bf16.msra.mxu0 %v4978_v22  ;;  %548 = vmatprep.mubr.f32.mxu0 %v4820_v4 }
  0x3d   :  { %4291 = vmatprep.subr.bf16.mxu0 %v4818_v3 }
  0x3f   :  { %3752 = vmatmul.mubr.msk.f32.gmra.mrb[20].mxu0 %vm81_vm0, %v344_v54 }
  0x40   :  { %554 = vmatprep.mubr.f32.mxu0 %v4820_v4  ;;  %4293 = vmatpush3.bf16.msra.mxu0 %v4996_v28 }
  0x41   :  { %4294 = vmatprep.subr.bf16.mxu0 %v4818_v3 }
  0x43   :  { %3753 = vmatmul.mubr.msk.f32.gmra.mrb[22].mxu0 %vm81_vm0, %v345_v55 }
  0x44   :  { %560 = vmatprep.mubr.f32.mxu0 %v4820_v4 }
  0x47   :  { %3754 = vmatmul.mubr.msk.f32.gmra.mrb[24].mxu0 %vm81_vm0, %v346_v56 }
  0x48   :  { %566 = vmatprep.mubr.f32.mxu0 %v4820_v4 }
  0x4b   :  { %3755 = vmatmul.mubr.msk.f32.gmra.mrb[26].mxu0 %vm81_vm0, %v347_v57 }
  0x4c   :  { %572 = vmatprep.mubr.f32.mxu0 %v4820_v4 }
  0x4f   :  { %3756 = vmatmul.mubr.msk.f32.gmra.mrb[28].mxu0 %vm81_vm0, %v348_v58 }
  0x50   :  { %578 = vmatprep.mubr.f32.mxu0 %v4820_v4 }
  0x53   :  { %3757 = vmatmul.mubr.msk.f32.gmra.mrb[30].mxu0 %vm81_vm0, %v349_v59 }
  0x54   :  { %584 = vmatprep.mubr.f32.mxu0 %v4820_v4 }
  0x57   :  { %3758 = vmatmul.mubr.msk.f32.gmra.mrb[32].mxu0 %vm81_vm0, %v350_v60 }
  0x58   :  { %4016 = vmatprep.mubr.msk.f32.mxu0 %vm4819_vm1, %v4820_v4 }
  0x5b   :  { %4017 = vmatmul.mubr.f32.vlgmr.msra.gmra.mrb[34].mxu0 %v4820_v4 }
  0x5c   :  { %4296 = vmatpush3.bf16.msra.mxu0 %v5117_v63  ;;  %4027 = vmatprep.mubr.msk.f32.mxu0 %vm4819_vm1, %v4820_v4 }
  0x5d   :  { %4297 = vmatprep.subr.bf16.mxu0 %v4818_v3 }
  0x60   :  { %4299 = vmatpush3.bf16.msra.mxu0 %v5127_v2 }
  0x61   :  { %4300 = vmatprep.subr.bf16.mxu0 %v4818_v3 }
  0x63   :  { %4028 = vmatmul.mubr.f32.vlgmr.msra.gmra.mrb[36].mxu0 %v4820_v4 }
  0x64   :  { %4302 = vmatpush3.bf16.msra.mxu0 %v4978_v22  ;;  %4038 = vmatprep.mubr.msk.f32.mxu0 %vm4819_vm1, %v4820_v4 }
  0x65   :  { %4303 = vmatprep.subr.bf16.mxu0 %v4818_v3 }
  0x68   :  { %4305 = vmatpush3.bf16.msra.mxu0 %v4996_v28 }
  0x69   :  { %4306 = vmatprep.subr.bf16.mxu0 %v4818_v3 }
  0xe6   :  { %v3978_v6 = vpop.f32.mrb[0].mxu0 }
  0xe7   :  { %v5147_v7 = vadd.f32 %v3978_v6, %v5144_v5  ;;  %v5149_v8 = vpop.f32.mrb[1].mxu0 }
  0xe8   :  { %v173_v42 = vadd.f32 %v5144_v5, %v5149_v8 }
  0xea   :  { %v3981_v9 = vpop.f32.mrb[2].mxu0 }
  0xeb   :  { %v5152_v10 = vadd.f32 %v3981_v9, %v5144_v5  ;;  %v182_v11 = vpop.f32.mrb[3].mxu0 }
  0xec   :  { %v5155_v12 = vadd.f32 %v5144_v5, %v182_v11 }
  0xee   :  { %v3984_v13 = vpop.f32.mrb[4].mxu0 }
  0xef   :  { %v5158_v14 = vadd.f32 %v3984_v13, %v5144_v5  ;;  %v192_v15 = vpop.f32.mrb[5].mxu0 }
  0xf0   :  { %v5161_v16 = vadd.f32 %v5144_v5, %v192_v15 }
  0xf2   :  { %v3987_v17 = vpop.f32.mrb[6].mxu0 }
  0xf3   :  { %v5164_v18 = vadd.f32 %v3987_v17, %v5144_v5  ;;  %v202_v19 = vpop.f32.mrb[7].mxu0 }
  0xf4   :  { %v5167_v20 = vadd.f32 %v5144_v5, %v202_v19 }
  0xf6   :  { %v3998_v23 = vpop.f32.mrb[8].mxu0 }
  0xf7   :  { %v5175_v24 = vadd.f32 %v3998_v23, %v5172_v21  ;;  %v296_v25 = vpop.f32.mrb[9].mxu0 }
  0xf8   :  { %v5178_v26 = vadd.f32 %v5172_v21, %v296_v25 }
  0xfa   :  { %v4001_v27 = vpop.f32.mrb[10].mxu0 }
  0xfb   :  { %v5181_v29 = vadd.f32 %v4001_v27, %v5172_v21  ;;  %v306_v30 = vpop.f32.mrb[11].mxu0 }
  0xfc   :  { %v5184_v31 = vadd.f32 %v5172_v21, %v306_v30 }
  0xfe   :  { %v4004_v33 = vpop.f32.mrb[12].mxu0 }
  0xff   :  { %v5187_v34 = vadd.f32 %v4004_v33, %v5172_v21  ;;  %v316_v35 = vpop.f32.mrb[13].mxu0 }
 0x100   :  { %v5190_v36 = vadd.f32 %v5172_v21, %v316_v35 }
 0x102   :  { %v4007_v38 = vpop.f32.mrb[14].mxu0 }
 0x103   :  { %v326_v39 = vpop.f32.mrb[15].mxu0 }
 0x104   :  { %v5193_v40 = vadd.f32 %v5172_v21, %v326_v39 }
 0x106   :  { %v441_v43 = vpop.f32.mrb[16].mxu0 }
 0x107   :  { %v443_v45 = vpop.f32.mrb[17].mxu0  ;;  %v442_v48 = vadd.f32 %v441_v43, %v365_v46  ;;  %v332_v46 = vadd.f32 %v4007_v38, %v5172_v21 }
 0x108   :  { %v444_v49 = vadd.f32 %v443_v45, %v369_v47 }
 0x10e   :  { %v544_v50 = vpop.f32.mrb[18].mxu0 }
 0x10f   :  { %v5198_v51 = vadd.f32 %v544_v50, %v442_v48  ;;  %v546_v52 = vpop.f32.mrb[19].mxu0 }
 0x110   :  { %v5200_v53 = vadd.f32 %v546_v52, %v444_v49 }
 0x112   :  { %v550_v54 = vpop.f32.mrb[20].mxu0 }
 0x113   :  { %v5202_v55 = vadd.f32 %v550_v54, %v442_v48  ;;  %v552_v56 = vpop.f32.mrb[21].mxu0 }
 0x114   :  { %v5204_v57 = vadd.f32 %v552_v56, %v444_v49 }
 0x116   :  { %v556_v58 = vpop.f32.mrb[22].mxu0 }
 0x117   :  { %v5206_v59 = vadd.f32 %v556_v58, %v442_v48  ;;  %v558_v60 = vpop.f32.mrb[23].mxu0 }
 0x118   :  { %v5208_v61 = vadd.f32 %v558_v60, %v444_v49 }
 0x11a   :  { %v562_v62 = vpop.f32.mrb[24].mxu0 }
 0x11b   :  { %v5210_v0 = vadd.f32 %v562_v62, %v442_v48  ;;  %v564_v1 = vpop.f32.mrb[25].mxu0 }
 0x11c   :  { %v5212_v6 = vadd.f32 %v564_v1, %v444_v49 }
 0x11e   :  { %v568_v9 = vpop.f32.mrb[26].mxu0 }
 0x11f   :  { %v5214_v11 = vadd.f32 %v568_v9, %v442_v48  ;;  %v570_v13 = vpop.f32.mrb[27].mxu0 }
 0x120   :  { %v5216_v15 = vadd.f32 %v570_v13, %v444_v49 }
 0x122   :  { %v574_v17 = vpop.f32.mrb[28].mxu0 }
 0x123   :  { %v5218_v19 = vadd.f32 %v574_v17, %v442_v48  ;;  %v576_v23 = vpop.f32.mrb[29].mxu0 }
 0x124   :  { %v5220_v25 = vadd.f32 %v576_v23, %v444_v49 }
 0x126   :  { %v580_v27 = vpop.f32.mrb[30].mxu0 }
 0x127   :  { %v5222_v30 = vadd.f32 %v580_v27, %v442_v48  ;;  %v582_v32 = vpop.f32.mrb[31].mxu0 }
 0x128   :  { %v5224_v33 = vadd.f32 %v582_v32, %v444_v49 }
 0x12a   :  { %v586_v35 = vpop.f32.mrb[32].mxu0 }
 0x12b   :  { %v5226_v37 = vadd.f32 %v586_v35, %v442_v48  ;;  %v588_v39 = vpop.f32.mrb[33].mxu0 }
 0x12c   :  { %v5228_v41 = vadd.f32 %v588_v39, %v444_v49 }
 0x12e   :  { %v697_v43 = vpop.f32.mrb[34].mxu0 }
 0x12f   :  { %v701_v44 = vadd.f32 %v697_v43, %v173_v42  ;;  %v4018_v45 = vpop.f32.mrb[35].mxu0 }
 0x131   :  { %4590 = vtanh.f32 %v701_v44  ;;  %v3759_v49 = vmul.f32 -1.442695, %v701_v44 }
 0x136   :  { %v798_v47 = vpop.f32.mrb[36].mxu0 }
 0x137   :  { %v802_v50 = vadd.f32 %v798_v47, %v332_v46  ;;  %v4029_v52 = vpop.f32.mrb[37].mxu0 }
 0x139   :  { %4592 = vtanh.f32 %v802_v50  ;;  %v3760_v5 = vmul.f32 -1.442695, %v802_v50 }
 0x13a   :  { %4594 = vpow2.f32 %v3759_v49 }
 0x13b   :  { %v4591_v54 = vpop.eup %4590  ;;  %4596 = vpow2.f32 %v3760_v5 }
 0x13c   :  { %711 = vrot.lane.b32.xlu0 %v4591_v54, %s4821_s16 }
 0x143   :  { %v4593_v48 = vpop.eup %4592 }
 0x144   :  { %812 = vrot.lane.b32.xlu0 %v4593_v48, %s4821_s16  ;;  %v4595_v8 = vpop.eup %4594 }
 0x145   :  { %v705_v56 = vadd.f32 1.0, %v4595_v8  ;;  %v4597_v58 = vpop.eup %4596 }
 0x146   :  { %v806_v21 = vadd.f32 1.0, %v4597_v58 }
 0x147   :  { %4598 = vrcp.f32 %v705_v56 }
 0x148   :  { %4600 = vrcp.f32 %v806_v21 }
 0x151   :  { %v4599_v38 = vpop.eup %4598 }
 0x152   :  { %v4601_v1 = vpop.eup %4600  ;;  %v709_v17 = vmul.f32 0.0, %v4599_v38 }
 0x153   :  { %v810_v32 = vmul.f32 0.0, %v4601_v1 }
 0x1ae   :  { %v712_v60 = vpop.permute.xlu0 %711 }
 0x1af   :  { %v714_v62 = vmul.f32 %v4599_v38, %v712_v60 }
 0x1b1   :  { %716 = vrot.lane.b32.xlu1 %v714_v62, %s4822_s25 }
 0x1b6   :  { %v813_v9 = vpop.permute.xlu0 %812 }
 0x1b7   :  { %v815_v13 = vmul.f32 %v4601_v1, %v813_v9 }
 0x1b9   :  { %817 = vrot.lane.b32.xlu1 %v815_v13, %s4822_s25 }
 0x223   :  { %v717_v23 = vpop.permute.xlu1 %716 }
 0x224   :  { %v719_v27 = vadd.f32 %v717_v23, %v709_v17 }
 0x226   :  { %4602 = vtanh.f32 %v719_v27 }
 0x22b   :  { %v818_v35 = vpop.permute.xlu1 %817 }
 0x22c   :  { %v820_v39 = vadd.f32 %v818_v35, %v810_v32 }
 0x22e   :  { %4604 = vtanh.f32 %v820_v39 }
 0x230   :  { %v4603_v42 = vpop.eup %4602 }
 0x231   :  { %722 = vrot.lane.b32.xlu0 %v4603_v42, %s4821_s16 }
 0x238   :  { %v4605_v43 = vpop.eup %4604 }
 0x239   :  { %823 = vrot.lane.b32.xlu1 %v4605_v43, %s4821_s16 }
 0x2a3   :  { %v723_v44 = vpop.permute.xlu0 %722 }
 0x2a4   :  { %v725_v45 = vmul.f32 %v4599_v38, %v723_v44 }
 0x2a6   :  { %830 = vrot.lane.b32.xlu0 %v725_v45, %s4822_s25 }
 0x2ab   :  { %v824_v46 = vpop.permute.xlu1 %823 }
 0x2ac   :  { %v826_v47 = vmul.f32 %v4601_v1, %v824_v46 }
 0x2ae   :  { %932 = vrot.lane.b32.xlu1 %v826_v47, %s4822_s25 }
 0x318   :  { %v831_v50 = vpop.permute.xlu0 %830 }
 0x319   :  { %4039 = vmatmul.mubr.msk.f32.vlgmr.msra.gmra.mrb[38].mxu0 %vm81_vm0, %v831_v50 }
 0x31a   :  { %4308 = vmatpush3.bf16.msra.mxu0 %v5117_v63  ;;  %4049 = vmatprep.mubr.msk.f32.mxu0 %vm4819_vm1, %v4820_v4 }
 0x31b   :  { %4309 = vmatprep.subr.bf16.mxu0 %v4818_v3 }
 0x31e   :  { %4311 = vmatpush3.bf16.msra.mxu0 %v5127_v2 }
 0x31f   :  { %4318 = vmatprep.subr.bf16.mxu0 %v4818_v3 }
 0x320   :  { %v933_v52 = vpop.permute.xlu1 %932 }
 0x321   :  { %4050 = vmatmul.mubr.msk.f32.vlgmr.msra.gmra.mrb[40].mxu0 %vm81_vm0, %v933_v52 }
 0x322   :  { %4320 = vmatpush3.bf16.msra.mxu0 %v5117_v63  ;;  %4071 = vmatprep.mubr.msk.f32.mxu0 %vm4819_vm1, %v4820_v4 }
 0x323   :  { %4321 = vmatprep.subr.bf16.mxu0 %v4818_v3 }
 0x326   :  { %4323 = vmatpush3.bf16.msra.mxu0 %v5127_v2 }
 0x327   :  { %4330 = vmatprep.subr.bf16.mxu0 %v4818_v3 }
 0x3ec   :  { %v900_v54 = vpop.f32.mrb[38].mxu0 }
 0x3ed   :  { %v904_v48 = vadd.f32 %v900_v54, %v5147_v7  ;;  %v4040_v49 = vpop.f32.mrb[39].mxu0 }
 0x3ef   :  { %4606 = vtanh.f32 %v904_v48  ;;  %v3762_v38 = vmul.f32 -1.442695, %v904_v48 }
 0x3f4   :  { %v1002_v5 = vpop.f32.mrb[40].mxu0 }
 0x3f5   :  { %v1006_v8 = vadd.f32 %v1002_v5, %v5193_v40  ;;  %v4051_v56 = vpop.f32.mrb[41].mxu0 }
 0x3f7   :  { %4608 = vtanh.f32 %v1006_v8  ;;  %v3764_v60 = vmul.f32 -1.442695, %v1006_v8 }
 0x3f8   :  { %4610 = vpow2.f32 %v3762_v38 }
 0x3f9   :  { %v4607_v58 = vpop.eup %4606  ;;  %4612 = vpow2.f32 %v3764_v60 }
 0x3fa   :  { %914 = vrot.lane.b32.xlu0 %v4607_v58, %s4821_s16 }
 0x401   :  { %v4609_v21 = vpop.eup %4608 }
 0x402   :  { %1016 = vrot.lane.b32.xlu1 %v4609_v21, %s4821_s16  ;;  %v4611_v62 = vpop.eup %4610 }
 0x403   :  { %v908_v1 = vadd.f32 1.0, %v4611_v62  ;;  %v4613_v7 = vpop.eup %4612 }
 0x404   :  { %v1010_v9 = vadd.f32 1.0, %v4613_v7 }
 0x405   :  { %4614 = vrcp.f32 %v908_v1 }
 0x406   :  { %4616 = vrcp.f32 %v1010_v9 }
 0x40f   :  { %v4615_v13 = vpop.eup %4614 }
 0x410   :  { %v4617_v23 = vpop.eup %4616  ;;  %v912_v42 = vmul.f32 %v4615_v13, %v719_v27 }
 0x411   :  { %v1014_v45 = vmul.f32 %v4617_v23, %v820_v39 }
 0x46c   :  { %v915_v40 = vpop.permute.xlu0 %914 }
 0x46d   :  { %v917_v17 = vmul.f32 %v4615_v13, %v915_v40 }
 0x46f   :  { %919 = vrot.lane.b32.xlu0 %v917_v17, %s4822_s25 }
 0x474   :  { %v1017_v32 = vpop.permute.xlu1 %1016 }
 0x475   :  { %v1019_v35 = vmul.f32 %v4617_v23, %v1017_v32 }
 0x477   :  { %1021 = vrot.lane.b32.xlu1 %v1019_v35, %s4822_s25 }
 0x4e1   :  { %v920_v43 = vpop.permute.xlu0 %919 }
 0x4e2   :  { %v922_v44 = vadd.f32 %v920_v43, %v912_v42 }
 0x4e4   :  { %4618 = vtanh.f32 %v922_v44 }
 0x4e9   :  { %v1022_v46 = vpop.permute.xlu1 %1021 }
 0x4ea   :  { %v1024_v47 = vadd.f32 %v1022_v46, %v1014_v45 }
 0x4ec   :  { %4620 = vtanh.f32 %v1024_v47 }
 0x4ee   :  { %v4619_v50 = vpop.eup %4618 }
 0x4ef   :  { %925 = vrot.lane.b32.xlu0 %v4619_v50, %s4821_s16 }
 0x4f6   :  { %v4621_v52 = vpop.eup %4620 }
 0x4f7   :  { %1027 = vrot.lane.b32.xlu1 %v4621_v52, %s4821_s16 }
 0x561   :  { %v926_v54 = vpop.permute.xlu0 %925 }
 0x562   :  { %v928_v48 = vmul.f32 %v4615_v13, %v926_v54 }
 0x564   :  { %1034 = vrot.lane.b32.xlu0 %v928_v48, %s4822_s25 }
 0x569   :  { %v1028_v49 = vpop.permute.xlu1 %1027 }
 0x56a   :  { %v1030_v5 = vmul.f32 %v4617_v23, %v1028_v49 }
 0x56c   :  { %1136 = vrot.lane.b32.xlu1 %v1030_v5, %s4822_s25 }
 0x5d6   :  { %v1035_v27 = vpop.permute.xlu0 %1034 }
 0x5d7   :  { %4061 = vmatmul.mubr.msk.f32.vlgmr.msra.gmra.mrb[0].mxu1 %vm81_vm0, %v1035_v27 }
 0x5d8   :  { %4326 = vmatpush3.bf16.msra.mxu1 %v4978_v22  ;;  %4082 = vmatprep.mubr.msk.f32.mxu1 %vm4819_vm1, %v4820_v4 }
 0x5d9   :  { %4327 = vmatprep.subr.bf16.mxu1 %v4818_v3 }
 0x5dc   :  { %4329 = vmatpush3.bf16.msra.mxu1 %v4996_v28 }
 0x5dd   :  { %4336 = vmatprep.subr.bf16.mxu1 %v4818_v3 }
 0x5de   :  { %v1137_v39 = vpop.permute.xlu1 %1136 }
 0x5df   :  { %4072 = vmatmul.mubr.msk.f32.vlgmr.msra.gmra.mrb[42].mxu0 %vm81_vm0, %v1137_v39 }
 0x5e0   :  { %4332 = vmatpush3.bf16.msra.mxu0 %v5117_v63  ;;  %4093 = vmatprep.mubr.msk.f32.mxu0 %vm4819_vm1, %v4820_v4 }
 0x5e1   :  { %4333 = vmatprep.subr.bf16.mxu0 %v4818_v3 }
 0x5e4   :  { %4335 = vmatpush3.bf16.msra.mxu0 %v5127_v2 }
 0x5e5   :  { %4342 = vmatprep.subr.bf16.mxu0 %v4818_v3 }
 0x6aa   :  { %v1104_v8 = vpop.f32.mrb[0].mxu1 }
 0x6ab   :  { %v1108_v56 = vadd.f32 %v1104_v8, %v5155_v12  ;;  %v4062_v58 = vpop.f32.mrb[1].mxu1 }
 0x6ad   :  { %4622 = vtanh.f32 %v1108_v56  ;;  %v3766_v7 = vmul.f32 -1.442695, %v1108_v56 }
 0x6b2   :  { %v1206_v21 = vpop.f32.mrb[42].mxu0 }
 0x6b3   :  { %v1210_v38 = vadd.f32 %v1206_v21, %v5187_v34  ;;  %v4073_v60 = vpop.f32.mrb[43].mxu0 }
 0x6b5   :  { %4624 = vtanh.f32 %v1210_v38  ;;  %v3768_v9 = vmul.f32 -1.442695, %v1210_v38 }
 0x6b6   :  { %4626 = vpow2.f32 %v3766_v7 }
 0x6b7   :  { %v4623_v62 = vpop.eup %4622  ;;  %4628 = vpow2.f32 %v3768_v9 }
 0x6b8   :  { %1118 = vrot.lane.b32.xlu0 %v4623_v62, %s4821_s16 }
 0x6bf   :  { %v4625_v1 = vpop.eup %4624 }
 0x6c0   :  { %1220 = vrot.lane.b32.xlu1 %v4625_v1, %s4821_s16  ;;  %v4627_v13 = vpop.eup %4626 }
 0x6c1   :  { %v1112_v40 = vadd.f32 1.0, %v4627_v13  ;;  %v4629_v12 = vpop.eup %4628 }
 0x6c2   :  { %v1214_v17 = vadd.f32 1.0, %v4629_v12 }
 0x6c3   :  { %4630 = vrcp.f32 %v1112_v40 }
 0x6c4   :  { %4632 = vrcp.f32 %v1214_v17 }
 0x6cd   :  { %v4631_v23 = vpop.eup %4630 }
 0x6ce   :  { %v4633_v35 = vpop.eup %4632  ;;  %v1116_v45 = vmul.f32 %v4631_v23, %v922_v44 }
 0x6cf   :  { %v1218_v52 = vmul.f32 %v4633_v35, %v1024_v47 }
 0x72a   :  { %v1119_v34 = vpop.permute.xlu0 %1118 }
 0x72b   :  { %v1121_v32 = vmul.f32 %v4631_v23, %v1119_v34 }
 0x72d   :  { %1123 = vrot.lane.b32.xlu0 %v1121_v32, %s4822_s25 }
 0x732   :  { %v1221_v42 = vpop.permute.xlu1 %1220 }
 0x733   :  { %v1223_v43 = vmul.f32 %v4633_v35, %v1221_v42 }
 0x735   :  { %1225 = vrot.lane.b32.xlu1 %v1223_v43, %s4822_s25 }
 0x79f   :  { %v1124_v46 = vpop.permute.xlu0 %1123 }
 0x7a0   :  { %v1126_v50 = vadd.f32 %v1124_v46, %v1116_v45 }
 0x7a2   :  { %4634 = vtanh.f32 %v1126_v50 }
 0x7a7   :  { %v1226_v54 = vpop.permute.xlu1 %1225 }
 0x7a8   :  { %v1228_v48 = vadd.f32 %v1226_v54, %v1218_v52 }
 0x7aa   :  { %4636 = vtanh.f32 %v1228_v48 }
 0x7ac   :  { %v4635_v49 = vpop.eup %4634 }
 0x7ad   :  { %1129 = vrot.lane.b32.xlu0 %v4635_v49, %s4821_s16 }
 0x7b4   :  { %v4637_v5 = vpop.eup %4636 }
 0x7b5   :  { %1231 = vrot.lane.b32.xlu1 %v4637_v5, %s4821_s16 }
 0x81f   :  { %v1130_v27 = vpop.permute.xlu0 %1129 }
 0x820   :  { %v1132_v39 = vmul.f32 %v4631_v23, %v1130_v27 }
 0x822   :  { %1238 = vrot.lane.b32.xlu0 %v1132_v39, %s4822_s25 }
 0x827   :  { %v1232_v8 = vpop.permute.xlu1 %1231 }
 0x828   :  { %v1234_v56 = vmul.f32 %v4633_v35, %v1232_v8 }
 0x82a   :  { %1340 = vrot.lane.b32.xlu1 %v1234_v56, %s4822_s25 }
 0x894   :  { %v1239_v44 = vpop.permute.xlu0 %1238 }
 0x895   :  { %4083 = vmatmul.mubr.msk.f32.vlgmr.msra.gmra.mrb[2].mxu1 %vm81_vm0, %v1239_v44 }
 0x896   :  { %4338 = vmatpush3.bf16.msra.mxu1 %v4978_v22  ;;  %4104 = vmatprep.mubr.msk.f32.mxu1 %vm4819_vm1, %v4820_v4 }
 0x897   :  { %4339 = vmatprep.subr.bf16.mxu1 %v4818_v3 }
 0x89a   :  { %4341 = vmatpush3.bf16.msra.mxu1 %v4996_v28 }
 0x89b   :  { %4348 = vmatprep.subr.bf16.mxu1 %v4818_v3 }
 0x89c   :  { %v1341_v47 = vpop.permute.xlu1 %1340 }
 0x89d   :  { %4094 = vmatmul.mubr.msk.f32.vlgmr.msra.gmra.mrb[44].mxu0 %vm81_vm0, %v1341_v47 }
 0x89e   :  { %4344 = vmatpush3.bf16.msra.mxu0 %v5117_v63  ;;  %4115 = vmatprep.mubr.msk.f32.mxu0 %vm4819_vm1, %v4820_v4 }
 0x89f   :  { %4345 = vmatprep.subr.bf16.mxu0 %v4818_v3 }
 0x8a2   :  { %4347 = vmatpush3.bf16.msra.mxu0 %v5127_v2 }
 0x8a3   :  { %4354 = vmatprep.subr.bf16.mxu0 %v4818_v3 }
 0x968   :  { %v1308_v58 = vpop.f32.mrb[2].mxu1 }
 0x969   :  { %v1312_v21 = vadd.f32 %v1308_v58, %v5152_v10  ;;  %v4084_v38 = vpop.f32.mrb[3].mxu1 }
 0x96b   :  { %4638 = vtanh.f32 %v1312_v21  ;;  %v3770_v13 = vmul.f32 -1.442695, %v1312_v21 }
 0x970   :  { %v1410_v60 = vpop.f32.mrb[44].mxu0 }
 0x971   :  { %v1414_v62 = vadd.f32 %v1410_v60, %v5190_v36  ;;  %v4095_v1 = vpop.f32.mrb[45].mxu0 }
 0x973   :  { %4640 = vtanh.f32 %v1414_v62  ;;  %v3772_v40 = vmul.f32 -1.442695, %v1414_v62 }
 0x974   :  { %4642 = vpow2.f32 %v3770_v13 }
 0x975   :  { %v4639_v7 = vpop.eup %4638  ;;  %4644 = vpow2.f32 %v3772_v40 }
 0x976   :  { %1322 = vrot.lane.b32.xlu0 %v4639_v7, %s4821_s16 }
 0x97d   :  { %v4641_v9 = vpop.eup %4640 }
 0x97e   :  { %1424 = vrot.lane.b32.xlu1 %v4641_v9, %s4821_s16  ;;  %v4643_v12 = vpop.eup %4642 }
 0x97f   :  { %v1316_v17 = vadd.f32 1.0, %v4643_v12  ;;  %v4645_v10 = vpop.eup %4644 }
 0x980   :  { %v1418_v23 = vadd.f32 1.0, %v4645_v10 }
 0x981   :  { %4646 = vrcp.f32 %v1316_v17 }
 0x982   :  { %4648 = vrcp.f32 %v1418_v23 }
 0x98b   :  { %v4647_v34 = vpop.eup %4646 }
 0x98c   :  { %v4649_v35 = vpop.eup %4648  ;;  %v1320_v45 = vmul.f32 %v4647_v34, %v1126_v50 }
 0x98d   :  { %v1422_v54 = vmul.f32 %v4649_v35, %v1228_v48 }
 0x9e8   :  { %v1323_v36 = vpop.permute.xlu0 %1322 }
 0x9e9   :  { %v1325_v32 = vmul.f32 %v4647_v34, %v1323_v36 }
 0x9eb   :  { %1327 = vrot.lane.b32.xlu0 %v1325_v32, %s4822_s25 }
 0x9f0   :  { %v1425_v42 = vpop.permute.xlu1 %1424 }
 0x9f1   :  { %v1427_v43 = vmul.f32 %v4649_v35, %v1425_v42 }
 0x9f3   :  { %1429 = vrot.lane.b32.xlu1 %v1427_v43, %s4822_s25 }
 0xa5d   :  { %v1328_v46 = vpop.permute.xlu0 %1327 }
 0xa5e   :  { %v1330_v52 = vadd.f32 %v1328_v46, %v1320_v45 }
 0xa60   :  { %4650 = vtanh.f32 %v1330_v52 }
 0xa65   :  { %v1430_v49 = vpop.permute.xlu1 %1429 }
 0xa66   :  { %v1432_v5 = vadd.f32 %v1430_v49, %v1422_v54 }
 0xa68   :  { %4652 = vtanh.f32 %v1432_v5 }
 0xa6a   :  { %v4651_v27 = vpop.eup %4650 }
 0xa6b   :  { %1333 = vrot.lane.b32.xlu0 %v4651_v27, %s4821_s16 }
 0xa72   :  { %v4653_v39 = vpop.eup %4652 }
 0xa73   :  { %1435 = vrot.lane.b32.xlu1 %v4653_v39, %s4821_s16 }
 0xadd   :  { %v1334_v8 = vpop.permute.xlu0 %1333 }
 0xade   :  { %v1336_v56 = vmul.f32 %v4647_v34, %v1334_v8 }
 0xae0   :  { %1442 = vrot.lane.b32.xlu0 %v1336_v56, %s4822_s25 }
 0xae5   :  { %v1436_v44 = vpop.permute.xlu1 %1435 }
 0xae6   :  { %v1438_v47 = vmul.f32 %v4649_v35, %v1436_v44 }
 0xae8   :  { %1544 = vrot.lane.b32.xlu1 %v1438_v47, %s4822_s25 }
 0xb52   :  { %v1443_v50 = vpop.permute.xlu0 %1442 }
 0xb53   :  { %4105 = vmatmul.mubr.msk.f32.vlgmr.msra.gmra.mrb[4].mxu1 %vm81_vm0, %v1443_v50 }
 0xb54   :  { %4350 = vmatpush3.bf16.msra.mxu1 %v4978_v22  ;;  %4126 = vmatprep.mubr.msk.f32.mxu1 %vm4819_vm1, %v4820_v4 }
 0xb55   :  { %4351 = vmatprep.subr.bf16.mxu1 %v4818_v3 }
 0xb58   :  { %4353 = vmatpush3.bf16.msra.mxu1 %v4996_v28 }
 0xb59   :  { %4360 = vmatprep.subr.bf16.mxu1 %v4818_v3 }
 0xb5a   :  { %v1545_v48 = vpop.permute.xlu1 %1544 }
 0xb5b   :  { %4116 = vmatmul.mubr.msk.f32.vlgmr.msra.gmra.mrb[46].mxu0 %vm81_vm0, %v1545_v48 }
 0xb5c   :  { %4356 = vmatpush3.bf16.msra.mxu0 %v5117_v63  ;;  %4137 = vmatprep.mubr.msk.f32.mxu0 %vm4819_vm1, %v4820_v4 }
 0xb5d   :  { %4357 = vmatprep.subr.bf16.mxu0 %v4818_v3 }
 0xb60   :  { %4359 = vmatpush3.bf16.msra.mxu0 %v5127_v2 }
 0xb61   :  { %4366 = vmatprep.subr.bf16.mxu0 %v4818_v3 }
 0xc26   :  { %v1512_v58 = vpop.f32.mrb[4].mxu1 }
 0xc27   :  { %v1516_v21 = vadd.f32 %v1512_v58, %v5161_v16  ;;  %v4106_v38 = vpop.f32.mrb[5].mxu1 }
 0xc29   :  { %4654 = vtanh.f32 %v1516_v21  ;;  %v3774_v13 = vmul.f32 -1.442695, %v1516_v21 }
 0xc2e   :  { %v1614_v60 = vpop.f32.mrb[46].mxu0 }
 0xc2f   :  { %v1618_v62 = vadd.f32 %v1614_v60, %v5181_v29  ;;  %v4117_v1 = vpop.f32.mrb[47].mxu0 }
 0xc31   :  { %4656 = vtanh.f32 %v1618_v62  ;;  %v3776_v40 = vmul.f32 -1.442695, %v1618_v62 }
 0xc32   :  { %4658 = vpow2.f32 %v3774_v13 }
 0xc33   :  { %v4655_v7 = vpop.eup %4654  ;;  %4660 = vpow2.f32 %v3776_v40 }
 0xc34   :  { %1526 = vrot.lane.b32.xlu0 %v4655_v7, %s4821_s16 }
 0xc3b   :  { %v4657_v9 = vpop.eup %4656 }
 0xc3c   :  { %1628 = vrot.lane.b32.xlu1 %v4657_v9, %s4821_s16  ;;  %v4659_v12 = vpop.eup %4658 }
 0xc3d   :  { %v1520_v17 = vadd.f32 1.0, %v4659_v12  ;;  %v4661_v16 = vpop.eup %4660 }
 0xc3e   :  { %v1622_v10 = vadd.f32 1.0, %v4661_v16 }
 0xc3f   :  { %4662 = vrcp.f32 %v1520_v17 }
 0xc40   :  { %4664 = vrcp.f32 %v1622_v10 }
 0xc49   :  { %v4663_v23 = vpop.eup %4662 }
 0xc4a   :  { %v4665_v36 = vpop.eup %4664  ;;  %v1524_v42 = vmul.f32 %v4663_v23, %v1330_v52 }
 0xc4b   :  { %v1626_v46 = vmul.f32 %v4665_v36, %v1432_v5 }
 0xca6   :  { %v1527_v29 = vpop.permute.xlu0 %1526 }
 0xca7   :  { %v1529_v34 = vmul.f32 %v4663_v23, %v1527_v29 }
 0xca9   :  { %1531 = vrot.lane.b32.xlu0 %v1529_v34, %s4822_s25 }
 0xcae   :  { %v1629_v32 = vpop.permute.xlu1 %1628 }
 0xcaf   :  { %v1631_v35 = vmul.f32 %v4665_v36, %v1629_v32 }
 0xcb1   :  { %1633 = vrot.lane.b32.xlu1 %v1631_v35, %s4822_s25 }
 0xd1b   :  { %v1532_v43 = vpop.permute.xlu0 %1531 }
 0xd1c   :  { %v1534_v45 = vadd.f32 %v1532_v43, %v1524_v42 }
 0xd1e   :  { %4666 = vtanh.f32 %v1534_v45 }
 0xd23   :  { %v1634_v54 = vpop.permute.xlu1 %1633 }
 0xd24   :  { %v1636_v49 = vadd.f32 %v1634_v54, %v1626_v46 }
 0xd26   :  { %4668 = vtanh.f32 %v1636_v49 }
 0xd28   :  { %v4667_v27 = vpop.eup %4666 }
 0xd29   :  { %1537 = vrot.lane.b32.xlu0 %v4667_v27, %s4821_s16 }
 0xd30   :  { %v4669_v39 = vpop.eup %4668 }
 0xd31   :  { %1639 = vrot.lane.b32.xlu1 %v4669_v39, %s4821_s16 }
 0xd9b   :  { %v1538_v8 = vpop.permute.xlu0 %1537 }
 0xd9c   :  { %v1540_v56 = vmul.f32 %v4663_v23, %v1538_v8 }
 0xd9e   :  { %1646 = vrot.lane.b32.xlu0 %v1540_v56, %s4822_s25 }
 0xda3   :  { %v1640_v44 = vpop.permute.xlu1 %1639 }
 0xda4   :  { %v1642_v47 = vmul.f32 %v4665_v36, %v1640_v44 }
 0xda6   :  { %1748 = vrot.lane.b32.xlu1 %v1642_v47, %s4822_s25 }
 0xe10   :  { %v1647_v52 = vpop.permute.xlu0 %1646 }
 0xe11   :  { %4127 = vmatmul.mubr.msk.f32.vlgmr.msra.gmra.mrb[6].mxu1 %vm81_vm0, %v1647_v52 }
 0xe12   :  { %4362 = vmatpush3.bf16.msra.mxu1 %v4978_v22  ;;  %4148 = vmatprep.mubr.msk.f32.mxu1 %vm4819_vm1, %v4820_v4 }
 0xe13   :  { %4363 = vmatprep.subr.bf16.mxu1 %v4818_v3 }
 0xe16   :  { %4365 = vmatpush3.bf16.msra.mxu1 %v4996_v28 }
 0xe17   :  { %4372 = vmatprep.subr.bf16.mxu1 %v4818_v3 }
 0xe18   :  { %v1749_v5 = vpop.permute.xlu1 %1748 }
 0xe19   :  { %4138 = vmatmul.mubr.msk.f32.vlgmr.msra.gmra.mrb[48].mxu0 %vm81_vm0, %v1749_v5 }
 0xe1a   :  { %4368 = vmatpush3.bf16.msra.mxu0 %v5117_v63  ;;  %4159 = vmatprep.mubr.msk.f32.mxu0 %vm4819_vm1, %v4820_v4 }
 0xe1b   :  { %4369 = vmatprep.subr.bf16.mxu0 %v4818_v3 }
 0xe1e   :  { %4371 = vmatpush3.bf16.msra.mxu0 %v5127_v2 }
 0xe1f   :  { %4378 = vmatprep.subr.bf16.mxu0 %v4818_v3 }
 0xee4   :  { %v1716_v50 = vpop.f32.mrb[6].mxu1 }
 0xee5   :  { %v1720_v48 = vadd.f32 %v1716_v50, %v5158_v14  ;;  %v4128_v58 = vpop.f32.mrb[7].mxu1 }
 0xee7   :  { %4670 = vtanh.f32 %v1720_v48  ;;  %v3778_v7 = vmul.f32 -1.442695, %v1720_v48 }
 0xeec   :  { %v1818_v21 = vpop.f32.mrb[48].mxu0 }
 0xeed   :  { %v1822_v38 = vadd.f32 %v1818_v21, %v5184_v31  ;;  %v4139_v60 = vpop.f32.mrb[49].mxu0 }
 0xeef   :  { %4672 = vtanh.f32 %v1822_v38  ;;  %v3780_v9 = vmul.f32 -1.442695, %v1822_v38 }
 0xef0   :  { %4674 = vpow2.f32 %v3778_v7 }
 0xef1   :  { %v4671_v62 = vpop.eup %4670  ;;  %4676 = vpow2.f32 %v3780_v9 }
 0xef2   :  { %1730 = vrot.lane.b32.xlu0 %v4671_v62, %s4821_s16 }
 0xef9   :  { %v4673_v1 = vpop.eup %4672 }
 0xefa   :  { %1832 = vrot.lane.b32.xlu1 %v4673_v1, %s4821_s16  ;;  %v4675_v13 = vpop.eup %4674 }
 0xefb   :  { %v1724_v40 = vadd.f32 1.0, %v4675_v13  ;;  %v4677_v14 = vpop.eup %4676 }
 0xefc   :  { %v1826_v12 = vadd.f32 1.0, %v4677_v14 }
 0xefd   :  { %4678 = vrcp.f32 %v1724_v40 }
 0xefe   :  { %4680 = vrcp.f32 %v1826_v12 }
 0xf07   :  { %v4679_v17 = vpop.eup %4678 }
 0xf08   :  { %v4681_v10 = vpop.eup %4680  ;;  %v1728_v34 = vmul.f32 %v4679_v17, %v1534_v45 }
 0xf09   :  { %v1830_v35 = vmul.f32 %v4681_v10, %v1636_v49 }
 0xf64   :  { %v1731_v31 = vpop.permute.xlu0 %1730 }
 0xf65   :  { %v1733_v16 = vmul.f32 %v4679_v17, %v1731_v31 }
 0xf67   :  { %1735 = vrot.lane.b32.xlu0 %v1733_v16, %s4822_s25 }
 0xf6c   :  { %v1833_v23 = vpop.permute.xlu1 %1832 }
 0xf6d   :  { %v1835_v29 = vmul.f32 %v4681_v10, %v1833_v23 }
 0xf6f   :  { %1837 = vrot.lane.b32.xlu1 %v1835_v29, %s4822_s25 }
 0xfd9   :  { %v1736_v36 = vpop.permute.xlu0 %1735 }
 0xfda   :  { %v1738_v32 = vadd.f32 %v1736_v36, %v1728_v34 }
 0xfdc   :  { %4682 = vtanh.f32 %v1738_v32 }
 0xfe1   :  { %v1838_v42 = vpop.permute.xlu1 %1837 }
 0xfe2   :  { %v1840_v43 = vadd.f32 %v1838_v42, %v1830_v35 }
 0xfe4   :  { %4684 = vtanh.f32 %v1840_v43 }
 0xfe6   :  { %v4683_v46 = vpop.eup %4682 }
 0xfe7   :  { %1741 = vrot.lane.b32.xlu0 %v4683_v46, %s4821_s16 }
 0xfee   :  { %v4685_v54 = vpop.eup %4684 }
 0xfef   :  { %1843 = vrot.lane.b32.xlu1 %v4685_v54, %s4821_s16 }
0x1059   :  { %v1742_v27 = vpop.permute.xlu0 %1741 }
0x105a   :  { %v1744_v39 = vmul.f32 %v4679_v17, %v1742_v27 }
0x105c   :  { %1850 = vrot.lane.b32.xlu0 %v1744_v39, %s4822_s25 }
0x1061   :  { %v1844_v8 = vpop.permute.xlu1 %1843 }
0x1062   :  { %v1846_v56 = vmul.f32 %v4681_v10, %v1844_v8 }
0x1064   :  { %1952 = vrot.lane.b32.xlu1 %v1846_v56, %s4822_s25 }
0x10ce   :  { %v1851_v45 = vpop.permute.xlu0 %1850 }
0x10cf   :  { %4149 = vmatmul.mubr.msk.f32.vlgmr.msra.gmra.mrb[8].mxu1 %vm81_vm0, %v1851_v45 }
0x10d0   :  { %4374 = vmatpush3.bf16.msra.mxu1 %v4978_v22  ;;  %4170 = vmatprep.mubr.msk.f32.mxu1 %vm4819_vm1, %v4820_v4 }
0x10d1   :  { %4375 = vmatprep.subr.bf16.mxu1 %v4818_v3 }
0x10d4   :  { %4377 = vmatpush3.bf16.msra.mxu1 %v4996_v28 }
0x10d5   :  { %4384 = vmatprep.subr.bf16.mxu1 %v4818_v3 }
0x10d6   :  { %v1953_v49 = vpop.permute.xlu1 %1952 }
0x10d7   :  { %4160 = vmatmul.mubr.msk.f32.vlgmr.msra.gmra.mrb[50].mxu0 %vm81_vm0, %v1953_v49 }
0x10d8   :  { %4380 = vmatpush3.bf16.msra.mxu0 %v5117_v63  ;;  %4181 = vmatprep.mubr.msk.f32.mxu0 %vm4819_vm1, %v4820_v4 }
0x10d9   :  { %4381 = vmatprep.subr.bf16.mxu0 %v4818_v3 }
0x10dc   :  { %4383 = vmatpush3.bf16.msra.mxu0 %v5127_v2 }
0x10dd   :  { %4390 = vmatprep.subr.bf16.mxu0 %v4818_v3 }
0x11a2   :  { %v1920_v22 = vpop.f32.mrb[8].mxu1 }
0x11a3   :  { %v1924_v44 = vadd.f32 %v1920_v22, %v5167_v20  ;;  %v4150_v28 = vpop.f32.mrb[9].mxu1 }
0x11a5   :  { %4686 = vtanh.f32 %v1924_v44  ;;  %v3782_v48 = vmul.f32 -1.442695, %v1924_v44 }
0x11aa   :  { %v2022_v47 = vpop.f32.mrb[50].mxu0 }
0x11ab   :  { %v2026_v52 = vadd.f32 %v2022_v47, %v5175_v24  ;;  %v4161_v5 = vpop.f32.mrb[51].mxu0 }
0x11ad   :  { %4688 = vtanh.f32 %v2026_v52  ;;  %v3784_v2 = vmul.f32 -1.442695, %v2026_v52 }
0x11ae   :  { %4690 = vpow2.f32 %v3782_v48 }
0x11af   :  { %v4687_v63 = vpop.eup %4686  ;;  %4692 = vpow2.f32 %v3784_v2 }
0x11b0   :  { %1934 = vrot.lane.b32.xlu0 %v4687_v63, %s4821_s16 }
0x11b7   :  { %v4689_v50 = vpop.eup %4688 }
0x11b8   :  { %2036 = vrot.lane.b32.xlu1 %v4689_v50, %s4821_s16  ;;  %v4691_v58 = vpop.eup %4690 }
0x11b9   :  { %v1928_v21 = vadd.f32 1.0, %v4691_v58  ;;  %v4693_v20 = vpop.eup %4692 }
0x11ba   :  { %v2030_v38 = vadd.f32 1.0, %v4693_v20 }
0x11bb   :  { %4694 = vrcp.f32 %v1928_v21 }
0x11bc   :  { %4696 = vrcp.f32 %v2030_v38 }
0x11c5   :  { %v4695_v60 = vpop.eup %4694 }
0x11c6   :  { %v4697_v1 = vpop.eup %4696  ;;  %v1932_v13 = vmul.f32 %v4695_v60, %v1738_v32 }
0x11c7   :  { %v2034_v12 = vmul.f32 %v4697_v1, %v1840_v43 }
0x1222   :  { %v1935_v24 = vpop.permute.xlu0 %1934 }
0x1223   :  { %v1937_v62 = vmul.f32 %v4695_v60, %v1935_v24  ;;  %v2254_v24 = vld [vmem:[%s5735_s9] sm:$0xff] }
0x1225   :  { %1939 = vrot.lane.b32.xlu0 %v1937_v62, %s4822_s25  ;;  %v2255_v62 = vld [vmem:[%s5735_s9 + $0x8] sm:$0xff] }
0x122a   :  { %v2037_v7 = vpop.permute.xlu1 %2036 }
0x122b   :  { %v2039_v9 = vmul.f32 %v4697_v1, %v2037_v7  ;;  %v4391_v7 = vpack.c.bf16 %v2255_v62, %v2254_v24  ;;  %v2598_v62 = vld [vmem:[%s5737_s15 + $0x40] sm:$0xff] }
0x122d   :  { %2041 = vrot.lane.b32.xlu1 %v2039_v9, %s4822_s25  ;;  %v2257_v9 = vld [vmem:[%s5735_s9 + $0x18] sm:$0xff] }
0x1297   :  { %v1940_v40 = vpop.permute.xlu0 %1939 }
0x1298   :  { %v1942_v14 = vadd.f32 %v1940_v40, %v1932_v13  ;;  %v2258_v13 = vld [vmem:[%s5735_s9 + $0x20] sm:$0xff]  ;;  %v2259_v40 = vld [vmem:[%s5735_s9 + $0x28] sm:$0xff] }
0x129a   :  { %4698 = vtanh.f32 %v1942_v14 }
0x129f   :  { %v2042_v17 = vpop.permute.xlu1 %2041 }
0x12a0   :  { %v2044_v31 = vadd.f32 %v2042_v17, %v2034_v12 }
0x12a2   :  { %4700 = vtanh.f32 %v2044_v31 }
0x12a4   :  { %v4699_v16 = vpop.eup %4698 }
0x12a5   :  { %1945 = vrot.lane.b32.xlu0 %v4699_v16, %s4821_s16  ;;  %v2261_v16 = vld [vmem:[%s5735_s9 + $0x38] sm:$0xff] }
0x12ac   :  { %v4701_v10 = vpop.eup %4700 }
0x12ad   :  { %2047 = vrot.lane.b32.xlu1 %v4701_v10, %s4821_s16 }
0x1317   :  { %v1946_v23 = vpop.permute.xlu0 %1945 }
0x1318   :  { %v1948_v29 = vmul.f32 %v4695_v60, %v1946_v23 }
0x131a   :  { %2054 = vrot.lane.b32.xlu0 %v1948_v29, %s4822_s25 }
0x131f   :  { %v2048_v34 = vpop.permute.xlu1 %2047 }
0x1320   :  { %v2050_v36 = vmul.f32 %v4697_v1, %v2048_v34  ;;  %v2256_v1 = vld [vmem:[%s5735_s9 + $0x10] sm:$0xff] }
0x1321   :  { %v4394_v12 = vpack.c.bf16 %v2257_v9, %v2256_v1  ;;  %v2600_v1 = vld [vmem:[%s5737_s15 + $0x50] sm:$0xff]  ;;  %v2603_v9 = vld [vmem:[%s5737_s15 + $0x68] sm:$0xff] }
0x1322   :  { %2155 = vrot.lane.b32.xlu1 %v2050_v36, %s4822_s25 }
0x138c   :  { %v2055_v32 = vpop.permute.xlu0 %2054 }
0x138d   :  { %4171 = vmatmul.mubr.msk.f32.vlgmr.msra.gmra.mrb[10].mxu1 %vm81_vm0, %v2055_v32  ;;  %v2262_v32 = vld [vmem:[%s5736_s11] sm:$0xff] }
0x138e   :  { %4192 = vmatprep.mubr.msk.f32.mxu1 %vm4819_vm1, %v4820_v4 }
0x1394   :  { %v2156_v35 = vpop.permute.xlu1 %2155 }
0x1395   :  { %4182 = vmatmul.mubr.msk.f32.vlgmr.msra.gmra.mrb[52].mxu0 %vm81_vm0, %v2156_v35  ;;  %v2263_v35 = vld [vmem:[%s5736_s11 + $0x8] sm:$0xff] }
0x1396   :  { %4203 = vmatprep.mubr.msk.f32.mxu0 %vm4819_vm1, %v4820_v4  ;;  %4392 = vmatpush3.bf16.msra.mxu0 %v4391_v7  ;;  %v5514_v7 = vpack.c.bf16 %v2600_v1, %v2598_v62 }
0x1397   :  { %4393 = vmatprep.subr.bf16.mxu0 %v4818_v3 }
0x139a   :  { %4395 = vmatpush3.bf16.msra.mxu0 %v4394_v12  ;;  %v2604_v12 = vld [vmem:[%s5737_s15 + $0x70] sm:$0xff] }
0x139b   :  { %4402 = vmatprep.subr.bf16.mxu0 %v4818_v3 }
0x1460   :  { %v2124_v42 = vpop.f32.mrb[10].mxu1 }
0x1461   :  { %v2128_v43 = vadd.f32 %v2124_v42, %v5164_v18  ;;  %v4172_v46 = vpop.f32.mrb[11].mxu1  ;;  %v4403_v42 = vpack.c.bf16 %v2263_v35, %v2262_v32 }
0x1462   :  { %v2265_v46 = vld [vmem:[%s5736_s11 + $0x18] sm:$0xff] }
0x1463   :  { %4702 = vtanh.f32 %v2128_v43  ;;  %v3786_v45 = vmul.f32 -1.442695, %v2128_v43  ;;  %v2264_v43 = vld [vmem:[%s5736_s11 + $0x10] sm:$0xff] }
0x1468   :  { %v2225_v54 = vpop.f32.mrb[52].mxu0 }
0x1469   :  { %v2229_v27 = vadd.f32 %v2225_v54, %v5178_v26  ;;  %v4183_v39 = vpop.f32.mrb[53].mxu0 }
0x146a   :  { %v2266_v39 = vld [vmem:[%s5736_s11 + $0x20] sm:$0xff] }
0x146b   :  { %4704 = vtanh.f32 %v2229_v27  ;;  %v3788_v49 = vmul.f32 -1.442695, %v2229_v27  ;;  %v4406_v27 = vpack.c.bf16 %v2265_v46, %v2264_v43  ;;  %v3794_v43 = vld [vmem:[%s5739_s12] ss:$0 sm:$0xff] }
0x146c   :  { %4706 = vpow2.f32 %v3786_v45  ;;  %v2268_v45 = vld [vmem:[%s5736_s11 + $0x30] sm:$0xff] }
0x146d   :  { %v4703_v8 = vpop.eup %4702  ;;  %4708 = vpow2.f32 %v3788_v49  ;;  %v2269_v49 = vld [vmem:[%s5736_s11 + $0x38] sm:$0xff] }
0x146e   :  { %2138 = vrot.lane.b32.xlu0 %v4703_v8, %s4821_s16  ;;  %v2267_v8 = vld [vmem:[%s5736_s11 + $0x28] sm:$0xff] }
0x1475   :  { %v4705_v56 = vpop.eup %4704 }
0x1476   :  { %2239 = vrot.lane.b32.xlu1 %v4705_v56, %s4821_s16  ;;  %v4707_v22 = vpop.eup %4706  ;;  %v4397_v56 = vpack.c.bf16 %v2267_v8, %v2266_v39 }
0x1477   :  { %v2132_v44 = vadd.f32 1.0, %v4707_v22  ;;  %v4709_v18 = vpop.eup %4708 }
0x1478   :  { %v2233_v28 = vadd.f32 1.0, %v4709_v18  ;;  %v4400_v18 = vpack.c.bf16 %v2269_v49, %v2268_v45 }
0x1479   :  { %4710 = vrcp.f32 %v2132_v44 }
0x147a   :  { %4712 = vrcp.f32 %v2233_v28 }
0x1483   :  { %v4711_v47 = vpop.eup %4710 }
0x1484   :  { %v4713_v5 = vpop.eup %4712  ;;  %v2136_v48 = vmul.f32 %v4711_v47, %v1942_v14  ;;  %v4385_v14 = vpack.c.bf16 %v2259_v40, %v2258_v13  ;;  %v2605_v13 = vld [vmem:[%s5737_s15 + $0x78] sm:$0xff] }
0x1485   :  { %v2237_v21 = vmul.f32 %v4713_v5, %v2044_v31  ;;  %v2260_v31 = vld [vmem:[%s5735_s9 + $0x30] sm:$0xff]  ;;  %v5524_v40 = vpack.c.bf16 %v2605_v13, %v2603_v9 }
0x1486   :  { %4386 = vmatpush3.bf16.msra.mxu1 %v4385_v14  ;;  %v4388_v10 = vpack.c.bf16 %v2261_v16, %v2260_v31  ;;  %v2602_v14 = vld [vmem:[%s5737_s15 + $0x60] sm:$0xff] }
0x1487   :  { %4387 = vmatprep.subr.bf16.mxu1 %v4818_v3 }
0x148a   :  { %4389 = vmatpush3.bf16.msra.mxu1 %v4388_v10 }
0x148b   :  { %4396 = vmatprep.subr.bf16.mxu1 %v4818_v3 }
0x14e0   :  { %v2139_v26 = vpop.permute.xlu0 %2138 }
0x14e1   :  { %v2141_v52 = vmul.f32 %v4711_v47, %v2139_v26  ;;  %v2593_v26 = vld [vmem:[%s5737_s15 + $0x18] sm:$0xff] }
0x14e3   :  { %2143 = vrot.lane.b32.xlu0 %v2141_v52, %s4822_s25 }
0x14e8   :  { %v2240_v63 = vpop.permute.xlu1 %2239 }
0x14e9   :  { %v2242_v50 = vmul.f32 %v4713_v5, %v2240_v63 }
0x14eb   :  { %2244 = vrot.lane.b32.xlu1 %v2242_v50, %s4822_s25  ;;  %v2595_v50 = vld [vmem:[%s5737_s15 + $0x28] sm:$0xff] }
0x1555   :  { %v2144_v2 = vpop.permute.xlu0 %2143 }
0x1556   :  { %v2146_v58 = vadd.f32 %v2144_v2, %v2136_v48  ;;  %v2597_v48 = vld [vmem:[%s5737_s15 + $0x38] sm:$0xff] }
0x1557   :  { %v5488_v2 = vpack.c.bf16 %v2597_v48, %v2595_v50 }
0x1558   :  { %4714 = vtanh.f32 %v2146_v58 }
0x155d   :  { %v2245_v20 = vpop.permute.xlu1 %2244 }
0x155e   :  { %v2247_v38 = vadd.f32 %v2245_v20, %v2237_v21  ;;  %v2596_v21 = vld [vmem:[%s5737_s15 + $0x30] sm:$0xff] }
0x1560   :  { %4716 = vtanh.f32 %v2247_v38 }
0x1562   :  { %v4715_v60 = vpop.eup %4714 }
0x1563   :  { %2149 = vrot.lane.b32.xlu0 %v4715_v60, %s4821_s16  ;;  %v2601_v60 = vld [vmem:[%s5737_s15 + $0x58] sm:$0xff] }
0x156a   :  { %v4717_v17 = vpop.eup %4716 }
0x156b   :  { %2250 = vrot.lane.b32.xlu1 %v4717_v17, %s4821_s16  ;;  %v5532_v17 = vpack.c.bf16 %v2604_v12, %v2602_v14 }
0x15d5   :  { %v2150_v23 = vpop.permute.xlu0 %2149 }
0x15d6   :  { %v2152_v29 = vmul.f32 %v4711_v47, %v2150_v23  ;;  %v2591_v47 = vld [vmem:[%s5737_s15 + $0x8] sm:$0xff]  ;;  %v3791_v23 = vld [vmem:[%s5738_s10] ss:$0 sm:$0xff] }
0x15d7   :  { %v5470_v52 = vpack.c.bf16 %v2593_v26, %v2591_v47 }
0x15d8   :  { %2346 = vrot.lane.b32.xlu1 %v2152_v29, %s4822_s25 }
0x15dc   :  { %2505 = vrot.lane.b32.xlu1 %v2146_v58, %s4823_s6  ;;  %v2594_v58 = vld [vmem:[%s5737_s15 + $0x20] sm:$0xff] }
0x15dd   :  { %v2251_v34 = vpop.permute.xlu1 %2250  ;;  %v5496_v20 = vpack.c.bf16 %v2596_v21, %v2594_v58 }
0x15de   :  { %v2253_v36 = vmul.f32 %v4713_v5, %v2251_v34  ;;  %v2592_v5 = vld [vmem:[%s5737_s15 + $0x10] sm:$0xff] }
0x15e0   :  { %2271 = vrot.lane.b32.xlu0 %v2253_v36, %s4822_s25 }
0x15e4   :  { %2430 = vrot.lane.b32.xlu0 %v2247_v38, %s4823_s6  ;;  %v2599_v38 = vld [vmem:[%s5737_s15 + $0x48] sm:$0xff] }
0x15e5   :  { %v5506_v24 = vpack.c.bf16 %v2601_v60, %v2599_v38 }
0x164a   :  { %v2347_v54 = vpop.permute.xlu1 %2346 }
0x164b   :  { %4204 = vmatmul.mubr.msk.f32.vlgmr.msra.gmra.mrb[54].mxu0 %vm81_vm0, %v2347_v54 }
0x164c   :  { %4404 = vmatpush3.bf16.msra.mxu0 %v4403_v42  ;;  %4225 = vmatprep.mubr.msk.f32.mxu0 %vm4819_vm1, %v4820_v4 }
0x164d   :  { %4405 = vmatprep.subr.bf16.mxu0 %v4818_v3 }
0x164e   :  { %v2506_v22 = vpop.permute.xlu1 %2505 }
0x1650   :  { %4407 = vmatpush3.bf16.msra.mxu0 %v4406_v27 }
0x1652   :  { %v2272_v44 = vpop.permute.xlu0 %2271 }
0x1653   :  { %4193 = vmatmul.mubr.msk.f32.vlgmr.msra.gmra.mrb[12].mxu1 %vm81_vm0, %v2272_v44  ;;  %4226 = vmatmul.mubr.msk.f32.vlgmr.msra.gmra.mrb[56].mxu0 %vm81_vm0, %v2506_v22 }
0x1654   :  { %4398 = vmatpush3.bf16.msra.mxu1 %v4397_v56  ;;  %4214 = vmatprep.mubr.msk.f32.mxu1 %vm4819_vm1, %v4820_v4 }
0x1655   :  { %4399 = vmatprep.subr.bf16.mxu1 %v4818_v3  ;;  %v2590_v3 = vld [vmem:[%s5737_s15] sm:$0xff] }
0x1656   :  { %v2431_v28 = vpop.permute.xlu0 %2430  ;;  %v5478_v63 = vpack.c.bf16 %v2592_v5, %v2590_v3 }
0x1658   :  { %4401 = vmatpush3.bf16.msra.mxu1 %v4400_v18 }
0x1659   :  { %4409 = vmatprep.subr.bf16.mxu1 %v5470_v52 }
0x165b   :  { %4215 = vmatmul.mubr.msk.f32.vlgmr.msra.gmra.mrb[14].mxu1 %vm81_vm0, %v2431_v28 }
0x165c   :  { %2674 = vmatprep.mubr.f32.mxu1 %v4820_v4  ;;  %4411 = vmatpush1.bf16.msra.mxu1 %v5478_v63 }
0x165d   :  { %4413 = vmatprep.subr.bf16.mxu1 %v5488_v2 }
0x1660   :  { %4415 = vmatpush1.bf16.msra.mxu1 %v5496_v20 }
0x1661   :  { %4417 = vmatprep.subr.bf16.mxu1 %v5506_v24 }
0x1664   :  { %4419 = vmatpush1.bf16.msra.mxu1 %v5514_v7 }
0x1665   :  { %4421 = vmatprep.subr.bf16.mxu1 %v5524_v40 }
0x1668   :  { %4423 = vmatpush1.bf16.msra.mxu1 %v5532_v17 }
0x1669   :  { %4425 = vmatprep.subr.bf16.mxu1 %v5470_v52 }
0x171e   :  { %v2416_v31 = vpop.f32.mrb[54].mxu0 }
0x171f   :  { %v4205_v16 = vpop.f32.mrb[55].mxu0 }
0x1726   :  { %v2341_v10 = vpop.f32.mrb[12].mxu1  ;;  %v2575_v29 = vpop.f32.mrb[56].mxu0 }
0x1727   :  { %v2417_v34 = vadd.f32 %v2416_v31, %v2341_v10  ;;  %v4194_v36 = vpop.f32.mrb[13].mxu1  ;;  %v4227_v32 = vpop.f32.mrb[57].mxu0 }
0x1728   :  { %v3576_v32 = vld [vmem:[%s5740_s17] sm:$0xff] }
0x1729   :  { %v2427_v35 = vadd.f32 %v3791_v23, %v2417_v34 }
0x172b   :  { %4718 = vtanh.f32 %v2427_v35 }
0x172e   :  { %v2500_v42 = vpop.f32.mrb[14].mxu1 }
0x172f   :  { %v2576_v46 = vadd.f32 %v2575_v29, %v2500_v42  ;;  %v4216_v54 = vpop.f32.mrb[15].mxu1  ;;  %v3579_v42 = vld [vmem:[%s5740_s17 + $0x18] sm:$0xff] }
0x1731   :  { %v2586_v27 = vadd.f32 %v3794_v43, %v2576_v46 }
0x1733   :  { %4720 = vtanh.f32 %v2586_v27 }
0x1735   :  { %v4719_v39 = vpop.eup %4718 }
0x1736   :  { %3795 = vmatmul.mubr.msk.f32.vlgmr.msra.gmra.mrb[16].mxu1 %vm2606_vm2, %v4719_v39 }
0x1737   :  { %4427 = vmatpush1.bf16.msra.mxu1 %v5478_v63  ;;  %2799 = vmatprep.mubr.f32.mxu1 %v4820_v4 }
0x1738   :  { %4429 = vmatprep.subr.bf16.mxu1 %v5488_v2 }
0x173b   :  { %4431 = vmatpush1.bf16.msra.mxu1 %v5496_v20 }
0x173c   :  { %4433 = vmatprep.subr.bf16.mxu1 %v5506_v24 }
0x173d   :  { %v4721_v8 = vpop.eup %4720 }
0x173e   :  { %2697 = vrot.lane.b32.xlu0 %v4721_v8, %s4821_s16 }
0x173f   :  { %4435 = vmatpush1.bf16.msra.mxu1 %v5514_v7 }
0x1740   :  { %4437 = vmatprep.subr.bf16.mxu1 %v5524_v40 }
0x1743   :  { %4439 = vmatpush1.bf16.msra.mxu1 %v5532_v17 }
0x1744   :  { %4441 = vmatprep.subr.bf16.mxu1 %v5470_v52 }
0x17b0   :  { %v2698_v48 = vpop.permute.xlu0 %2697 }
0x1809   :  { %v2676_v56 = vpop.f32.mrb[16].mxu1 }
0x180a   :  { %v2681_v45 = vadd.f32 %v2676_v56, %v5198_v51  ;;  %v2678_v49 = vpop.f32.mrb[17].mxu1 }
0x180b   :  { %v2682_v22 = vadd.f32 %v2678_v49, %v5200_v53  ;;  %v3581_v49 = vld [vmem:[%s5740_s17 + $0x28] sm:$0xff] }
0x180c   :  { %v3796_v44 = vmul.f32 -1.442695, %v2681_v45  ;;  %v3580_v45 = vld [vmem:[%s5740_s17 + $0x20] sm:$0xff] }
0x180d   :  { %v3797_v5 = vmul.f32 -1.442695, %v2682_v22 }
0x180e   :  { %4722 = vpow2.f32 %v3796_v44  ;;  %v3582_v44 = vld [vmem:[%s5740_s17 + $0x30] sm:$0xff] }
0x180f   :  { %4724 = vtanh.f32 %v2682_v22  ;;  %v4544_v22 = vpack.c.bf16 %v3581_v49, %v3580_v45 }
0x1818   :  { %v4723_v18 = vpop.eup %4722 }
0x1819   :  { %v2686_v28 = vadd.f32 1.0, %v4723_v18  ;;  %v4725_v47 = vpop.eup %4724  ;;  %v3583_v18 = vld [vmem:[%s5740_s17 + $0x38] sm:$0xff] }
0x181b   :  { %4726 = vrcp.f32 %v2686_v28  ;;  %v4548_v28 = vpack.c.bf16 %v3583_v18, %v3582_v44 }
0x181c   :  { %4728 = vpow2.f32 %v3797_v5 }
0x1825   :  { %v4727_v26 = vpop.eup %4726 }
0x1826   :  { %v2701_v3 = vmul.f32 %v4727_v26, %v4725_v47  ;;  %v4729_v50 = vpop.eup %4728  ;;  %v2700_v51 = vmul.f32 %v4727_v26, %v2698_v48 }
0x1827   :  { %v2693_v58 = vadd.f32 1.0, %v4729_v50 }
0x1828   :  { %2703 = vrot.lane.b32.xlu1 %v2701_v3, %s4821_s16 }
0x1829   :  { %4730 = vrcp.f32 %v2693_v58 }
0x1833   :  { %v4731_v53 = vpop.eup %4730 }
0x189a   :  { %v2704_v21 = vpop.permute.xlu1 %2703 }
0x189b   :  { %v2706_v38 = vadd.f32 %v2704_v21, %v2700_v51 }
0x189d   :  { %4732 = vtanh.f32 %v2706_v38 }
0x18a7   :  { %v4733_v60 = vpop.eup %4732 }
0x18a8   :  { %v2708_v62 = vmul.f32 %v4733_v60, %v4731_v53  ;;  %v5615_v53 = vld [vmem:[%s5741_s18] ss:$0 sm:$0xff] }
0x18aa   :  { %2710 = vrot.lane.b32.xlu0 %v2708_v62, %s4821_s16 }
0x191c   :  { %v2711_v1 = vpop.permute.xlu0 %2710 }
0x191d   :  { %2713 = vst.msk [vmem:[#allocation5] sm:$0xff] %vm2606_vm2, %v2711_v1  ;;  %3798 = vmatmul.mubr.msk.f32.vlgmr.msra.gmra.mrb[18].mxu1 %vm2606_vm2, %v2711_v1 }
0x191e   :  { %4443 = vmatpush1.bf16.msra.mxu1 %v5478_v63  ;;  %2921 = vmatprep.mubr.f32.mxu1 %v4820_v4 }
0x191f   :  { %4445 = vmatprep.subr.bf16.mxu1 %v5488_v2 }
0x1922   :  { %4447 = vmatpush1.bf16.msra.mxu1 %v5496_v20 }
0x1923   :  { %4449 = vmatprep.subr.bf16.mxu1 %v5506_v24 }
0x1924   :  { %v3568_v9 = vld [vmem:[#allocation5] sm:$0xff] }
0x1925   :  { %4244 = vmatprep.mubr.msk.f32.mxu0 %vm2606_vm2, %v3568_v9 }
0x1926   :  { %4451 = vmatpush1.bf16.msra.mxu1 %v5514_v7 }
0x1927   :  { %4453 = vmatprep.subr.bf16.mxu1 %v5524_v40 }
0x192a   :  { %4455 = vmatpush1.bf16.msra.mxu1 %v5532_v17 }
0x192b   :  { %4457 = vmatprep.subr.bf16.mxu1 %v5470_v52 }
0x19f0   :  { %v2801_v13 = vpop.f32.mrb[18].mxu1 }
0x19f1   :  { %v2806_v14 = vadd.f32 %v2801_v13, %v5202_v55  ;;  %v2803_v12 = vpop.f32.mrb[19].mxu1  ;;  %v3577_v55 = vld [vmem:[%s5740_s17 + $0x8] sm:$0xff] }
0x19f2   :  { %v2807_v31 = vadd.f32 %v2803_v12, %v5204_v57  ;;  %v3578_v57 = vld [vmem:[%s5740_s17 + $0x10] sm:$0xff]  ;;  %v4536_v35 = vpack.c.bf16 %v3577_v55, %v3576_v32 }
0x19f3   :  { %v3799_v16 = vmul.f32 -1.442695, %v2806_v14  ;;  %v4540_v43 = vpack.c.bf16 %v3579_v42, %v3578_v57 }
0x19f4   :  { %4537 = vmatprep.subr.bf16.mxu0 %v4536_v35  ;;  %v3800_v46 = vmul.f32 -1.442695, %v2807_v31 }
0x19f5   :  { %4734 = vpow2.f32 %v3799_v16  ;;  %4539 = vmatpush3.bf16.msra.mxu0 %v4536_v35 }
0x19f6   :  { %4736 = vtanh.f32 %v2807_v31  ;;  %4541 = vmatprep.subr.bf16.mxu0 %v4540_v43 }
0x19f9   :  { %4543 = vmatpush3.bf16.msra.mxu0 %v4540_v43 }
0x19fa   :  { %4545 = vmatprep.subr.bf16.mxu0 %v4544_v22 }
0x19fd   :  { %4547 = vmatpush3.bf16.msra.mxu0 %v4544_v22 }
0x19fe   :  { %4549 = vmatprep.subr.bf16.mxu0 %v4548_v28 }
0x19ff   :  { %v4735_v10 = vpop.eup %4734 }
0x1a00   :  { %v2811_v23 = vadd.f32 1.0, %v4735_v10  ;;  %v4737_v29 = vpop.eup %4736 }
0x1a01   :  { %4551 = vmatpush3.bf16.msra.mxu0 %v4548_v28 }
0x1a02   :  { %4738 = vrcp.f32 %v2811_v23 }
0x1a03   :  { %4740 = vpow2.f32 %v3800_v46 }
0x1a0c   :  { %v4739_v34 = vpop.eup %4738 }
0x1a0d   :  { %v2822_v36 = vmul.f32 %v4739_v34, %v4737_v29  ;;  %v4741_v54 = vpop.eup %4740  ;;  %v2821_v39 = vmul.f32 %v4739_v34, %v2706_v38 }
0x1a0e   :  { %v2818_v27 = vadd.f32 1.0, %v4741_v54 }
0x1a0f   :  { %2824 = vrot.lane.b32.xlu1 %v2822_v36, %s4821_s16 }
0x1a10   :  { %4742 = vrcp.f32 %v2818_v27 }
0x1a1a   :  { %v4743_v47 = vpop.eup %4742 }
0x1a81   :  { %v2825_v8 = vpop.permute.xlu1 %2824 }
0x1a82   :  { %v2827_v56 = vadd.f32 %v2825_v8, %v2821_v39 }
0x1a84   :  { %4744 = vtanh.f32 %v2827_v56 }
0x1a8e   :  { %v4745_v26 = vpop.eup %4744 }
0x1a8f   :  { %v2829_v3 = vmul.f32 %v4745_v26, %v4743_v47 }
0x1a91   :  { %2831 = vrot.lane.b32.xlu0 %v2829_v3, %s4821_s16 }
0x1b03   :  { %v2832_v5 = vpop.permute.xlu0 %2831 }
0x1b04   :  { %2835 = vst.msk [vmem:[#allocation5 + $0x8] sm:$0xff] %vm2606_vm2, %v2832_v5  ;;  %3801 = vmatmul.mubr.msk.f32.vlgmr.msra.gmra.mrb[20].mxu1 %vm2606_vm2, %v2832_v5 }
0x1b05   :  { %4459 = vmatpush1.bf16.msra.mxu1 %v5478_v63  ;;  %3043 = vmatprep.mubr.f32.mxu1 %v4820_v4 }
0x1b06   :  { %4461 = vmatprep.subr.bf16.mxu1 %v5488_v2 }
0x1b09   :  { %4463 = vmatpush1.bf16.msra.mxu1 %v5496_v20 }
0x1b0a   :  { %4465 = vmatprep.subr.bf16.mxu1 %v5506_v24 }
0x1b0b   :  { %v3569_v50 = vld [vmem:[#allocation5 + $0x8] sm:$0xff] }
0x1b0c   :  { %4245 = vmatmul.mubr.msk.f32.vlgmr.msra.gmra.mrb[58].mxu0 %vm2606_vm2, %v3569_v50 }
0x1b0d   :  { %4467 = vmatpush1.bf16.msra.mxu1 %v5514_v7 }
0x1b0e   :  { %4469 = vmatprep.subr.bf16.mxu1 %v5524_v40 }
0x1b11   :  { %4471 = vmatpush1.bf16.msra.mxu1 %v5532_v17 }
0x1b12   :  { %4473 = vmatprep.subr.bf16.mxu1 %v5470_v52 }
0x1bd7   :  { %v2923_v48 = vpop.f32.mrb[20].mxu1 }
0x1bd8   :  { %v2928_v58 = vadd.f32 %v2923_v48, %v5206_v59  ;;  %v2925_v51 = vpop.f32.mrb[21].mxu1 }
0x1bd9   :  { %v2929_v21 = vadd.f32 %v2925_v51, %v5208_v61 }
0x1bda   :  { %v3802_v38 = vmul.f32 -1.442695, %v2928_v58 }
0x1bdb   :  { %v3803_v31 = vmul.f32 -1.442695, %v2929_v21 }
0x1bdc   :  { %4746 = vpow2.f32 %v3802_v38 }
0x1bdd   :  { %4748 = vtanh.f32 %v2929_v21 }
0x1bdf   :  { %v4246_v60 = vpop.f32.mrb[58].mxu0 }
0x1be0   :  { %v3687_v62 = vadd.f32 %v4246_v60, %v5615_v53  ;;  %v3681_v1 = vpop.f32.mrb[59].mxu0 }
0x1be1   :  { %v3682_v9 = vadd.f32 %v5615_v53, %v3681_v1 }
0x1be2   :  { %3721 = vst [vmem:[%s5742_s19 + $0x8] sm:$0xff] %v3687_v62 }
0x1be3   :  { %3720 = vst [vmem:[%s5742_s19] sm:$0xff] %v3682_v9 }
0x1be6   :  { %v4747_v59 = vpop.eup %4746 }
0x1be7   :  { %v2933_v61 = vadd.f32 1.0, %v4747_v59  ;;  %v4749_v13 = vpop.eup %4748 }
0x1be9   :  { %4750 = vrcp.f32 %v2933_v61 }
0x1bea   :  { %4752 = vpow2.f32 %v3803_v31 }
0x1bf3   :  { %v4751_v14 = vpop.eup %4750 }
0x1bf4   :  { %v2944_v12 = vmul.f32 %v4751_v14, %v4749_v13  ;;  %v4753_v16 = vpop.eup %4752  ;;  %v2943_v23 = vmul.f32 %v4751_v14, %v2827_v56 }
0x1bf5   :  { %v2940_v10 = vadd.f32 1.0, %v4753_v16 }
0x1bf6   :  { %2946 = vrot.lane.b32.xlu1 %v2944_v12, %s4821_s16 }
0x1bf7   :  { %4754 = vrcp.f32 %v2940_v10 }
0x1c01   :  { %v4755_v36 = vpop.eup %4754 }
0x1c68   :  { %v2947_v29 = vpop.permute.xlu1 %2946 }
0x1c69   :  { %v2949_v34 = vadd.f32 %v2947_v29, %v2943_v23 }
0x1c6b   :  { %4756 = vtanh.f32 %v2949_v34 }
0x1c75   :  { %v4757_v32 = vpop.eup %4756 }
0x1c76   :  { %v2951_v55 = vmul.f32 %v4757_v32, %v4755_v36 }
0x1c78   :  { %2953 = vrot.lane.b32.xlu0 %v2951_v55, %s4821_s16 }
0x1cea   :  { %v2954_v57 = vpop.permute.xlu0 %2953 }
0x1ceb   :  { %2957 = vst.msk [vmem:[#allocation5 + $0x10] sm:$0xff] %vm2606_vm2, %v2954_v57  ;;  %3804 = vmatmul.mubr.msk.f32.vlgmr.msra.gmra.mrb[22].mxu1 %vm2606_vm2, %v2954_v57 }
0x1cec   :  { %4475 = vmatpush1.bf16.msra.mxu1 %v5478_v63  ;;  %3165 = vmatprep.mubr.f32.mxu1 %v4820_v4 }
0x1ced   :  { %4477 = vmatprep.subr.bf16.mxu1 %v5488_v2 }
0x1cf0   :  { %4479 = vmatpush1.bf16.msra.mxu1 %v5496_v20 }
0x1cf1   :  { %4481 = vmatprep.subr.bf16.mxu1 %v5506_v24 }
0x1cf2   :  { %v3570_v35 = vld [vmem:[#allocation5 + $0x10] sm:$0xff] }
0x1cf3   :  { %4247 = vmatprep.mubr.msk.f32.mxu0 %vm2606_vm2, %v3570_v35 }
0x1cf4   :  { %4483 = vmatpush1.bf16.msra.mxu1 %v5514_v7 }
0x1cf5   :  { %4485 = vmatprep.subr.bf16.mxu1 %v5524_v40 }
0x1cf8   :  { %4487 = vmatpush1.bf16.msra.mxu1 %v5532_v17 }
0x1cf9   :  { %4489 = vmatprep.subr.bf16.mxu1 %v5470_v52 }
0x1dbe   :  { %v3045_v42 = vpop.f32.mrb[22].mxu1 }
0x1dbf   :  { %v3050_v43 = vadd.f32 %v3045_v42, %v5210_v0  ;;  %v3047_v46 = vpop.f32.mrb[23].mxu1 }
0x1dc0   :  { %v3051_v54 = vadd.f32 %v3047_v46, %v5212_v6 }
0x1dc1   :  { %v3805_v27 = vmul.f32 -1.442695, %v3050_v43 }
0x1dc2   :  { %v3806_v22 = vmul.f32 -1.442695, %v3051_v54 }
0x1dc3   :  { %4758 = vpow2.f32 %v3805_v27 }
0x1dc4   :  { %4760 = vtanh.f32 %v3051_v54 }
0x1dcd   :  { %v4759_v39 = vpop.eup %4758 }
0x1dce   :  { %v3055_v8 = vadd.f32 1.0, %v4759_v39  ;;  %v4761_v56 = vpop.eup %4760 }
0x1dd0   :  { %4762 = vrcp.f32 %v3055_v8 }
0x1dd1   :  { %4764 = vpow2.f32 %v3806_v22 }
0x1dda   :  { %v4763_v45 = vpop.eup %4762 }
0x1ddb   :  { %v3066_v49 = vmul.f32 %v4763_v45, %v4761_v56  ;;  %v4765_v44 = vpop.eup %4764  ;;  %v3065_v28 = vmul.f32 %v4763_v45, %v2949_v34 }
0x1ddc   :  { %v3062_v18 = vadd.f32 1.0, %v4765_v44 }
0x1ddd   :  { %3068 = vrot.lane.b32.xlu1 %v3066_v49, %s4821_s16 }
0x1dde   :  { %4766 = vrcp.f32 %v3062_v18 }
0x1de8   :  { %v4767_v6 = vpop.eup %4766 }
0x1e4f   :  { %v3069_v0 = vpop.permute.xlu1 %3068 }
0x1e50   :  { %v3071_v47 = vadd.f32 %v3069_v0, %v3065_v28 }
0x1e52   :  { %4768 = vtanh.f32 %v3071_v47 }
0x1e5c   :  { %v4769_v26 = vpop.eup %4768 }
0x1e5d   :  { %v3073_v3 = vmul.f32 %v4769_v26, %v4767_v6 }
0x1e5f   :  { %3075 = vrot.lane.b32.xlu0 %v3073_v3, %s4821_s16 }
0x1ed1   :  { %v3076_v5 = vpop.permute.xlu0 %3075 }
0x1ed2   :  { %3079 = vst.msk [vmem:[#allocation5 + $0x18] sm:$0xff] %vm2606_vm2, %v3076_v5  ;;  %3807 = vmatmul.mubr.msk.f32.vlgmr.msra.gmra.mrb[24].mxu1 %vm2606_vm2, %v3076_v5 }
0x1ed3   :  { %4491 = vmatpush1.bf16.msra.mxu1 %v5478_v63  ;;  %3287 = vmatprep.mubr.f32.mxu1 %v4820_v4 }
0x1ed4   :  { %4493 = vmatprep.subr.bf16.mxu1 %v5488_v2 }
0x1ed7   :  { %4495 = vmatpush1.bf16.msra.mxu1 %v5496_v20 }
0x1ed8   :  { %4497 = vmatprep.subr.bf16.mxu1 %v5506_v24 }
0x1ed9   :  { %v3571_v50 = vld [vmem:[#allocation5 + $0x18] sm:$0xff] }
0x1eda   :  { %4248 = vmatmul.mubr.msk.f32.gmra.mrb[60].mxu0 %vm2606_vm2, %v3571_v50 }
0x1edb   :  { %4499 = vmatpush1.bf16.msra.mxu1 %v5514_v7 }
0x1edc   :  { %4501 = vmatprep.subr.bf16.mxu1 %v5524_v40 }
0x1edf   :  { %4503 = vmatpush1.bf16.msra.mxu1 %v5532_v17 }
0x1ee0   :  { %4505 = vmatprep.subr.bf16.mxu1 %v5470_v52 }
0x1fa5   :  { %v3167_v48 = vpop.f32.mrb[24].mxu1 }
0x1fa6   :  { %v3172_v58 = vadd.f32 %v3167_v48, %v5214_v11  ;;  %v3169_v51 = vpop.f32.mrb[25].mxu1 }
0x1fa7   :  { %v3173_v21 = vadd.f32 %v3169_v51, %v5216_v15 }
0x1fa8   :  { %v3808_v38 = vmul.f32 -1.442695, %v3172_v58 }
0x1fa9   :  { %v3809_v14 = vmul.f32 -1.442695, %v3173_v21 }
0x1faa   :  { %4770 = vpow2.f32 %v3808_v38 }
0x1fab   :  { %4772 = vtanh.f32 %v3173_v21 }
0x1fad   :  { %v4249_v60 = vpop.f32.mrb[60].mxu0 }
0x1fae   :  { %v3697_v62 = vadd.f32 %v4249_v60, %v5615_v53  ;;  %v3691_v1 = vpop.f32.mrb[61].mxu0 }
0x1faf   :  { %v3692_v9 = vadd.f32 %v5615_v53, %v3691_v1 }
0x1fb0   :  { %3723 = vst [vmem:[%s5742_s19 + $0x18] sm:$0xff] %v3697_v62 }
0x1fb1   :  { %3722 = vst [vmem:[%s5742_s19 + $0x10] sm:$0xff] %v3692_v9 }
0x1fb4   :  { %v4771_v11 = vpop.eup %4770 }
0x1fb5   :  { %v3177_v59 = vadd.f32 1.0, %v4771_v11  ;;  %v4773_v15 = vpop.eup %4772 }
0x1fb7   :  { %4774 = vrcp.f32 %v3177_v59 }
0x1fb8   :  { %4776 = vpow2.f32 %v3809_v14 }
0x1fc1   :  { %v4775_v61 = vpop.eup %4774 }
0x1fc2   :  { %v3188_v13 = vmul.f32 %v4775_v61, %v4773_v15  ;;  %v4777_v12 = vpop.eup %4776  ;;  %v3187_v16 = vmul.f32 %v4775_v61, %v3071_v47 }
0x1fc3   :  { %v3184_v31 = vadd.f32 1.0, %v4777_v12 }
0x1fc4   :  { %3190 = vrot.lane.b32.xlu1 %v3188_v13, %s4821_s16 }
0x1fc5   :  { %4778 = vrcp.f32 %v3184_v31 }
0x1fcf   :  { %v4779_v29 = vpop.eup %4778 }
0x2036   :  { %v3191_v10 = vpop.permute.xlu1 %3190 }
0x2037   :  { %v3193_v23 = vadd.f32 %v3191_v10, %v3187_v16 }
0x2039   :  { %4780 = vtanh.f32 %v3193_v23 }
0x2043   :  { %v4781_v34 = vpop.eup %4780 }
0x2044   :  { %v3195_v36 = vmul.f32 %v4781_v34, %v4779_v29 }
0x2046   :  { %3197 = vrot.lane.b32.xlu0 %v3195_v36, %s4821_s16 }
0x20b8   :  { %v3198_v32 = vpop.permute.xlu0 %3197 }
0x20b9   :  { %3201 = vst.msk [vmem:[#allocation5 + $0x20] sm:$0xff] %vm2606_vm2, %v3198_v32  ;;  %3810 = vmatmul.mubr.msk.f32.vlgmr.msra.gmra.mrb[26].mxu1 %vm2606_vm2, %v3198_v32 }
0x20ba   :  { %4507 = vmatpush1.bf16.msra.mxu1 %v5478_v63  ;;  %3409 = vmatprep.mubr.f32.mxu1 %v4820_v4 }
0x20bb   :  { %4509 = vmatprep.subr.bf16.mxu1 %v5488_v2 }
0x20be   :  { %4511 = vmatpush1.bf16.msra.mxu1 %v5496_v20 }
0x20bf   :  { %4513 = vmatprep.subr.bf16.mxu1 %v5506_v24 }
0x20c0   :  { %v3572_v55 = vld [vmem:[#allocation5 + $0x20] sm:$0xff] }
0x20c1   :  { %4250 = vmatprep.mubr.msk.f32.mxu0 %vm2606_vm2, %v3572_v55 }
0x20c2   :  { %4515 = vmatpush1.bf16.msra.mxu1 %v5514_v7 }
0x20c3   :  { %4517 = vmatprep.subr.bf16.mxu1 %v5524_v40 }
0x20c6   :  { %4519 = vmatpush1.bf16.msra.mxu1 %v5532_v17 }
0x20c7   :  { %4521 = vmatprep.subr.bf16.mxu1 %v5470_v52 }
0x218c   :  { %v3289_v57 = vpop.f32.mrb[26].mxu1 }
0x218d   :  { %v3294_v35 = vadd.f32 %v3289_v57, %v5218_v19  ;;  %v3291_v42 = vpop.f32.mrb[27].mxu1 }
0x218e   :  { %v3295_v43 = vadd.f32 %v3291_v42, %v5220_v25 }
0x218f   :  { %v3811_v46 = vmul.f32 -1.442695, %v3294_v35 }
0x2190   :  { %v3812_v45 = vmul.f32 -1.442695, %v3295_v43 }
0x2191   :  { %4782 = vpow2.f32 %v3811_v46 }
0x2192   :  { %4784 = vtanh.f32 %v3295_v43 }
0x219b   :  { %v4783_v54 = vpop.eup %4782 }
0x219c   :  { %v3299_v27 = vadd.f32 1.0, %v4783_v54  ;;  %v4785_v39 = vpop.eup %4784 }
0x219e   :  { %4786 = vrcp.f32 %v3299_v27 }
0x219f   :  { %4788 = vpow2.f32 %v3812_v45 }
0x21a8   :  { %v4787_v8 = vpop.eup %4786 }
0x21a9   :  { %v3310_v56 = vmul.f32 %v4787_v8, %v4785_v39  ;;  %v4789_v52 = vpop.eup %4788  ;;  %v3309_v22 = vmul.f32 %v4787_v8, %v3193_v23 }
0x21aa   :  { %v3306_v49 = vadd.f32 1.0, %v4789_v52 }
0x21ab   :  { %3312 = vrot.lane.b32.xlu1 %v3310_v56, %s4821_s16 }
0x21ac   :  { %4790 = vrcp.f32 %v3306_v49 }
0x21b6   :  { %v4791_v25 = vpop.eup %4790 }
0x221d   :  { %v3313_v19 = vpop.permute.xlu1 %3312 }
0x221e   :  { %v3315_v44 = vadd.f32 %v3313_v19, %v3309_v22 }
0x2220   :  { %4792 = vtanh.f32 %v3315_v44 }
0x222a   :  { %v4793_v18 = vpop.eup %4792 }
0x222b   :  { %v3317_v28 = vmul.f32 %v4793_v18, %v4791_v25 }
0x222d   :  { %3319 = vrot.lane.b32.xlu0 %v3317_v28, %s4821_s16 }
0x229f   :  { %v3320_v0 = vpop.permute.xlu0 %3319 }
0x22a0   :  { %3323 = vst.msk [vmem:[#allocation5 + $0x28] sm:$0xff] %vm2606_vm2, %v3320_v0  ;;  %3813 = vmatmul.mubr.msk.f32.vlgmr.msra.gmra.mrb[28].mxu1 %vm2606_vm2, %v3320_v0 }
0x22a1   :  { %4523 = vmatpush1.bf16.msra.mxu1 %v5478_v63  ;;  %3531 = vmatprep.mubr.f32.mxu1 %v4820_v4 }
0x22a2   :  { %4525 = vmatprep.subr.bf16.mxu1 %v5488_v2 }
0x22a5   :  { %4527 = vmatpush1.bf16.msra.mxu1 %v5496_v20 }
0x22a6   :  { %4529 = vmatprep.subr.bf16.mxu1 %v5506_v24 }
0x22a7   :  { %v3573_v47 = vld [vmem:[#allocation5 + $0x28] sm:$0xff] }
0x22a8   :  { %4251 = vmatmul.mubr.msk.f32.gmra.mrb[62].mxu0 %vm2606_vm2, %v3573_v47 }
0x22a9   :  { %4531 = vmatpush1.bf16.msra.mxu1 %v5514_v7 }
0x22aa   :  { %4533 = vmatprep.subr.bf16.mxu1 %v5524_v40 }
0x22ad   :  { %4535 = vmatpush1.bf16.msra.mxu1 %v5532_v17 }
0x2373   :  { %v3411_v6 = vpop.f32.mrb[28].mxu1 }
0x2374   :  { %v3416_v63 = vadd.f32 %v3411_v6, %v5222_v30  ;;  %v3413_v26 = vpop.f32.mrb[29].mxu1 }
0x2375   :  { %v3417_v4 = vadd.f32 %v3413_v26, %v5224_v33 }
0x2376   :  { %v3814_v2 = vmul.f32 -1.442695, %v3416_v63 }
0x2377   :  { %v3815_v50 = vmul.f32 -1.442695, %v3417_v4 }
0x2378   :  { %4794 = vpow2.f32 %v3814_v2 }
0x2379   :  { %4796 = vtanh.f32 %v3417_v4 }
0x237b   :  { %v4252_v20 = vpop.f32.mrb[62].mxu0 }
0x237c   :  { %v3707_v24 = vadd.f32 %v4252_v20, %v5615_v53  ;;  %v3701_v3 = vpop.f32.mrb[63].mxu0 }
0x237d   :  { %v3702_v5 = vadd.f32 %v5615_v53, %v3701_v3 }
0x237e   :  { %3725 = vst [vmem:[%s5742_s19 + $0x28] sm:$0xff] %v3707_v24 }
0x237f   :  { %3724 = vst [vmem:[%s5742_s19 + $0x20] sm:$0xff] %v3702_v5 }
0x2382   :  { %v4795_v30 = vpop.eup %4794 }
0x2383   :  { %v3421_v7 = vadd.f32 1.0, %v4795_v30  ;;  %v4797_v33 = vpop.eup %4796 }
0x2385   :  { %4798 = vrcp.f32 %v3421_v7 }
0x2386   :  { %4800 = vpow2.f32 %v3815_v50 }
0x238f   :  { %v4799_v40 = vpop.eup %4798 }
0x2390   :  { %v3432_v17 = vmul.f32 %v4799_v40, %v4797_v33  ;;  %v4801_v48 = vpop.eup %4800  ;;  %v3431_v51 = vmul.f32 %v4799_v40, %v3315_v44 }
0x2391   :  { %v3428_v58 = vadd.f32 1.0, %v4801_v48 }
0x2392   :  { %3434 = vrot.lane.b32.xlu1 %v3432_v17, %s4821_s16 }
0x2393   :  { %4802 = vrcp.f32 %v3428_v58 }
0x239d   :  { %v4803_v60 = vpop.eup %4802 }
0x2404   :  { %v3435_v21 = vpop.permute.xlu1 %3434 }
0x2405   :  { %v3437_v38 = vadd.f32 %v3435_v21, %v3431_v51 }
0x2407   :  { %4804 = vtanh.f32 %v3437_v38 }
0x2411   :  { %v4805_v62 = vpop.eup %4804 }
0x2412   :  { %v3439_v1 = vmul.f32 %v4805_v62, %v4803_v60 }
0x2414   :  { %3441 = vrot.lane.b32.xlu0 %v3439_v1, %s4821_s16 }
0x2486   :  { %v3442_v9 = vpop.permute.xlu0 %3441 }
0x2487   :  { %3445 = vst.msk [vmem:[#allocation5 + $0x30] sm:$0xff] %vm2606_vm2, %v3442_v9  ;;  %3816 = vmatmul.mubr.msk.f32.vlgmr.msra.gmra.mrb[30].mxu1 %vm2606_vm2, %v3442_v9 }
0x248e   :  { %v3574_v11 = vld [vmem:[#allocation5 + $0x30] sm:$0xff] }
0x248f   :  { %4253 = vmatprep.mubr.msk.f32.mxu0 %vm2606_vm2, %v3574_v11 }
0x255a   :  { %v3533_v59 = vpop.f32.mrb[30].mxu1 }
0x255b   :  { %v3538_v15 = vadd.f32 %v3533_v59, %v5226_v37  ;;  %v3535_v61 = vpop.f32.mrb[31].mxu1 }
0x255c   :  { %v3539_v13 = vadd.f32 %v3535_v61, %v5228_v41 }
0x255d   :  { %v3817_v14 = vmul.f32 -1.442695, %v3538_v15 }
0x255e   :  { %v3818_v29 = vmul.f32 -1.442695, %v3539_v13 }
0x255f   :  { %4806 = vpow2.f32 %v3817_v14 }
0x2560   :  { %4808 = vtanh.f32 %v3539_v13 }
0x2569   :  { %v4807_v12 = vpop.eup %4806 }
0x256a   :  { %v3543_v31 = vadd.f32 1.0, %v4807_v12  ;;  %v4809_v16 = vpop.eup %4808 }
0x256c   :  { %4810 = vrcp.f32 %v3543_v31 }
0x256d   :  { %4812 = vpow2.f32 %v3818_v29 }
0x2576   :  { %v4811_v10 = vpop.eup %4810 }
0x2577   :  { %v3554_v23 = vmul.f32 %v4811_v10, %v4809_v16  ;;  %v4813_v34 = vpop.eup %4812  ;;  %v3553_v32 = vmul.f32 %v4811_v10, %v3437_v38 }
0x2578   :  { %v3550_v36 = vadd.f32 1.0, %v4813_v34 }
0x2579   :  { %3556 = vrot.lane.b32.xlu1 %v3554_v23, %s4821_s16 }
0x257a   :  { %4814 = vrcp.f32 %v3550_v36 }
0x2584   :  { %v4815_v41 = vpop.eup %4814 }
0x25eb   :  { %v3557_v37 = vpop.permute.xlu1 %3556 }
0x25ec   :  { %v3559_v55 = vadd.f32 %v3557_v37, %v3553_v32 }
0x25ee   :  { %4816 = vtanh.f32 %v3559_v55 }
0x25f8   :  { %v4817_v57 = vpop.eup %4816 }
0x25f9   :  { %v3561_v35 = vmul.f32 %v4817_v57, %v4815_v41 }
0x25fb   :  { %3563 = vrot.lane.b32.xlu0 %v3561_v35, %s4821_s16 }
0x266d   :  { %v3564_v42 = vpop.permute.xlu0 %3563 }
0x266e   :  { %3567 = vst.msk [vmem:[#allocation5 + $0x38] sm:$0xff] %vm2606_vm2, %v3564_v42 }
0x2675   :  { %v3575_v43 = vld [vmem:[#allocation5 + $0x38] sm:$0xff] }
0x2676   :  { %4254 = vmatmul.mubr.msk.f32.gmra.mrb[64].mxu0 %vm2606_vm2, %v3575_v43 }
0x2749   :  { %v4255_v46 = vpop.f32.mrb[64].mxu0 }
0x274a   :  { %v3717_v54 = vadd.f32 %v4255_v46, %v5615_v53  ;;  %v3711_v27 = vpop.f32.mrb[65].mxu0 }
0x274b   :  { %v3712_v39 = vadd.f32 %v5615_v53, %v3711_v27 }
0x274c   :  { %3727 = vst [vmem:[%s5742_s19 + $0x38] sm:$0xff] %v3717_v54 }
0x274d   :  { %3726 = vst [vmem:[%s5742_s19 + $0x30] sm:$0xff] %v3712_v39 }

</bundles_post_ra>
